<compile_context>
chip_gen: v7x
topology: tpu7x:2x2x1
jax: 0.10.0
libtpu: 0.0.40
codegen_flags: <defaults>
</compile_context>

<pallas_src>
import functools

import numpy as np
import jax
import jax.numpy as jnp
from jax.experimental import pallas as pl
from jax.experimental.pallas import tpu as pltpu


def _round_up(v, m):
    return ((v + m - 1) // m) * m


# ----------------------------------------------------------------------------
# Tiled matmul kernel:  y = act(x @ w [+ b]),  bf16 operands, f32 accumulation
# ----------------------------------------------------------------------------
def _matmul_kernel(*refs, act, has_bias):
    if has_bias:
        x_ref, w_ref, b_ref, o_ref, acc_ref = refs
    else:
        x_ref, w_ref, o_ref, acc_ref = refs
        b_ref = None

    @pl.when(pl.program_id(2) == 0)
    def _():
        acc_ref[...] = jnp.zeros_like(acc_ref)

    acc_ref[...] += jnp.dot(x_ref[...], w_ref[...],
                            preferred_element_type=jnp.float32)

    @pl.when(pl.program_id(2) == pl.num_programs(2) - 1)
    def _():
        y = acc_ref[...]
        if has_bias:
            y = y + b_ref[...]
        if act == "tanh":
            y = jnp.tanh(y)
        o_ref[...] = y


def pallas_matmul(x, w, b=None, act="none"):
    """y = act(x @ w + b), x:[M,K], w:[K,N], b:[N] or None.  Tiled + pipelined."""
    M, K = x.shape
    K2, N = w.shape
    assert K == K2
    # Tile sizes: multiples of (8, 128); sized well under v7x's 32 MiB scoped VMEM
    # even with double-buffered inputs.
    tm = 256 if M >= 256 else _round_up(M, 8)
    tk = 512 if K >= 512 else _round_up(K, 128)
    tn = 256 if N >= 256 else _round_up(N, 128)
    Mp, Kp, Np = _round_up(M, tm), _round_up(K, tk), _round_up(N, tn)

    xp = jnp.zeros((Mp, Kp), jnp.bfloat16).at[:M, :K].set(x.astype(jnp.bfloat16))
    wp = jnp.zeros((Kp, Np), jnp.bfloat16).at[:K, :N].set(w.astype(jnp.bfloat16))

    has_bias = b is not None
    inputs = [xp, wp]
    in_specs = [
        pl.BlockSpec((tm, tk), lambda i, j, k: (i, k)),
        pl.BlockSpec((tk, tn), lambda i, j, k: (k, j)),
    ]
    if has_bias:
        bp = jnp.zeros((1, Np), jnp.float32).at[0, :N].set(
            jnp.reshape(b, (-1,)).astype(jnp.float32))
        inputs.append(bp)
        in_specs.append(pl.BlockSpec((1, tn), lambda i, j, k: (0, j)))

    out = pl.pallas_call(
        functools.partial(_matmul_kernel, act=act, has_bias=has_bias),
        out_shape=jax.ShapeDtypeStruct((Mp, Np), jnp.float32),
        grid=(Mp // tm, Np // tn, Kp // tk),
        in_specs=in_specs,
        out_specs=pl.BlockSpec((tm, tn), lambda i, j, k: (i, j)),
        scratch_shapes=[pltpu.VMEM((tm, tn), jnp.float32)],
        compiler_params=pltpu.CompilerParams(
            dimension_semantics=("parallel", "parallel", "arbitrary")),
    )(*inputs)
    return out[:M, :N]


# ----------------------------------------------------------------------------
# Fused BatchNorm1d (training-mode batch stats) + PReLU + Linear
# ----------------------------------------------------------------------------
def _bn_prelu_linear_kernel(x_ref, g_ref, beta_ref, alpha_ref, w_ref, b_ref,
                            o_ref, *, eps):
    x = x_ref[...]
    mean = jnp.mean(x, axis=0, keepdims=True)
    xc = x - mean
    var = jnp.mean(xc * xc, axis=0, keepdims=True)
    y = xc * jax.lax.rsqrt(var + eps) * g_ref[...] + beta_ref[...]
    # PReLU (alpha == 1.0 -> identity, used for lin1 which has no PReLU)
    y = jnp.where(y >= 0.0, y, y * alpha_ref[...])
    o_ref[...] = (jnp.dot(y.astype(jnp.bfloat16), w_ref[...],
                          preferred_element_type=jnp.float32) + b_ref[...])


def bn_prelu_linear(x, gamma, beta, alpha, w, b, eps=1e-5):
    # TODO(synk): batch-statistics BN needs the full M block; for very large node
    # counts switch to a two-pass (stats kernel + tiled matmul) formulation.
    x = x.astype(jnp.float32)
    M, K = x.shape
    _, N = w.shape
    gamma = jnp.reshape(gamma, (1, K)).astype(jnp.float32)
    beta = jnp.reshape(beta, (1, K)).astype(jnp.float32)
    alpha = jnp.reshape(jnp.asarray(alpha, jnp.float32), (1, 1))
    w = w.astype(jnp.bfloat16)
    b = jnp.reshape(b, (1, N)).astype(jnp.float32)
    return pl.pallas_call(
        functools.partial(_bn_prelu_linear_kernel, eps=eps),
        out_shape=jax.ShapeDtypeStruct((M, N), jnp.float32),
        grid=(1,),
        in_specs=[
            pl.BlockSpec((M, K), lambda i: (0, 0)),
            pl.BlockSpec((1, K), lambda i: (0, 0)),
            pl.BlockSpec((1, K), lambda i: (0, 0)),
            pl.BlockSpec((1, 1), lambda i: (0, 0)),
            pl.BlockSpec((K, N), lambda i: (0, 0)),
            pl.BlockSpec((1, N), lambda i: (0, 0)),
        ],
        out_specs=pl.BlockSpec((M, N), lambda i: (0, 0)),
        compiler_params=pltpu.CompilerParams(dimension_semantics=("arbitrary",)),
    )(x, gamma, beta, alpha, w, b)


# ----------------------------------------------------------------------------
# Fused message-passing loop kernel (A_line / B_pool stay VMEM-resident for all
# n_iter iterations).
# ----------------------------------------------------------------------------
def _mp_loop_kernel(edge_feat_ref, a_ref, b_pool_ref, b_poolT_ref,
                    w_rel_ref, w_root_ref, b_rel_ref, w_gout_ref, b_gout_ref,
                    out_all_ref, gout_all_ref, *, n_iter):
    edge_feat = edge_feat_ref[...]            # [Ep, F] f32 (padded rows are zero)
    A = a_ref[...]                            # [Ep, Ep] bf16, 0/1 entries
    B = b_pool_ref[...]                       # [G, Ep]  f32, 0/1 entries
    BT = b_poolT_ref[...]                     # [Ep, G]  f32
    B_bf = B.astype(jnp.bfloat16)
    w_rel = w_rel_ref[...]                    # [1, F]
    w_root = w_root_ref[...]                  # [1, F]
    w_gout = w_gout_ref[...]                  # [F, F] bf16
    b_gout = b_gout_ref[...]                  # [1, F]

    out = edge_feat
    for t in range(n_iter):                   # n_iter is static -> unrolled
        # out = edge_feat + scatter_add(out[lg0], lg1)  ==  edge_feat + A @ out
        out = edge_feat + jnp.dot(A, out.astype(jnp.bfloat16),
                                  preferred_element_type=jnp.float32)

        # GraphConv(F -> 1) on the line graph as a VPU lane-reduction
        # (avoids two [E,1] MXU matmuls with masked lane-1 stores).
        agg = jnp.dot(A, out.astype(jnp.bfloat16),
                      preferred_element_type=jnp.float32)
        x_conv = (jnp.sum(agg * w_rel, axis=-1, keepdims=True)
                  + jnp.sum(out * w_root, axis=-1, keepdims=True)
                  + b_rel_ref[...])                                   # [Ep, 1]

        # Per-graph softmax over edges via the dense B_pool operator.
        # A global max shift is used (mathematically identical per segment);
        # padded edges end up with score exactly 0 (their B_pool column is 0).
        m = jnp.max(x_conv, axis=0, keepdims=True)
        e = jnp.exp(x_conv - m)
        s = jnp.dot(B, e, preferred_element_type=jnp.float32)         # [G, 1]
        inv_s = 1.0 / jnp.maximum(s, 1e-30)                           # NaN guard
        scores = e * jnp.dot(BT, inv_s, preferred_element_type=jnp.float32)

        # gx = global_add_pool(out * scores);  gout = tanh(lin_gout(gx))
        gx = jnp.dot(B_bf, (out * scores).astype(jnp.bfloat16),
                     preferred_element_type=jnp.float32)              # [G, F]
        gout = jnp.tanh(jnp.dot(gx.astype(jnp.bfloat16), w_gout,
                                preferred_element_type=jnp.float32) + b_gout)

        out_all_ref[t, :, :] = out
        gout_all_ref[t, :, :] = gout


def mp_loop(edge_feat_p, a_line_bf16, b_pool, w_rel, w_root, b_rel,
            w_gout_bf16, b_gout, n_iter):
    Ep, F = edge_feat_p.shape
    G = b_pool.shape[0]
    b_poolT = jnp.transpose(b_pool)

    def full(shape):
        return pl.BlockSpec(shape, lambda i: (0,) * len(shape))

    return pl.pallas_call(
        functools.partial(_mp_loop_kernel, n_iter=n_iter),
        out_shape=(jax.ShapeDtypeStruct((n_iter, Ep, F), jnp.float32),
                   jax.ShapeDtypeStruct((n_iter, G, F), jnp.float32)),
        grid=(1,),
        in_specs=[full((Ep, F)), full((Ep, Ep)), full((G, Ep)), full((Ep, G)),
                  full((1, F)), full((1, F)), full((1, 1)),
                  full((F, F)), full((1, F))],
        out_specs=(full((n_iter, Ep, F)), full((n_iter, G, F))),
        compiler_params=pltpu.CompilerParams(dimension_semantics=("arbitrary",)),
    )(edge_feat_p, a_line_bf16, b_pool, b_poolT, w_rel, w_root, b_rel,
      w_gout_bf16, b_gout)


# ----------------------------------------------------------------------------
# Parameters / LinearBlock / forward
# ----------------------------------------------------------------------------
def init_params(key, edge_dim, n_feats, n_iter):
    F, F6 = n_feats, 6 * n_feats
    keys = iter(jax.random.split(key, 32))

    def U(k, shape, fan_in):
        s = 1.0 / np.sqrt(fan_in)
        return jax.random.uniform(k, shape, jnp.float32, -s, s)

    p = {
        "w_u": U(next(keys), (F, F), F),                    # lin_u (no bias)
        "w_v": U(next(keys), (F, F), F),                    # lin_v (no bias)
        "w_edge": U(next(keys), (edge_dim, F), edge_dim),   # lin_edge (no bias)
        # GlobalAttentionPool.conv = GraphConv(F, 1)
        "gc_w_rel": U(next(keys), (F, 1), F),
        "gc_b_rel": U(next(keys), (1,), F),
        "gc_w_root": U(next(keys), (F, 1), F),
        # lin_gout
        "w_gout": U(next(keys), (F, F), F),
        "b_gout": U(next(keys), (F,), F),
        # attention params
        "a": jax.random.uniform(next(keys), (1, F, n_iter), jnp.float32, -1.0, 1.0)
             * np.sqrt(6.0 / (F + n_iter)),                 # glorot
        "a_bias": jnp.zeros((1, 1, n_iter), jnp.float32),
    }

    lb = {}
    dims = [(F, F6), (F6, F6), (F6, F6), (F6, F6), (F6, F)]
    for idx, (fi, fo) in enumerate(dims, start=1):
        lb[f"g{idx}"] = jnp.ones((fi,), jnp.float32)        # BN weight
        lb[f"bt{idx}"] = jnp.zeros((fi,), jnp.float32)      # BN bias
        lb[f"w{idx}"] = U(next(keys), (fi, fo), fi)
        lb[f"b{idx}"] = U(next(keys), (fo,), fi)
        lb[f"a{idx}"] = 1.0 if idx == 1 else 0.25           # lin1 has no PReLU
    p["lin_block"] = lb
    return p


def linear_block(x, lb):
    h1 = bn_prelu_linear(x, lb["g1"], lb["bt1"], lb["a1"], lb["w1"], lb["b1"])
    h2 = bn_prelu_linear(h1, lb["g2"], lb["bt2"], lb["a2"], lb["w2"], lb["b2"])
    h3 = bn_prelu_linear(h2, lb["g3"], lb["bt3"], lb["a3"], lb["w3"], lb["b3"])
    h = (h3 + h1) / 2.0
    h4 = bn_prelu_linear(h, lb["g4"], lb["bt4"], lb["a4"], lb["w4"], lb["b4"])
    h = (h4 + h) / 2.0
    return bn_prelu_linear(h, lb["g5"], lb["bt5"], lb["a5"], lb["w5"], lb["b5"])


def dmpnn_forward(params, x, edge_index, edge_attr, line_graph_edge_index,
                  edge_index_batch, *, n_iter, num_graphs):
    N, F = x.shape
    E = edge_index.shape[1]
    ei0, ei1 = edge_index[0], edge_index[1]
    lg0, lg1 = line_graph_edge_index[0], line_graph_edge_index[1]

    # Linear projections on the MXU (tiled, bf16 operands / f32 accumulation).
    edge_u = pallas_matmul(x, params["w_u"])              # [N, F]
    edge_v = pallas_matmul(x, params["w_v"])              # [N, F]
    edge_uv = pallas_matmul(edge_attr, params["w_edge"])  # [E, F]
    edge_feat = (edge_u[ei0] + edge_v[ei1] + edge_uv) / 3.0

    # Dense one-hot operators (lane-aligned padded edge axis), consumed by the
    # fused MP kernel / tiled matmul.  Exact in bf16 (0/1 entries).
    # TODO(synk): for large E replace the dense E x E A_line with a block-sparse /
    # scalar-prefetch gather formulation and tile the fused kernel over edge rows.
    Ep = _round_up(E, 128)
    A_line = jnp.zeros((Ep, Ep), jnp.float32).at[lg1, lg0].add(1.0)
    B_pool = jnp.zeros((num_graphs, Ep), jnp.float32).at[
        edge_index_batch, jnp.arange(E)].add(1.0)
    M_node = jnp.zeros((N, E), jnp.float32).at[ei1, jnp.arange(E)].add(1.0)

    edge_feat_p = jnp.zeros((Ep, F), jnp.float32).at[:E].set(edge_feat)

    # Fused n_iter message-passing loop (A_line / B_pool resident in VMEM).
    out_all, gout_all = mp_loop(
        edge_feat_p,
        A_line.astype(jnp.bfloat16),
        B_pool,
        jnp.reshape(params["gc_w_rel"], (1, F)),
        jnp.reshape(params["gc_w_root"], (1, F)),
        jnp.reshape(params["gc_b_rel"], (1, 1)),
        params["w_gout"].astype(jnp.bfloat16),
        jnp.reshape(params["b_gout"], (1, F)),
        n_iter)
    out_all = out_all[:, :E, :]                           # [T, E, F]

    # Attention over the n_iter snapshots (tiny; plain-JAX glue).
    att = jnp.einsum("tgf,ft->gt", gout_all, params["a"][0]) + params["a_bias"][0]
    att = jax.nn.softmax(att, axis=-1)                    # [G, T]
    # repeat_interleave(degree(batch)) == gather by graph id (edges grouped per graph)
    att_e = att[edge_index_batch]                         # [E, T]
    out_w = jnp.einsum("tef,et->ef", out_all, att_e)      # [E, F]

    # x + scatter_add(out_w, edge_index[1])  ==  x + M_node @ out_w
    xn = x + pallas_matmul(M_node, out_w)
    return linear_block(xn, params["lin_block"])


# ----------------------------------------------------------------------------
# Demo
# ----------------------------------------------------------------------------
def build_graph(num_graphs=2, nodes_per_graph=6):
    edges = []
    for g in range(num_graphs):
        base = g * nodes_per_graph
        for i in range(nodes_per_graph):
            u = base + i
            v = base + (i + 1) % nodes_per_graph
            edges.append((u, v))
            edges.append((v, u))
    edge_index = np.array(edges, dtype=np.int32).T               # [2, E]
    E = edge_index.shape[1]
    node_batch = np.repeat(np.arange(num_graphs), nodes_per_graph).astype(np.int32)
    edge_index_batch = node_batch[edge_index[0]]                  # sorted by construction

    lg = []
    for i in range(E):
        for j in range(E):
            if (edge_index[1, i] == edge_index[0, j]
                    and edge_index[0, i] != edge_index[1, j]):
                lg.append((i, j))
    line_graph_edge_index = np.array(lg, dtype=np.int32).T        # [2, LE]
    return edge_index, line_graph_edge_index, edge_index_batch


if __name__ == "__main__":
    n_feats, edge_dim, n_iter = 32, 8, 3
    num_graphs, nodes_per_graph = 2, 6
    N = num_graphs * nodes_per_graph

    edge_index_np, lg_np, ebatch_np = build_graph(num_graphs, nodes_per_graph)
    E = edge_index_np.shape[1]

    key = jax.random.PRNGKey(0)
    kx, ke, kp = jax.random.split(key, 3)
    x = jax.random.normal(kx, (N, n_feats), jnp.float32)
    edge_attr = jax.random.normal(ke, (E, edge_dim), jnp.float32)
    params = init_params(kp, edge_dim, n_feats, n_iter)

    edge_index = jnp.asarray(edge_index_np)
    line_graph_edge_index = jnp.asarray(lg_np)
    edge_index_batch = jnp.asarray(ebatch_np)

    # n_iter / num_graphs are bound as static Python ints (fixes the tracer error).
    fwd = jax.jit(functools.partial(dmpnn_forward, n_iter=n_iter,
                                    num_graphs=num_graphs))
    out = fwd(params, x, edge_index, edge_attr, line_graph_edge_index,
              edge_index_batch)
    out = jax.block_until_ready(out)

    assert out.shape == (N, n_feats) and out.dtype == jnp.float32
    assert bool(jnp.all(jnp.isfinite(out)))
    print("KERNEL_OK")
</pallas_src>

<mosaic_0001>
module attributes {stable_mosaic.version = 11 : i64} {
  func.func @_matmul_kernel(%arg0: i32, %arg1: i32, %arg2: i32, %arg3: memref<16x128xbf16, #tpu.memory_space<vmem>>, %arg4: memref<128x128xbf16, #tpu.memory_space<vmem>>, %arg5: memref<16x128xf32, #tpu.memory_space<vmem>>, %arg6: memref<16x128xf32, #tpu.memory_space<vmem>>) attributes {dimension_semantics = [#tpu.dimension_semantics<parallel>, #tpu.dimension_semantics<parallel>, #tpu.dimension_semantics<arbitrary>], iteration_bounds = array<i64: 1, 1, 1>, scalar_prefetch = 0 : i64, scratch_operands = 1 : i64, tpu.core_type = #tpu.core_type<tc>, window_params = [{transform_indices = @transform_0, window_bounds = array<i64: 16, 128>}, {transform_indices = @transform_1, window_bounds = array<i64: 128, 128>}, {transform_indices = @transform_2, window_bounds = array<i64: 16, 128>}]} {
    %c0_i32 = arith.constant 0 : i32
    %0 = arith.cmpi eq, %arg2, %c0_i32 : i32
    %1 = arith.extui %0 : i1 to i32
    %c0_i32_0 = arith.constant 0 : i32
    %2 = arith.cmpi ne, %1, %c0_i32_0 : i32
    scf.if %2 {
      %cst_10 = arith.constant 0.000000e+00 : f32
      %12 = vector.broadcast %cst_10 : f32 to vector<16x128xf32>
      %c0_11 = arith.constant 0 : index
      %c0_12 = arith.constant 0 : index
      %13 = vector.load %arg6[%c0_11, %c0_12] : memref<16x128xf32, #tpu.memory_space<vmem>>, vector<16x128xf32>
      tpu.vector_store %arg6[%c0_11, %c0_12], %12 {strides = array<i32>} : memref<16x128xf32, #tpu.memory_space<vmem>>, vector<16x128xf32>,
    } else {
    }
    %c0 = arith.constant 0 : index
    %c0_1 = arith.constant 0 : index
    %3 = vector.load %arg6[%c0, %c0_1] : memref<16x128xf32, #tpu.memory_space<vmem>>, vector<16x128xf32>
    %c0_2 = arith.constant 0 : index
    %c0_3 = arith.constant 0 : index
    %4 = vector.load %arg3[%c0_2, %c0_3] : memref<16x128xbf16, #tpu.memory_space<vmem>>, vector<16x128xbf16>
    %c0_4 = arith.constant 0 : index
    %c0_5 = arith.constant 0 : index
    %5 = vector.load %arg4[%c0_4, %c0_5] : memref<128x128xbf16, #tpu.memory_space<vmem>>, vector<128x128xbf16>
    %cst = arith.constant dense<0.000000e+00> : vector<16x128xf32>
    %6 = tpu.matmul %4, %5, %cst {dimension_numbers = #tpu.dot_dimension_numbers<[1], [0], [0], [1], [0, 0, 1, 1], [], []>} : vector<16x128xbf16>, vector<128x128xbf16>, vector<16x128xf32> -> vector<16x128xf32>
    %7 = arith.addf %3, %6 : vector<16x128xf32>
    %c0_6 = arith.constant 0 : index
    %c0_7 = arith.constant 0 : index
    %8 = vector.load %arg6[%c0_6, %c0_7] : memref<16x128xf32, #tpu.memory_space<vmem>>, vector<16x128xf32>
    tpu.vector_store %arg6[%c0_6, %c0_7], %7 {strides = array<i32>} : memref<16x128xf32, #tpu.memory_space<vmem>>, vector<16x128xf32>,
    %c0_i32_8 = arith.constant 0 : i32
    %9 = arith.cmpi eq, %arg2, %c0_i32_8 : i32
    %10 = arith.extui %9 : i1 to i32
    %c0_i32_9 = arith.constant 0 : i32
    %11 = arith.cmpi ne, %10, %c0_i32_9 : i32
    scf.if %11 {
      %c0_10 = arith.constant 0 : index
      %c0_11 = arith.constant 0 : index
      %12 = vector.load %arg6[%c0_10, %c0_11] : memref<16x128xf32, #tpu.memory_space<vmem>>, vector<16x128xf32>
      %c0_12 = arith.constant 0 : index
      %c0_13 = arith.constant 0 : index
      %13 = vector.load %arg5[%c0_12, %c0_13] : memref<16x128xf32, #tpu.memory_space<vmem>>, vector<16x128xf32>
      tpu.vector_store %arg5[%c0_12, %c0_13], %12 {strides = array<i32>} : memref<16x128xf32, #tpu.memory_space<vmem>>, vector<16x128xf32>,
    } else {
    }
    return
  }
  func.func @transform_0(%arg0: i32, %arg1: i32, %arg2: i32) -> (i32, i32) {
    %c0_i32 = arith.constant 0 : i32
    return %arg0, %arg2 : i32, i32
  }
  func.func @transform_1(%arg0: i32, %arg1: i32, %arg2: i32) -> (i32, i32) {
    %c0_i32 = arith.constant 0 : i32
    return %arg2, %arg1 : i32, i32
  }
  func.func @transform_2(%arg0: i32, %arg1: i32, %arg2: i32) -> (i32, i32) {
    %c0_i32 = arith.constant 0 : i32
    return %arg0, %arg1 : i32, i32
  }
}

module attributes {stable_mosaic.version = 11 : i64} {
  func.func @_matmul_kernel(%arg0: i32, %arg1: i32, %arg2: i32, %arg3: memref<24x128xbf16, #tpu.memory_space<vmem>>, %arg4: memref<128x128xbf16, #tpu.memory_space<vmem>>, %arg5: memref<24x128xf32, #tpu.memory_space<vmem>>, %arg6: memref<24x128xf32, #tpu.memory_space<vmem>>) attributes {dimension_semantics = [#tpu.dimension_semantics<parallel>, #tpu.dimension_semantics<parallel>, #tpu.dimension_semantics<arbitrary>], iteration_bounds = array<i64: 1, 1, 1>, scalar_prefetch = 0 : i64, scratch_operands = 1 : i64, tpu.core_type = #tpu.core_type<tc>, window_params = [{transform_indices = @transform_0, window_bounds = array<i64: 24, 128>}, {transform_indices = @transform_1, window_bounds = array<i64: 128, 128>}, {transform_indices = @transform_2, window_bounds = array<i64: 24, 128>}]} {
    %c0_i32 = arith.constant 0 : i32
    %0 = arith.cmpi eq, %arg2, %c0_i32 : i32
    %1 = arith.extui %0 : i1 to i32
    %c0_i32_0 = arith.constant 0 : i32
    %2 = arith.cmpi ne, %1, %c0_i32_0 : i32
    scf.if %2 {
      %cst_10 = arith.constant 0.000000e+00 : f32
      %12 = vector.broadcast %cst_10 : f32 to vector<24x128xf32>
      %c0_11 = arith.constant 0 : index
      %c0_12 = arith.constant 0 : index
      %13 = vector.load %arg6[%c0_11, %c0_12] : memref<24x128xf32, #tpu.memory_space<vmem>>, vector<24x128xf32>
      tpu.vector_store %arg6[%c0_11, %c0_12], %12 {strides = array<i32>} : memref<24x128xf32, #tpu.memory_space<vmem>>, vector<24x128xf32>,
    } else {
    }
    %c0 = arith.constant 0 : index
    %c0_1 = arith.constant 0 : index
    %3 = vector.load %arg6[%c0, %c0_1] : memref<24x128xf32, #tpu.memory_space<vmem>>, vector<24x128xf32>
    %c0_2 = arith.constant 0 : index
    %c0_3 = arith.constant 0 : index
    %4 = vector.load %arg3[%c0_2, %c0_3] : memref<24x128xbf16, #tpu.memory_space<vmem>>, vector<24x128xbf16>
    %c0_4 = arith.constant 0 : index
    %c0_5 = arith.constant 0 : index
    %5 = vector.load %arg4[%c0_4, %c0_5] : memref<128x128xbf16, #tpu.memory_space<vmem>>, vector<128x128xbf16>
    %cst = arith.constant dense<0.000000e+00> : vector<24x128xf32>
    %6 = tpu.matmul %4, %5, %cst {dimension_numbers = #tpu.dot_dimension_numbers<[1], [0], [0], [1], [0, 0, 1, 1], [], []>} : vector<24x128xbf16>, vector<128x128xbf16>, vector<24x128xf32> -> vector<24x128xf32>
    %7 = arith.addf %3, %6 : vector<24x128xf32>
    %c0_6 = arith.constant 0 : index
    %c0_7 = arith.constant 0 : index
    %8 = vector.load %arg6[%c0_6, %c0_7] : memref<24x128xf32, #tpu.memory_space<vmem>>, vector<24x128xf32>
    tpu.vector_store %arg6[%c0_6, %c0_7], %7 {strides = array<i32>} : memref<24x128xf32, #tpu.memory_space<vmem>>, vector<24x128xf32>,
    %c0_i32_8 = arith.constant 0 : i32
    %9 = arith.cmpi eq, %arg2, %c0_i32_8 : i32
    %10 = arith.extui %9 : i1 to i32
    %c0_i32_9 = arith.constant 0 : i32
    %11 = arith.cmpi ne, %10, %c0_i32_9 : i32
    scf.if %11 {
      %c0_10 = arith.constant 0 : index
      %c0_11 = arith.constant 0 : index
      %12 = vector.load %arg6[%c0_10, %c0_11] : memref<24x128xf32, #tpu.memory_space<vmem>>, vector<24x128xf32>
      %c0_12 = arith.constant 0 : index
      %c0_13 = arith.constant 0 : index
      %13 = vector.load %arg5[%c0_12, %c0_13] : memref<24x128xf32, #tpu.memory_space<vmem>>, vector<24x128xf32>
      tpu.vector_store %arg5[%c0_12, %c0_13], %12 {strides = array<i32>} : memref<24x128xf32, #tpu.memory_space<vmem>>, vector<24x128xf32>,
    } else {
    }
    return
  }
  func.func @transform_0(%arg0: i32, %arg1: i32, %arg2: i32) -> (i32, i32) {
    %c0_i32 = arith.constant 0 : i32
    return %arg0, %arg2 : i32, i32
  }
  func.func @transform_1(%arg0: i32, %arg1: i32, %arg2: i32) -> (i32, i32) {
    %c0_i32 = arith.constant 0 : i32
    return %arg2, %arg1 : i32, i32
  }
  func.func @transform_2(%arg0: i32, %arg1: i32, %arg2: i32) -> (i32, i32) {
    %c0_i32 = arith.constant 0 : i32
    return %arg0, %arg1 : i32, i32
  }
}

module attributes {stable_mosaic.version = 11 : i64} {
  func.func @_mp_loop_kernel(%arg0: i32, %arg1: memref<128x32xf32, #tpu.memory_space<vmem>>, %arg2: memref<128x128xbf16, #tpu.memory_space<vmem>>, %arg3: memref<2x128xf32, #tpu.memory_space<vmem>>, %arg4: memref<128x2xf32, #tpu.memory_space<vmem>>, %arg5: memref<1x32xf32, #tpu.memory_space<vmem>>, %arg6: memref<1x32xf32, #tpu.memory_space<vmem>>, %arg7: memref<1x1xf32, #tpu.memory_space<vmem>>, %arg8: memref<32x32xbf16, #tpu.memory_space<vmem>>, %arg9: memref<1x32xf32, #tpu.memory_space<vmem>>, %arg10: memref<3x128x32xf32, #tpu.memory_space<vmem>>, %arg11: memref<3x2x32xf32, #tpu.memory_space<vmem>>) attributes {dimension_semantics = [#tpu.dimension_semantics<arbitrary>], iteration_bounds = array<i64: 1>, scalar_prefetch = 0 : i64, scratch_operands = 0 : i64, tpu.core_type = #tpu.core_type<tc>, window_params = [{pipeline_mode = #tpu.pipeline_mode<synchronous>, transform_indices = @transform_0, window_bounds = array<i64: 128, 32>}, {pipeline_mode = #tpu.pipeline_mode<synchronous>, transform_indices = @transform_1, window_bounds = array<i64: 128, 128>}, {pipeline_mode = #tpu.pipeline_mode<synchronous>, transform_indices = @transform_2, window_bounds = array<i64: 2, 128>}, {pipeline_mode = #tpu.pipeline_mode<synchronous>, transform_indices = @transform_3, window_bounds = array<i64: 128, 2>}, {pipeline_mode = #tpu.pipeline_mode<synchronous>, transform_indices = @transform_4, window_bounds = array<i64: 1, 32>}, {pipeline_mode = #tpu.pipeline_mode<synchronous>, transform_indices = @transform_5, window_bounds = array<i64: 1, 32>}, {pipeline_mode = #tpu.pipeline_mode<synchronous>, transform_indices = @transform_6, window_bounds = array<i64: 1, 1>}, {pipeline_mode = #tpu.pipeline_mode<synchronous>, transform_indices = @transform_7, window_bounds = array<i64: 32, 32>}, {pipeline_mode = #tpu.pipeline_mode<synchronous>, transform_indices = @transform_8, window_bounds = array<i64: 1, 32>}, {pipeline_mode = #tpu.pipeline_mode<synchronous>, transform_indices = @transform_9, window_bounds = array<i64: 3, 128, 32>}, {pipeline_mode = #tpu.pipeline_mode<synchronous>, transform_indices = @transform_10, window_bounds = array<i64: 3, 2, 32>}]} {
    %c0 = arith.constant 0 : index
    %c0_0 = arith.constant 0 : index
    %0 = vector.load %arg1[%c0, %c0_0] : memref<128x32xf32, #tpu.memory_space<vmem>>, vector<128x32xf32>
    %c0_1 = arith.constant 0 : index
    %c0_2 = arith.constant 0 : index
    %1 = vector.load %arg2[%c0_1, %c0_2] : memref<128x128xbf16, #tpu.memory_space<vmem>>, vector<128x128xbf16>
    %c0_3 = arith.constant 0 : index
    %c0_4 = arith.constant 0 : index
    %2 = vector.load %arg3[%c0_3, %c0_4] : memref<2x128xf32, #tpu.memory_space<vmem>>, vector<2x128xf32>
    %c0_5 = arith.constant 0 : index
    %c0_6 = arith.constant 0 : index
    %3 = vector.load %arg4[%c0_5, %c0_6] : memref<128x2xf32, #tpu.memory_space<vmem>>, vector<128x2xf32>
    %4 = arith.truncf %2 : vector<2x128xf32> to vector<2x128xbf16>
    %c0_7 = arith.constant 0 : index
    %c0_8 = arith.constant 0 : index
    %5 = vector.load %arg5[%c0_7, %c0_8] : memref<1x32xf32, #tpu.memory_space<vmem>>, vector<1x32xf32>
    %c0_9 = arith.constant 0 : index
    %c0_10 = arith.constant 0 : index
    %6 = vector.load %arg6[%c0_9, %c0_10] : memref<1x32xf32, #tpu.memory_space<vmem>>, vector<1x32xf32>
    %c0_11 = arith.constant 0 : index
    %c0_12 = arith.constant 0 : index
    %7 = vector.load %arg8[%c0_11, %c0_12] : memref<32x32xbf16, #tpu.memory_space<vmem>>, vector<32x32xbf16>
    %c0_13 = arith.constant 0 : index
    %c0_14 = arith.constant 0 : index
    %8 = vector.load %arg9[%c0_13, %c0_14] : memref<1x32xf32, #tpu.memory_space<vmem>>, vector<1x32xf32>
    %9 = arith.truncf %0 : vector<128x32xf32> to vector<128x32xbf16>
    %cst = arith.constant dense<0.000000e+00> : vector<128x32xf32>
    %10 = tpu.matmul %1, %9, %cst {dimension_numbers = #tpu.dot_dimension_numbers<[1], [0], [0], [1], [0, 0, 1, 1], [], []>} : vector<128x128xbf16>, vector<128x32xbf16>, vector<128x32xf32> -> vector<128x32xf32>
    %11 = arith.addf %0, %10 : vector<128x32xf32>
    %12 = arith.truncf %11 : vector<128x32xf32> to vector<128x32xbf16>
    %cst_15 = arith.constant dense<0.000000e+00> : vector<128x32xf32>
    %13 = tpu.matmul %1, %12, %cst_15 {dimension_numbers = #tpu.dot_dimension_numbers<[1], [0], [0], [1], [0, 0, 1, 1], [], []>} : vector<128x128xbf16>, vector<128x32xbf16>, vector<128x32xf32> -> vector<128x32xf32>
    %14 = vector.broadcast %5 : vector<1x32xf32> to vector<128x32xf32>
    %15 = arith.mulf %13, %14 : vector<128x32xf32>
    %cst_16 = arith.constant dense<0.000000e+00> : vector<128xf32>
    %16 = vector.multi_reduction <add>, %15, %cst_16 [1] : vector<128x32xf32> to vector<128xf32>
    %17 = vector.shape_cast %16 : vector<128xf32> to vector<128x1xf32>
    %18 = vector.broadcast %6 : vector<1x32xf32> to vector<128x32xf32>
    %19 = arith.mulf %11, %18 : vector<128x32xf32>
    %cst_17 = arith.constant dense<0.000000e+00> : vector<128xf32>
    %20 = vector.multi_reduction <add>, %19, %cst_17 [1] : vector<128x32xf32> to vector<128xf32>
    %21 = vector.shape_cast %20 : vector<128xf32> to vector<128x1xf32>
    %22 = arith.addf %17, %21 : vector<128x1xf32>
    %c0_18 = arith.constant 0 : index
    %c0_19 = arith.constant 0 : index
    %23 = vector.load %arg7[%c0_18, %c0_19] : memref<1x1xf32, #tpu.memory_space<vmem>>, vector<1x1xf32>
    %24 = vector.broadcast %23 : vector<1x1xf32> to vector<128x1xf32>
    %25 = arith.addf %22, %24 : vector<128x1xf32>
    %cst_20 = arith.constant dense<0xFF800000> : vector<1xf32>
    %26 = vector.multi_reduction <maximumf>, %25, %cst_20 [0] : vector<128x1xf32> to vector<1xf32>
    %27 = vector.shape_cast %26 : vector<1xf32> to vector<1x1xf32>
    %28 = vector.broadcast %27 : vector<1x1xf32> to vector<128x1xf32>
    %29 = arith.subf %25, %28 : vector<128x1xf32>
    %30 = math.exp %29 : vector<128x1xf32>
    %cst_21 = arith.constant dense<0.000000e+00> : vector<2x1xf32>
    %31 = tpu.matmul %2, %30, %cst_21 {dimension_numbers = #tpu.dot_dimension_numbers<[1], [0], [0], [1], [0, 0, 1, 1], [], []>} : vector<2x128xf32>, vector<128x1xf32>, vector<2x1xf32> -> vector<2x1xf32>
    %cst_22 = arith.constant 1.000000e-30 : f32
    %32 = vector.broadcast %cst_22 : f32 to vector<2x1xf32>
    %33 = arith.maximumf %31, %32 : vector<2x1xf32>
    %cst_23 = arith.constant 1.000000e+00 : f32
    %34 = vector.broadcast %cst_23 : f32 to vector<2x1xf32>
    %35 = arith.divf %34, %33 : vector<2x1xf32>
    %cst_24 = arith.constant dense<0.000000e+00> : vector<128x1xf32>
    %36 = tpu.matmul %3, %35, %cst_24 {dimension_numbers = #tpu.dot_dimension_numbers<[1], [0], [0], [1], [0, 0, 1, 1], [], []>} : vector<128x2xf32>, vector<2x1xf32>, vector<128x1xf32> -> vector<128x1xf32>
    %37 = arith.mulf %30, %36 : vector<128x1xf32>
    %38 = vector.broadcast %37 : vector<128x1xf32> to vector<128x32xf32>
    %39 = arith.mulf %11, %38 : vector<128x32xf32>
    %40 = arith.truncf %39 : vector<128x32xf32> to vector<128x32xbf16>
    %cst_25 = arith.constant dense<0.000000e+00> : vector<2x32xf32>
    %41 = tpu.matmul %4, %40, %cst_25 {dimension_numbers = #tpu.dot_dimension_numbers<[1], [0], [0], [1], [0, 0, 1, 1], [], []>} : vector<2x128xbf16>, vector<128x32xbf16>, vector<2x32xf32> -> vector<2x32xf32>
    %42 = arith.truncf %41 : vector<2x32xf32> to vector<2x32xbf16>
    %cst_26 = arith.constant dense<0.000000e+00> : vector<2x32xf32>
    %43 = tpu.matmul %42, %7, %cst_26 {dimension_numbers = #tpu.dot_dimension_numbers<[1], [0], [0], [1], [0, 0, 1, 1], [], []>} : vector<2x32xbf16>, vector<32x32xbf16>, vector<2x32xf32> -> vector<2x32xf32>
    %44 = vector.broadcast %8 : vector<1x32xf32> to vector<2x32xf32>
    %45 = arith.addf %43, %44 : vector<2x32xf32>
    %46 = math.tanh %45 : vector<2x32xf32>
    %c0_27 = arith.constant 0 : index
    %c0_28 = arith.constant 0 : index
    %c0_29 = arith.constant 0 : index
    %47 = vector.load %arg10[%c0_27, %c0_28, %c0_29] : memref<3x128x32xf32, #tpu.memory_space<vmem>>, vector<1x128x32xf32>
    %48 = vector.shape_cast %47 : vector<1x128x32xf32> to vector<128x32xf32>
    %49 = vector.shape_cast %11 : vector<128x32xf32> to vector<1x128x32xf32>
    tpu.vector_store %arg10[%c0_27, %c0_28, %c0_29], %49 {strides = array<i32>} : memref<3x128x32xf32, #tpu.memory_space<vmem>>, vector<1x128x32xf32>,
    %c0_30 = arith.constant 0 : index
    %c0_31 = arith.constant 0 : index
    %c0_32 = arith.constant 0 : index
    %50 = vector.load %arg11[%c0_30, %c0_31, %c0_32] : memref<3x2x32xf32, #tpu.memory_space<vmem>>, vector<1x2x32xf32>
    %51 = vector.shape_cast %50 : vector<1x2x32xf32> to vector<2x32xf32>
    %52 = vector.shape_cast %46 : vector<2x32xf32> to vector<1x2x32xf32>
    tpu.vector_store %arg11[%c0_30, %c0_31, %c0_32], %52 {strides = array<i32>} : memref<3x2x32xf32, #tpu.memory_space<vmem>>, vector<1x2x32xf32>,
    %53 = arith.truncf %11 : vector<128x32xf32> to vector<128x32xbf16>
    %cst_33 = arith.constant dense<0.000000e+00> : vector<128x32xf32>
    %54 = tpu.matmul %1, %53, %cst_33 {dimension_numbers = #tpu.dot_dimension_numbers<[1], [0], [0], [1], [0, 0, 1, 1], [], []>} : vector<128x128xbf16>, vector<128x32xbf16>, vector<128x32xf32> -> vector<128x32xf32>
    %55 = arith.addf %0, %54 : vector<128x32xf32>
    %56 = arith.truncf %55 : vector<128x32xf32> to vector<128x32xbf16>
    %cst_34 = arith.constant dense<0.000000e+00> : vector<128x32xf32>
    %57 = tpu.matmul %1, %56, %cst_34 {dimension_numbers = #tpu.dot_dimension_numbers<[1], [0], [0], [1], [0, 0, 1, 1], [], []>} : vector<128x128xbf16>, vector<128x32xbf16>, vector<128x32xf32> -> vector<128x32xf32>
    %58 = vector.broadcast %5 : vector<1x32xf32> to vector<128x32xf32>
    %59 = arith.mulf %57, %58 : vector<128x32xf32>
    %cst_35 = arith.constant dense<0.000000e+00> : vector<128xf32>
    %60 = vector.multi_reduction <add>, %59, %cst_35 [1] : vector<128x32xf32> to vector<128xf32>
    %61 = vector.shape_cast %60 : vector<128xf32> to vector<128x1xf32>
    %62 = vector.broadcast %6 : vector<1x32xf32> to vector<128x32xf32>
    %63 = arith.mulf %55, %62 : vector<128x32xf32>
    %cst_36 = arith.constant dense<0.000000e+00> : vector<128xf32>
    %64 = vector.multi_reduction <add>, %63, %cst_36 [1] : vector<128x32xf32> to vector<128xf32>
    %65 = vector.shape_cast %64 : vector<128xf32> to vector<128x1xf32>
    %66 = arith.addf %61, %65 : vector<128x1xf32>
    %c0_37 = arith.constant 0 : index
    %c0_38 = arith.constant 0 : index
    %67 = vector.load %arg7[%c0_37, %c0_38] : memref<1x1xf32, #tpu.memory_space<vmem>>, vector<1x1xf32>
    %68 = vector.broadcast %67 : vector<1x1xf32> to vector<128x1xf32>
    %69 = arith.addf %66, %68 : vector<128x1xf32>
    %cst_39 = arith.constant dense<0xFF800000> : vector<1xf32>
    %70 = vector.multi_reduction <maximumf>, %69, %cst_39 [0] : vector<128x1xf32> to vector<1xf32>
    %71 = vector.shape_cast %70 : vector<1xf32> to vector<1x1xf32>
    %72 = vector.broadcast %71 : vector<1x1xf32> to vector<128x1xf32>
    %73 = arith.subf %69, %72 : vector<128x1xf32>
    %74 = math.exp %73 : vector<128x1xf32>
    %cst_40 = arith.constant dense<0.000000e+00> : vector<2x1xf32>
    %75 = tpu.matmul %2, %74, %cst_40 {dimension_numbers = #tpu.dot_dimension_numbers<[1], [0], [0], [1], [0, 0, 1, 1], [], []>} : vector<2x128xf32>, vector<128x1xf32>, vector<2x1xf32> -> vector<2x1xf32>
    %cst_41 = arith.constant 1.000000e-30 : f32
    %76 = vector.broadcast %cst_41 : f32 to vector<2x1xf32>
    %77 = arith.maximumf %75, %76 : vector<2x1xf32>
    %cst_42 = arith.constant 1.000000e+00 : f32
    %78 = vector.broadcast %cst_42 : f32 to vector<2x1xf32>
    %79 = arith.divf %78, %77 : vector<2x1xf32>
    %cst_43 = arith.constant dense<0.000000e+00> : vector<128x1xf32>
    %80 = tpu.matmul %3, %79, %cst_43 {dimension_numbers = #tpu.dot_dimension_numbers<[1], [0], [0], [1], [0, 0, 1, 1], [], []>} : vector<128x2xf32>, vector<2x1xf32>, vector<128x1xf32> -> vector<128x1xf32>
    %81 = arith.mulf %74, %80 : vector<128x1xf32>
    %82 = vector.broadcast %81 : vector<128x1xf32> to vector<128x32xf32>
    %83 = arith.mulf %55, %82 : vector<128x32xf32>
    %84 = arith.truncf %83 : vector<128x32xf32> to vector<128x32xbf16>
    %cst_44 = arith.constant dense<0.000000e+00> : vector<2x32xf32>
    %85 = tpu.matmul %4, %84, %cst_44 {dimension_numbers = #tpu.dot_dimension_numbers<[1], [0], [0], [1], [0, 0, 1, 1], [], []>} : vector<2x128xbf16>, vector<128x32xbf16>, vector<2x32xf32> -> vector<2x32xf32>
    %86 = arith.truncf %85 : vector<2x32xf32> to vector<2x32xbf16>
    %cst_45 = arith.constant dense<0.000000e+00> : vector<2x32xf32>
    %87 = tpu.matmul %86, %7, %cst_45 {dimension_numbers = #tpu.dot_dimension_numbers<[1], [0], [0], [1], [0, 0, 1, 1], [], []>} : vector<2x32xbf16>, vector<32x32xbf16>, vector<2x32xf32> -> vector<2x32xf32>
    %88 = vector.broadcast %8 : vector<1x32xf32> to vector<2x32xf32>
    %89 = arith.addf %87, %88 : vector<2x32xf32>
    %90 = math.tanh %89 : vector<2x32xf32>
    %c1 = arith.constant 1 : index
    %c0_46 = arith.constant 0 : index
    %c0_47 = arith.constant 0 : index
    %91 = vector.load %arg10[%c1, %c0_46, %c0_47] : memref<3x128x32xf32, #tpu.memory_space<vmem>>, vector<1x128x32xf32>
    %92 = vector.shape_cast %91 : vector<1x128x32xf32> to vector<128x32xf32>
    %93 = vector.shape_cast %55 : vector<128x32xf32> to vector<1x128x32xf32>
    tpu.vector_store %arg10[%c1, %c0_46, %c0_47], %93 {strides = array<i32>} : memref<3x128x32xf32, #tpu.memory_space<vmem>>, vector<1x128x32xf32>,
    %c1_48 = arith.constant 1 : index
    %c0_49 = arith.constant 0 : index
    %c0_50 = arith.constant 0 : index
    %94 = vector.load %arg11[%c1_48, %c0_49, %c0_50] : memref<3x2x32xf32, #tpu.memory_space<vmem>>, vector<1x2x32xf32>
    %95 = vector.shape_cast %94 : vector<1x2x32xf32> to vector<2x32xf32>
    %96 = vector.shape_cast %90 : vector<2x32xf32> to vector<1x2x32xf32>
    tpu.vector_store %arg11[%c1_48, %c0_49, %c0_50], %96 {strides = array<i32>} : memref<3x2x32xf32, #tpu.memory_space<vmem>>, vector<1x2x32xf32>,
    %97 = arith.truncf %55 : vector<128x32xf32> to vector<128x32xbf16>
    %cst_51 = arith.constant dense<0.000000e+00> : vector<128x32xf32>
    %98 = tpu.matmul %1, %97, %cst_51 {dimension_numbers = #tpu.dot_dimension_numbers<[1], [0], [0], [1], [0, 0, 1, 1], [], []>} : vector<128x128xbf16>, vector<128x32xbf16>, vector<128x32xf32> -> vector<128x32xf32>
    %99 = arith.addf %0, %98 : vector<128x32xf32>
    %100 = arith.truncf %99 : vector<128x32xf32> to vector<128x32xbf16>
    %cst_52 = arith.constant dense<0.000000e+00> : vector<128x32xf32>
    %101 = tpu.matmul %1, %100, %cst_52 {dimension_numbers = #tpu.dot_dimension_numbers<[1], [0], [0], [1], [0, 0, 1, 1], [], []>} : vector<128x128xbf16>, vector<128x32xbf16>, vector<128x32xf32> -> vector<128x32xf32>
    %102 = vector.broadcast %5 : vector<1x32xf32> to vector<128x32xf32>
    %103 = arith.mulf %101, %102 : vector<128x32xf32>
    %cst_53 = arith.constant dense<0.000000e+00> : vector<128xf32>
    %104 = vector.multi_reduction <add>, %103, %cst_53 [1] : vector<128x32xf32> to vector<128xf32>
    %105 = vector.shape_cast %104 : vector<128xf32> to vector<128x1xf32>
    %106 = vector.broadcast %6 : vector<1x32xf32> to vector<128x32xf32>
    %107 = arith.mulf %99, %106 : vector<128x32xf32>
    %cst_54 = arith.constant dense<0.000000e+00> : vector<128xf32>
    %108 = vector.multi_reduction <add>, %107, %cst_54 [1] : vector<128x32xf32> to vector<128xf32>
    %109 = vector.shape_cast %108 : vector<128xf32> to vector<128x1xf32>
    %110 = arith.addf %105, %109 : vector<128x1xf32>
    %c0_55 = arith.constant 0 : index
    %c0_56 = arith.constant 0 : index
    %111 = vector.load %arg7[%c0_55, %c0_56] : memref<1x1xf32, #tpu.memory_space<vmem>>, vector<1x1xf32>
    %112 = vector.broadcast %111 : vector<1x1xf32> to vector<128x1xf32>
    %113 = arith.addf %110, %112 : vector<128x1xf32>
    %cst_57 = arith.constant dense<0xFF800000> : vector<1xf32>
    %114 = vector.multi_reduction <maximumf>, %113, %cst_57 [0] : vector<128x1xf32> to vector<1xf32>
    %115 = vector.shape_cast %114 : vector<1xf32> to vector<1x1xf32>
    %116 = vector.broadcast %115 : vector<1x1xf32> to vector<128x1xf32>
    %117 = arith.subf %113, %116 : vector<128x1xf32>
    %118 = math.exp %117 : vector<128x1xf32>
    %cst_58 = arith.constant dense<0.000000e+00> : vector<2x1xf32>
    %119 = tpu.matmul %2, %118, %cst_58 {dimension_numbers = #tpu.dot_dimension_numbers<[1], [0], [0], [1], [0, 0, 1, 1], [], []>} : vector<2x128xf32>, vector<128x1xf32>, vector<2x1xf32> -> vector<2x1xf32>
    %cst_59 = arith.constant 1.000000e-30 : f32
    %120 = vector.broadcast %cst_59 : f32 to vector<2x1xf32>
    %121 = arith.maximumf %119, %120 : vector<2x1xf32>
    %cst_60 = arith.constant 1.000000e+00 : f32
    %122 = vector.broadcast %cst_60 : f32 to vector<2x1xf32>
    %123 = arith.divf %122, %121 : vector<2x1xf32>
    %cst_61 = arith.constant dense<0.000000e+00> : vector<128x1xf32>
    %124 = tpu.matmul %3, %123, %cst_61 {dimension_numbers = #tpu.dot_dimension_numbers<[1], [0], [0], [1], [0, 0, 1, 1], [], []>} : vector<128x2xf32>, vector<2x1xf32>, vector<128x1xf32> -> vector<128x1xf32>
    %125 = arith.mulf %118, %124 : vector<128x1xf32>
    %126 = vector.broadcast %125 : vector<128x1xf32> to vector<128x32xf32>
    %127 = arith.mulf %99, %126 : vector<128x32xf32>
    %128 = arith.truncf %127 : vector<128x32xf32> to vector<128x32xbf16>
    %cst_62 = arith.constant dense<0.000000e+00> : vector<2x32xf32>
    %129 = tpu.matmul %4, %128, %cst_62 {dimension_numbers = #tpu.dot_dimension_numbers<[1], [0], [0], [1], [0, 0, 1, 1], [], []>} : vector<2x128xbf16>, vector<128x32xbf16>, vector<2x32xf32> -> vector<2x32xf32>
    %130 = arith.truncf %129 : vector<2x32xf32> to vector<2x32xbf16>
    %cst_63 = arith.constant dense<0.000000e+00> : vector<2x32xf32>
    %131 = tpu.matmul %130, %7, %cst_63 {dimension_numbers = #tpu.dot_dimension_numbers<[1], [0], [0], [1], [0, 0, 1, 1], [], []>} : vector<2x32xbf16>, vector<32x32xbf16>, vector<2x32xf32> -> vector<2x32xf32>
    %132 = vector.broadcast %8 : vector<1x32xf32> to vector<2x32xf32>
    %133 = arith.addf %131, %132 : vector<2x32xf32>
    %134 = math.tanh %133 : vector<2x32xf32>
    %c2 = arith.constant 2 : index
    %c0_64 = arith.constant 0 : index
    %c0_65 = arith.constant 0 : index
    %135 = vector.load %arg10[%c2, %c0_64, %c0_65] : memref<3x128x32xf32, #tpu.memory_space<vmem>>, vector<1x128x32xf32>
    %136 = vector.shape_cast %135 : vector<1x128x32xf32> to vector<128x32xf32>
    %137 = vector.shape_cast %99 : vector<128x32xf32> to vector<1x128x32xf32>
    tpu.vector_store %arg10[%c2, %c0_64, %c0_65], %137 {strides = array<i32>} : memref<3x128x32xf32, #tpu.memory_space<vmem>>, vector<1x128x32xf32>,
    %c2_66 = arith.constant 2 : index
    %c0_67 = arith.constant 0 : index
    %c0_68 = arith.constant 0 : index
    %138 = vector.load %arg11[%c2_66, %c0_67, %c0_68] : memref<3x2x32xf32, #tpu.memory_space<vmem>>, vector<1x2x32xf32>
    %139 = vector.shape_cast %138 : vector<1x2x32xf32> to vector<2x32xf32>
    %140 = vector.shape_cast %134 : vector<2x32xf32> to vector<1x2x32xf32>
    tpu.vector_store %arg11[%c2_66, %c0_67, %c0_68], %140 {strides = array<i32>} : memref<3x2x32xf32, #tpu.memory_space<vmem>>, vector<1x2x32xf32>,
    return
  }
  func.func @transform_0(%arg0: i32) -> (i32, i32) {
    %c0_i32 = arith.constant 0 : i32
    %c0_i32_0 = arith.constant 0 : i32
    %c0_i32_1 = arith.constant 0 : i32
    return %c0_i32, %c0_i32_0 : i32, i32
  }
  func.func @transform_1(%arg0: i32) -> (i32, i32) {
    %c0_i32 = arith.constant 0 : i32
    %c0_i32_0 = arith.constant 0 : i32
    %c0_i32_1 = arith.constant 0 : i32
    return %c0_i32, %c0_i32_0 : i32, i32
  }
  func.func @transform_2(%arg0: i32) -> (i32, i32) {
    %c0_i32 = arith.constant 0 : i32
    %c0_i32_0 = arith.constant 0 : i32
    %c0_i32_1 = arith.constant 0 : i32
    return %c0_i32, %c0_i32_0 : i32, i32
  }
  func.func @transform_3(%arg0: i32) -> (i32, i32) {
    %c0_i32 = arith.constant 0 : i32
    %c0_i32_0 = arith.constant 0 : i32
    %c0_i32_1 = arith.constant 0 : i32
    return %c0_i32, %c0_i32_0 : i32, i32
  }
  func.func @transform_4(%arg0: i32) -> (i32, i32) {
    %c0_i32 = arith.constant 0 : i32
    %c0_i32_0 = arith.constant 0 : i32
    %c0_i32_1 = arith.constant 0 : i32
    return %c0_i32, %c0_i32_0 : i32, i32
  }
  func.func @transform_5(%arg0: i32) -> (i32, i32) {
    %c0_i32 = arith.constant 0 : i32
    %c0_i32_0 = arith.constant 0 : i32
    %c0_i32_1 = arith.constant 0 : i32
    return %c0_i32, %c0_i32_0 : i32, i32
  }
  func.func @transform_6(%arg0: i32) -> (i32, i32) {
    %c0_i32 = arith.constant 0 : i32
    %c0_i32_0 = arith.constant 0 : i32
    %c0_i32_1 = arith.constant 0 : i32
    return %c0_i32, %c0_i32_0 : i32, i32
  }
  func.func @transform_7(%arg0: i32) -> (i32, i32) {
    %c0_i32 = arith.constant 0 : i32
    %c0_i32_0 = arith.constant 0 : i32
    %c0_i32_1 = arith.constant 0 : i32
    return %c0_i32, %c0_i32_0 : i32, i32
  }
  func.func @transform_8(%arg0: i32) -> (i32, i32) {
    %c0_i32 = arith.constant 0 : i32
    %c0_i32_0 = arith.constant 0 : i32
    %c0_i32_1 = arith.constant 0 : i32
    return %c0_i32, %c0_i32_0 : i32, i32
  }
  func.func @transform_9(%arg0: i32) -> (i32, i32, i32) {
    %c0_i32 = arith.constant 0 : i32
    %c0_i32_0 = arith.constant 0 : i32
    %c0_i32_1 = arith.constant 0 : i32
    %c0_i32_2 = arith.constant 0 : i32
    return %c0_i32, %c0_i32_0, %c0_i32_1 : i32, i32, i32
  }
  func.func @transform_10(%arg0: i32) -> (i32, i32, i32) {
    %c0_i32 = arith.constant 0 : i32
    %c0_i32_0 = arith.constant 0 : i32
    %c0_i32_1 = arith.constant 0 : i32
    %c0_i32_2 = arith.constant 0 : i32
    return %c0_i32, %c0_i32_0, %c0_i32_1 : i32, i32, i32
  }
}

module attributes {stable_mosaic.version = 11 : i64} {
  func.func @_bn_prelu_linear_kernel(%arg0: i32, %arg1: memref<12x32xf32, #tpu.memory_space<vmem>>, %arg2: memref<1x32xf32, #tpu.memory_space<vmem>>, %arg3: memref<1x32xf32, #tpu.memory_space<vmem>>, %arg4: memref<1x1xf32, #tpu.memory_space<vmem>>, %arg5: memref<32x192xbf16, #tpu.memory_space<vmem>>, %arg6: memref<1x192xf32, #tpu.memory_space<vmem>>, %arg7: memref<12x192xf32, #tpu.memory_space<vmem>>) attributes {dimension_semantics = [#tpu.dimension_semantics<arbitrary>], iteration_bounds = array<i64: 1>, scalar_prefetch = 0 : i64, scratch_operands = 0 : i64, tpu.core_type = #tpu.core_type<tc>, window_params = [{pipeline_mode = #tpu.pipeline_mode<synchronous>, transform_indices = @transform_0, window_bounds = array<i64: 12, 32>}, {pipeline_mode = #tpu.pipeline_mode<synchronous>, transform_indices = @transform_1, window_bounds = array<i64: 1, 32>}, {pipeline_mode = #tpu.pipeline_mode<synchronous>, transform_indices = @transform_2, window_bounds = array<i64: 1, 32>}, {pipeline_mode = #tpu.pipeline_mode<synchronous>, transform_indices = @transform_3, window_bounds = array<i64: 1, 1>}, {pipeline_mode = #tpu.pipeline_mode<synchronous>, transform_indices = @transform_4, window_bounds = array<i64: 32, 192>}, {pipeline_mode = #tpu.pipeline_mode<synchronous>, transform_indices = @transform_5, window_bounds = array<i64: 1, 192>}, {pipeline_mode = #tpu.pipeline_mode<synchronous>, transform_indices = @transform_6, window_bounds = array<i64: 12, 192>}]} {
    %c0 = arith.constant 0 : index
    %c0_0 = arith.constant 0 : index
    %0 = vector.load %arg1[%c0, %c0_0] : memref<12x32xf32, #tpu.memory_space<vmem>>, vector<12x32xf32>
    %cst = arith.constant dense<0.000000e+00> : vector<32xf32>
    %1 = vector.multi_reduction <add>, %0, %cst [0] : vector<12x32xf32> to vector<32xf32>
    %2 = vector.shape_cast %1 : vector<32xf32> to vector<1x32xf32>
    %cst_1 = arith.constant 1.200000e+01 : f32
    %3 = vector.broadcast %cst_1 : f32 to vector<1x32xf32>
    %4 = arith.divf %2, %3 : vector<1x32xf32>
    %5 = vector.broadcast %4 : vector<1x32xf32> to vector<12x32xf32>
    %6 = arith.subf %0, %5 : vector<12x32xf32>
    %7 = arith.mulf %6, %6 : vector<12x32xf32>
    %cst_2 = arith.constant dense<0.000000e+00> : vector<32xf32>
    %8 = vector.multi_reduction <add>, %7, %cst_2 [0] : vector<12x32xf32> to vector<32xf32>
    %9 = vector.shape_cast %8 : vector<32xf32> to vector<1x32xf32>
    %cst_3 = arith.constant 1.200000e+01 : f32
    %10 = vector.broadcast %cst_3 : f32 to vector<1x32xf32>
    %11 = arith.divf %9, %10 : vector<1x32xf32>
    %cst_4 = arith.constant 9.99999974E-6 : f32
    %12 = vector.broadcast %cst_4 : f32 to vector<1x32xf32>
    %13 = arith.addf %11, %12 : vector<1x32xf32>
    %14 = math.rsqrt %13 : vector<1x32xf32>
    %15 = vector.broadcast %14 : vector<1x32xf32> to vector<12x32xf32>
    %16 = arith.mulf %6, %15 : vector<12x32xf32>
    %c0_5 = arith.constant 0 : index
    %c0_6 = arith.constant 0 : index
    %17 = vector.load %arg2[%c0_5, %c0_6] : memref<1x32xf32, #tpu.memory_space<vmem>>, vector<1x32xf32>
    %18 = vector.broadcast %17 : vector<1x32xf32> to vector<12x32xf32>
    %19 = arith.mulf %16, %18 : vector<12x32xf32>
    %c0_7 = arith.constant 0 : index
    %c0_8 = arith.constant 0 : index
    %20 = vector.load %arg3[%c0_7, %c0_8] : memref<1x32xf32, #tpu.memory_space<vmem>>, vector<1x32xf32>
    %21 = vector.broadcast %20 : vector<1x32xf32> to vector<12x32xf32>
    %22 = arith.addf %19, %21 : vector<12x32xf32>
    %cst_9 = arith.constant 0.000000e+00 : f32
    %23 = vector.broadcast %cst_9 : f32 to vector<12x32xf32>
    %24 = arith.cmpf oge, %22, %23 : vector<12x32xf32>
    %c0_10 = arith.constant 0 : index
    %c0_11 = arith.constant 0 : index
    %25 = vector.load %arg4[%c0_10, %c0_11] : memref<1x1xf32, #tpu.memory_space<vmem>>, vector<1x1xf32>
    %26 = vector.broadcast %25 : vector<1x1xf32> to vector<12x32xf32>
    %27 = arith.mulf %22, %26 : vector<12x32xf32>
    %28 = arith.select %24, %22, %27 : vector<12x32xi1>, vector<12x32xf32>
    %29 = arith.truncf %28 : vector<12x32xf32> to vector<12x32xbf16>
    %c0_12 = arith.constant 0 : index
    %c0_13 = arith.constant 0 : index
    %30 = vector.load %arg5[%c0_12, %c0_13] : memref<32x192xbf16, #tpu.memory_space<vmem>>, vector<32x192xbf16>
    %cst_14 = arith.constant dense<0.000000e+00> : vector<12x192xf32>
    %31 = tpu.matmul %29, %30, %cst_14 {dimension_numbers = #tpu.dot_dimension_numbers<[1], [0], [0], [1], [0, 0, 1, 1], [], []>} : vector<12x32xbf16>, vector<32x192xbf16>, vector<12x192xf32> -> vector<12x192xf32>
    %c0_15 = arith.constant 0 : index
    %c0_16 = arith.constant 0 : index
    %32 = vector.load %arg6[%c0_15, %c0_16] : memref<1x192xf32, #tpu.memory_space<vmem>>, vector<1x192xf32>
    %33 = vector.broadcast %32 : vector<1x192xf32> to vector<12x192xf32>
    %34 = arith.addf %31, %33 : vector<12x192xf32>
    %c0_17 = arith.constant 0 : index
    %c0_18 = arith.constant 0 : index
    %35 = vector.load %arg7[%c0_17, %c0_18] : memref<12x192xf32, #tpu.memory_space<vmem>>, vector<12x192xf32>
    tpu.vector_store %arg7[%c0_17, %c0_18], %34 {strides = array<i32>} : memref<12x192xf32, #tpu.memory_space<vmem>>, vector<12x192xf32>,
    return
  }
  func.func @transform_0(%arg0: i32) -> (i32, i32) {
    %c0_i32 = arith.constant 0 : i32
    %c0_i32_0 = arith.constant 0 : i32
    %c0_i32_1 = arith.constant 0 : i32
    return %c0_i32, %c0_i32_0 : i32, i32
  }
  func.func @transform_1(%arg0: i32) -> (i32, i32) {
    %c0_i32 = arith.constant 0 : i32
    %c0_i32_0 = arith.constant 0 : i32
    %c0_i32_1 = arith.constant 0 : i32
    return %c0_i32, %c0_i32_0 : i32, i32
  }
  func.func @transform_2(%arg0: i32) -> (i32, i32) {
    %c0_i32 = arith.constant 0 : i32
    %c0_i32_0 = arith.constant 0 : i32
    %c0_i32_1 = arith.constant 0 : i32
    return %c0_i32, %c0_i32_0 : i32, i32
  }
  func.func @transform_3(%arg0: i32) -> (i32, i32) {
    %c0_i32 = arith.constant 0 : i32
    %c0_i32_0 = arith.constant 0 : i32
    %c0_i32_1 = arith.constant 0 : i32
    return %c0_i32, %c0_i32_0 : i32, i32
  }
  func.func @transform_4(%arg0: i32) -> (i32, i32) {
    %c0_i32 = arith.constant 0 : i32
    %c0_i32_0 = arith.constant 0 : i32
    %c0_i32_1 = arith.constant 0 : i32
    return %c0_i32, %c0_i32_0 : i32, i32
  }
  func.func @transform_5(%arg0: i32) -> (i32, i32) {
    %c0_i32 = arith.constant 0 : i32
    %c0_i32_0 = arith.constant 0 : i32
    %c0_i32_1 = arith.constant 0 : i32
    return %c0_i32, %c0_i32_0 : i32, i32
  }
  func.func @transform_6(%arg0: i32) -> (i32, i32) {
    %c0_i32 = arith.constant 0 : i32
    %c0_i32_0 = arith.constant 0 : i32
    %c0_i32_1 = arith.constant 0 : i32
    return %c0_i32, %c0_i32_0 : i32, i32
  }
}

module attributes {stable_mosaic.version = 11 : i64} {
  func.func @_bn_prelu_linear_kernel(%arg0: i32, %arg1: memref<12x192xf32, #tpu.memory_space<vmem>>, %arg2: memref<1x192xf32, #tpu.memory_space<vmem>>, %arg3: memref<1x192xf32, #tpu.memory_space<vmem>>, %arg4: memref<1x1xf32, #tpu.memory_space<vmem>>, %arg5: memref<192x192xbf16, #tpu.memory_space<vmem>>, %arg6: memref<1x192xf32, #tpu.memory_space<vmem>>, %arg7: memref<12x192xf32, #tpu.memory_space<vmem>>) attributes {dimension_semantics = [#tpu.dimension_semantics<arbitrary>], iteration_bounds = array<i64: 1>, scalar_prefetch = 0 : i64, scratch_operands = 0 : i64, tpu.core_type = #tpu.core_type<tc>, window_params = [{pipeline_mode = #tpu.pipeline_mode<synchronous>, transform_indices = @transform_0, window_bounds = array<i64: 12, 192>}, {pipeline_mode = #tpu.pipeline_mode<synchronous>, transform_indices = @transform_1, window_bounds = array<i64: 1, 192>}, {pipeline_mode = #tpu.pipeline_mode<synchronous>, transform_indices = @transform_2, window_bounds = array<i64: 1, 192>}, {pipeline_mode = #tpu.pipeline_mode<synchronous>, transform_indices = @transform_3, window_bounds = array<i64: 1, 1>}, {pipeline_mode = #tpu.pipeline_mode<synchronous>, transform_indices = @transform_4, window_bounds = array<i64: 192, 192>}, {pipeline_mode = #tpu.pipeline_mode<synchronous>, transform_indices = @transform_5, window_bounds = array<i64: 1, 192>}, {pipeline_mode = #tpu.pipeline_mode<synchronous>, transform_indices = @transform_6, window_bounds = array<i64: 12, 192>}]} {
    %c0 = arith.constant 0 : index
    %c0_0 = arith.constant 0 : index
    %0 = vector.load %arg1[%c0, %c0_0] : memref<12x192xf32, #tpu.memory_space<vmem>>, vector<12x192xf32>
    %cst = arith.constant dense<0.000000e+00> : vector<192xf32>
    %1 = vector.multi_reduction <add>, %0, %cst [0] : vector<12x192xf32> to vector<192xf32>
    %2 = vector.shape_cast %1 : vector<192xf32> to vector<1x192xf32>
    %cst_1 = arith.constant 1.200000e+01 : f32
    %3 = vector.broadcast %cst_1 : f32 to vector<1x192xf32>
    %4 = arith.divf %2, %3 : vector<1x192xf32>
    %5 = vector.broadcast %4 : vector<1x192xf32> to vector<12x192xf32>
    %6 = arith.subf %0, %5 : vector<12x192xf32>
    %7 = arith.mulf %6, %6 : vector<12x192xf32>
    %cst_2 = arith.constant dense<0.000000e+00> : vector<192xf32>
    %8 = vector.multi_reduction <add>, %7, %cst_2 [0] : vector<12x192xf32> to vector<192xf32>
    %9 = vector.shape_cast %8 : vector<192xf32> to vector<1x192xf32>
    %cst_3 = arith.constant 1.200000e+01 : f32
    %10 = vector.broadcast %cst_3 : f32 to vector<1x192xf32>
    %11 = arith.divf %9, %10 : vector<1x192xf32>
    %cst_4 = arith.constant 9.99999974E-6 : f32
    %12 = vector.broadcast %cst_4 : f32 to vector<1x192xf32>
    %13 = arith.addf %11, %12 : vector<1x192xf32>
    %14 = math.rsqrt %13 : vector<1x192xf32>
    %15 = vector.broadcast %14 : vector<1x192xf32> to vector<12x192xf32>
    %16 = arith.mulf %6, %15 : vector<12x192xf32>
    %c0_5 = arith.constant 0 : index
    %c0_6 = arith.constant 0 : index
    %17 = vector.load %arg2[%c0_5, %c0_6] : memref<1x192xf32, #tpu.memory_space<vmem>>, vector<1x192xf32>
    %18 = vector.broadcast %17 : vector<1x192xf32> to vector<12x192xf32>
    %19 = arith.mulf %16, %18 : vector<12x192xf32>
    %c0_7 = arith.constant 0 : index
    %c0_8 = arith.constant 0 : index
    %20 = vector.load %arg3[%c0_7, %c0_8] : memref<1x192xf32, #tpu.memory_space<vmem>>, vector<1x192xf32>
    %21 = vector.broadcast %20 : vector<1x192xf32> to vector<12x192xf32>
    %22 = arith.addf %19, %21 : vector<12x192xf32>
    %cst_9 = arith.constant 0.000000e+00 : f32
    %23 = vector.broadcast %cst_9 : f32 to vector<12x192xf32>
    %24 = arith.cmpf oge, %22, %23 : vector<12x192xf32>
    %c0_10 = arith.constant 0 : index
    %c0_11 = arith.constant 0 : index
    %25 = vector.load %arg4[%c0_10, %c0_11] : memref<1x1xf32, #tpu.memory_space<vmem>>, vector<1x1xf32>
    %26 = vector.broadcast %25 : vector<1x1xf32> to vector<12x192xf32>
    %27 = arith.mulf %22, %26 : vector<12x192xf32>
    %28 = arith.select %24, %22, %27 : vector<12x192xi1>, vector<12x192xf32>
    %29 = arith.truncf %28 : vector<12x192xf32> to vector<12x192xbf16>
    %c0_12 = arith.constant 0 : index
    %c0_13 = arith.constant 0 : index
    %30 = vector.load %arg5[%c0_12, %c0_13] : memref<192x192xbf16, #tpu.memory_space<vmem>>, vector<192x192xbf16>
    %cst_14 = arith.constant dense<0.000000e+00> : vector<12x192xf32>
    %31 = tpu.matmul %29, %30, %cst_14 {dimension_numbers = #tpu.dot_dimension_numbers<[1], [0], [0], [1], [0, 0, 1, 1], [], []>} : vector<12x192xbf16>, vector<192x192xbf16>, vector<12x192xf32> -> vector<12x192xf32>
    %c0_15 = arith.constant 0 : index
    %c0_16 = arith.constant 0 : index
    %32 = vector.load %arg6[%c0_15, %c0_16] : memref<1x192xf32, #tpu.memory_space<vmem>>, vector<1x192xf32>
    %33 = vector.broadcast %32 : vector<1x192xf32> to vector<12x192xf32>
    %34 = arith.addf %31, %33 : vector<12x192xf32>
    %c0_17 = arith.constant 0 : index
    %c0_18 = arith.constant 0 : index
    %35 = vector.load %arg7[%c0_17, %c0_18] : memref<12x192xf32, #tpu.memory_space<vmem>>, vector<12x192xf32>
    tpu.vector_store %arg7[%c0_17, %c0_18], %34 {strides = array<i32>} : memref<12x192xf32, #tpu.memory_space<vmem>>, vector<12x192xf32>,
    return
  }
  func.func @transform_0(%arg0: i32) -> (i32, i32) {
    %c0_i32 = arith.constant 0 : i32
    %c0_i32_0 = arith.constant 0 : i32
    %c0_i32_1 = arith.constant 0 : i32
    return %c0_i32, %c0_i32_0 : i32, i32
  }
  func.func @transform_1(%arg0: i32) -> (i32, i32) {
    %c0_i32 = arith.constant 0 : i32
    %c0_i32_0 = arith.constant 0 : i32
    %c0_i32_1 = arith.constant 0 : i32
    return %c0_i32, %c0_i32_0 : i32, i32
  }
  func.func @transform_2(%arg0: i32) -> (i32, i32) {
    %c0_i32 = arith.constant 0 : i32
    %c0_i32_0 = arith.constant 0 : i32
    %c0_i32_1 = arith.constant 0 : i32
    return %c0_i32, %c0_i32_0 : i32, i32
  }
  func.func @transform_3(%arg0: i32) -> (i32, i32) {
    %c0_i32 = arith.constant 0 : i32
    %c0_i32_0 = arith.constant 0 : i32
    %c0_i32_1 = arith.constant 0 : i32
    return %c0_i32, %c0_i32_0 : i32, i32
  }
  func.func @transform_4(%arg0: i32) -> (i32, i32) {
    %c0_i32 = arith.constant 0 : i32
    %c0_i32_0 = arith.constant 0 : i32
    %c0_i32_1 = arith.constant 0 : i32
    return %c0_i32, %c0_i32_0 : i32, i32
  }
  func.func @transform_5(%arg0: i32) -> (i32, i32) {
    %c0_i32 = arith.constant 0 : i32
    %c0_i32_0 = arith.constant 0 : i32
    %c0_i32_1 = arith.constant 0 : i32
    return %c0_i32, %c0_i32_0 : i32, i32
  }
  func.func @transform_6(%arg0: i32) -> (i32, i32) {
    %c0_i32 = arith.constant 0 : i32
    %c0_i32_0 = arith.constant 0 : i32
    %c0_i32_1 = arith.constant 0 : i32
    return %c0_i32, %c0_i32_0 : i32, i32
  }
}

module attributes {stable_mosaic.version = 11 : i64} {
  func.func @_bn_prelu_linear_kernel(%arg0: i32, %arg1: memref<12x192xf32, #tpu.memory_space<vmem>>, %arg2: memref<1x192xf32, #tpu.memory_space<vmem>>, %arg3: memref<1x192xf32, #tpu.memory_space<vmem>>, %arg4: memref<1x1xf32, #tpu.memory_space<vmem>>, %arg5: memref<192x32xbf16, #tpu.memory_space<vmem>>, %arg6: memref<1x32xf32, #tpu.memory_space<vmem>>, %arg7: memref<12x32xf32, #tpu.memory_space<vmem>>) attributes {dimension_semantics = [#tpu.dimension_semantics<arbitrary>], iteration_bounds = array<i64: 1>, scalar_prefetch = 0 : i64, scratch_operands = 0 : i64, tpu.core_type = #tpu.core_type<tc>, window_params = [{pipeline_mode = #tpu.pipeline_mode<synchronous>, transform_indices = @transform_0, window_bounds = array<i64: 12, 192>}, {pipeline_mode = #tpu.pipeline_mode<synchronous>, transform_indices = @transform_1, window_bounds = array<i64: 1, 192>}, {pipeline_mode = #tpu.pipeline_mode<synchronous>, transform_indices = @transform_2, window_bounds = array<i64: 1, 192>}, {pipeline_mode = #tpu.pipeline_mode<synchronous>, transform_indices = @transform_3, window_bounds = array<i64: 1, 1>}, {pipeline_mode = #tpu.pipeline_mode<synchronous>, transform_indices = @transform_4, window_bounds = array<i64: 192, 32>}, {pipeline_mode = #tpu.pipeline_mode<synchronous>, transform_indices = @transform_5, window_bounds = array<i64: 1, 32>}, {pipeline_mode = #tpu.pipeline_mode<synchronous>, transform_indices = @transform_6, window_bounds = array<i64: 12, 32>}]} {
    %c0 = arith.constant 0 : index
    %c0_0 = arith.constant 0 : index
    %0 = vector.load %arg1[%c0, %c0_0] : memref<12x192xf32, #tpu.memory_space<vmem>>, vector<12x192xf32>
    %cst = arith.constant dense<0.000000e+00> : vector<192xf32>
    %1 = vector.multi_reduction <add>, %0, %cst [0] : vector<12x192xf32> to vector<192xf32>
    %2 = vector.shape_cast %1 : vector<192xf32> to vector<1x192xf32>
    %cst_1 = arith.constant 1.200000e+01 : f32
    %3 = vector.broadcast %cst_1 : f32 to vector<1x192xf32>
    %4 = arith.divf %2, %3 : vector<1x192xf32>
    %5 = vector.broadcast %4 : vector<1x192xf32> to vector<12x192xf32>
    %6 = arith.subf %0, %5 : vector<12x192xf32>
    %7 = arith.mulf %6, %6 : vector<12x192xf32>
    %cst_2 = arith.constant dense<0.000000e+00> : vector<192xf32>
    %8 = vector.multi_reduction <add>, %7, %cst_2 [0] : vector<12x192xf32> to vector<192xf32>
    %9 = vector.shape_cast %8 : vector<192xf32> to vector<1x192xf32>
    %cst_3 = arith.constant 1.200000e+01 : f32
    %10 = vector.broadcast %cst_3 : f32 to vector<1x192xf32>
    %11 = arith.divf %9, %10 : vector<1x192xf32>
    %cst_4 = arith.constant 9.99999974E-6 : f32
    %12 = vector.broadcast %cst_4 : f32 to vector<1x192xf32>
    %13 = arith.addf %11, %12 : vector<1x192xf32>
    %14 = math.rsqrt %13 : vector<1x192xf32>
    %15 = vector.broadcast %14 : vector<1x192xf32> to vector<12x192xf32>
    %16 = arith.mulf %6, %15 : vector<12x192xf32>
    %c0_5 = arith.constant 0 : index
    %c0_6 = arith.constant 0 : index
    %17 = vector.load %arg2[%c0_5, %c0_6] : memref<1x192xf32, #tpu.memory_space<vmem>>, vector<1x192xf32>
    %18 = vector.broadcast %17 : vector<1x192xf32> to vector<12x192xf32>
    %19 = arith.mulf %16, %18 : vector<12x192xf32>
    %c0_7 = arith.constant 0 : index
    %c0_8 = arith.constant 0 : index
    %20 = vector.load %arg3[%c0_7, %c0_8] : memref<1x192xf32, #tpu.memory_space<vmem>>, vector<1x192xf32>
    %21 = vector.broadcast %20 : vector<1x192xf32> to vector<12x192xf32>
    %22 = arith.addf %19, %21 : vector<12x192xf32>
    %cst_9 = arith.constant 0.000000e+00 : f32
    %23 = vector.broadcast %cst_9 : f32 to vector<12x192xf32>
    %24 = arith.cmpf oge, %22, %23 : vector<12x192xf32>
    %c0_10 = arith.constant 0 : index
    %c0_11 = arith.constant 0 : index
    %25 = vector.load %arg4[%c0_10, %c0_11] : memref<1x1xf32, #tpu.memory_space<vmem>>, vector<1x1xf32>
    %26 = vector.broadcast %25 : vector<1x1xf32> to vector<12x192xf32>
    %27 = arith.mulf %22, %26 : vector<12x192xf32>
    %28 = arith.select %24, %22, %27 : vector<12x192xi1>, vector<12x192xf32>
    %29 = arith.truncf %28 : vector<12x192xf32> to vector<12x192xbf16>
    %c0_12 = arith.constant 0 : index
    %c0_13 = arith.constant 0 : index
    %30 = vector.load %arg5[%c0_12, %c0_13] : memref<192x32xbf16, #tpu.memory_space<vmem>>, vector<192x32xbf16>
    %cst_14 = arith.constant dense<0.000000e+00> : vector<12x32xf32>
    %31 = tpu.matmul %29, %30, %cst_14 {dimension_numbers = #tpu.dot_dimension_numbers<[1], [0], [0], [1], [0, 0, 1, 1], [], []>} : vector<12x192xbf16>, vector<192x32xbf16>, vector<12x32xf32> -> vector<12x32xf32>
    %c0_15 = arith.constant 0 : index
    %c0_16 = arith.constant 0 : index
    %32 = vector.load %arg6[%c0_15, %c0_16] : memref<1x32xf32, #tpu.memory_space<vmem>>, vector<1x32xf32>
    %33 = vector.broadcast %32 : vector<1x32xf32> to vector<12x32xf32>
    %34 = arith.addf %31, %33 : vector<12x32xf32>
    %c0_17 = arith.constant 0 : index
    %c0_18 = arith.constant 0 : index
    %35 = vector.load %arg7[%c0_17, %c0_18] : memref<12x32xf32, #tpu.memory_space<vmem>>, vector<12x32xf32>
    tpu.vector_store %arg7[%c0_17, %c0_18], %34 {strides = array<i32>} : memref<12x32xf32, #tpu.memory_space<vmem>>, vector<12x32xf32>,
    return
  }
  func.func @transform_0(%arg0: i32) -> (i32, i32) {
    %c0_i32 = arith.constant 0 : i32
    %c0_i32_0 = arith.constant 0 : i32
    %c0_i32_1 = arith.constant 0 : i32
    return %c0_i32, %c0_i32_0 : i32, i32
  }
  func.func @transform_1(%arg0: i32) -> (i32, i32) {
    %c0_i32 = arith.constant 0 : i32
    %c0_i32_0 = arith.constant 0 : i32
    %c0_i32_1 = arith.constant 0 : i32
    return %c0_i32, %c0_i32_0 : i32, i32
  }
  func.func @transform_2(%arg0: i32) -> (i32, i32) {
    %c0_i32 = arith.constant 0 : i32
    %c0_i32_0 = arith.constant 0 : i32
    %c0_i32_1 = arith.constant 0 : i32
    return %c0_i32, %c0_i32_0 : i32, i32
  }
  func.func @transform_3(%arg0: i32) -> (i32, i32) {
    %c0_i32 = arith.constant 0 : i32
    %c0_i32_0 = arith.constant 0 : i32
    %c0_i32_1 = arith.constant 0 : i32
    return %c0_i32, %c0_i32_0 : i32, i32
  }
  func.func @transform_4(%arg0: i32) -> (i32, i32) {
    %c0_i32 = arith.constant 0 : i32
    %c0_i32_0 = arith.constant 0 : i32
    %c0_i32_1 = arith.constant 0 : i32
    return %c0_i32, %c0_i32_0 : i32, i32
  }
  func.func @transform_5(%arg0: i32) -> (i32, i32) {
    %c0_i32 = arith.constant 0 : i32
    %c0_i32_0 = arith.constant 0 : i32
    %c0_i32_1 = arith.constant 0 : i32
    return %c0_i32, %c0_i32_0 : i32, i32
  }
  func.func @transform_6(%arg0: i32) -> (i32, i32) {
    %c0_i32 = arith.constant 0 : i32
    %c0_i32_0 = arith.constant 0 : i32
    %c0_i32_1 = arith.constant 0 : i32
    return %c0_i32, %c0_i32_0 : i32, i32
  }
}

</mosaic_0001>

<bundles_post_ra>
// kernel: dmpnn_forward.10
= control target key start
LH: loop header
LB: loop body
LE: loop exit
PB: predicated region body
PF: predicated region fallthrough
CT: control target
= control target key end

     0   :  { %v197_v0 = vmov 0.0   ;;  %vm198_vm0 = vmmov 0   ;;  %s247_s1 = inlined_call_operand.vmem [shape: bf16[128,128], index: 1, kind: input, shape index: {}]   ;;  %s248_s0 = inlined_call_operand.vmem [shape: bf16[16,128], index: 0, kind: input, shape index: {}]   ;;  %s249_s2 = inlined_call_operand.vmem [shape: f32[16,128], index: 2, kind: output, shape index: {}]  }
   0x1   :  { %166 = vmatprep.subr.bf16.mxu0 %v197_v0  ;;  %v188_v1 = vld [vmem:[%s247_s1] sm:$0xff]   ;;  %182 = vmatprep.mubr.msk.bf16.mxu0 %vm198_vm0, %v197_v0  ;;  %v189_v2 = vld [vmem:[%s247_s1 + $0x8] sm:$0xff]   ;;  %v190_v3 = vld [vmem:[%s247_s1 + $0x10] sm:$0xff]  }
   0x2   :  { %167 = vmatpush3.bf16.msra.mxu0 %v188_v1  ;;  %v191_v4 = vld [vmem:[%s247_s1 + $0x18] sm:$0xff]   ;;  %v192_v5 = vld [vmem:[%s247_s1 + $0x20] sm:$0xff]   ;;  %v193_v6 = vld [vmem:[%s247_s1 + $0x28] sm:$0xff]  }
   0x3   :  { %168 = vmatprep.subr.bf16.mxu0 %v197_v0  ;;  %v194_v7 = vld [vmem:[%s247_s1 + $0x30] sm:$0xff]   ;;  %v195_v8 = vld [vmem:[%s247_s1 + $0x38] sm:$0xff]   ;;  %v196_v9 = vld [vmem:[%s248_s0] sm:$0xff]  }
   0x6   :  { %169 = vmatpush3.bf16.msra.mxu0 %v189_v2 }
   0x7   :  { %170 = vmatprep.subr.bf16.mxu0 %v197_v0 }
   0xa   :  { %171 = vmatpush3.bf16.msra.mxu0 %v190_v3 }
   0xb   :  { %172 = vmatprep.subr.bf16.mxu0 %v197_v0 }
   0xe   :  { %173 = vmatpush3.bf16.msra.mxu0 %v191_v4 }
   0xf   :  { %174 = vmatprep.subr.bf16.mxu0 %v197_v0 }
  0x12   :  { %175 = vmatpush3.bf16.msra.mxu0 %v192_v5 }
  0x13   :  { %176 = vmatprep.subr.bf16.mxu0 %v197_v0 }
  0x16   :  { %177 = vmatpush3.bf16.msra.mxu0 %v193_v6 }
  0x17   :  { %178 = vmatprep.subr.bf16.mxu0 %v197_v0 }
  0x1a   :  { %179 = vmatpush3.bf16.msra.mxu0 %v194_v7 }
  0x1b   :  { %180 = vmatprep.subr.bf16.mxu0 %v197_v0 }
  0x1e   :  { %181 = vmatpush3.bf16.msra.mxu0 %v195_v8 }
  0x21   :  { %183 = vmatmul.mubr.bf16.vlgmr.msra.gmra.mrb[0].mxu0 %v196_v9 }
  0xf4   :  { %v126_v10 = vpop.f32.mrb[0].mxu0 }
  0xf5   :  { %142 = vst [vmem:[%s249_s2] sm:$0xff] %v126_v10  ;;  %v184_v11 = vpop.f32.mrb[1].mxu0 }
  0xf6   :  { %v129_v12 = vpop.f32.mrb[2].mxu0 }
  0xf7   :  { %143 = vst [vmem:[%s249_s2 + $0x8] sm:$0xff] %v129_v12  ;;  %v185_v13 = vpop.f32.mrb[3].mxu0 }

// kernel: dmpnn_forward.12
= control target key start
LH: loop header
LB: loop body
LE: loop exit
PB: predicated region body
PF: predicated region fallthrough
CT: control target
= control target key end

     0   :  { %s270_s1 = inlined_call_operand.vmem [shape: bf16[128,128], index: 1, kind: input, shape index: {}]   ;;  %s271_s0 = inlined_call_operand.vmem [shape: bf16[24,128], index: 0, kind: input, shape index: {}]   ;;  %s272_s2 = inlined_call_operand.vmem [shape: f32[24,128], index: 2, kind: output, shape index: {}]  }
   0x1   :  { %v206_v0 = vld [vmem:[%s270_s1] sm:$0xff]   ;;  %v207_v1 = vld [vmem:[%s270_s1 + $0x8] sm:$0xff]   ;;  %v208_v2 = vld [vmem:[%s270_s1 + $0x10] sm:$0xff]  }
   0x2   :  { %186 = vmatprep.subr.bf16.mxu0 %v206_v0  ;;  %v209_v3 = vld [vmem:[%s270_s1 + $0x18] sm:$0xff]   ;;  %v214_v4 = vld [vmem:[%s271_s0] sm:$0xff]   ;;  %v211_v6 = vld [vmem:[%s270_s1 + $0x28] sm:$0xff]  }
   0x3   :  { %187 = vmatpush3.bf16.msra.mxu0 %v206_v0  ;;  %202 = vmatprep.mubr.bf16.mxu0 %v214_v4  ;;  %v210_v5 = vld [vmem:[%s270_s1 + $0x20] sm:$0xff]   ;;  %v212_v7 = vld [vmem:[%s270_s1 + $0x30] sm:$0xff]   ;;  %v213_v8 = vld [vmem:[%s270_s1 + $0x38] sm:$0xff]  }
   0x4   :  { %188 = vmatprep.subr.bf16.mxu0 %v207_v1  ;;  %v215_v9 = vld [vmem:[%s271_s0 + $0x8] ss:$0 sps:$4 sm:$0xff]  }
   0x7   :  { %189 = vmatpush3.bf16.msra.mxu0 %v207_v1 }
   0x8   :  { %190 = vmatprep.subr.bf16.mxu0 %v208_v2 }
   0xb   :  { %191 = vmatpush3.bf16.msra.mxu0 %v208_v2 }
   0xc   :  { %192 = vmatprep.subr.bf16.mxu0 %v209_v3 }
   0xf   :  { %193 = vmatpush3.bf16.msra.mxu0 %v209_v3 }
  0x10   :  { %194 = vmatprep.subr.bf16.mxu0 %v210_v5 }
  0x13   :  { %195 = vmatpush3.bf16.msra.mxu0 %v210_v5 }
  0x14   :  { %196 = vmatprep.subr.bf16.mxu0 %v211_v6 }
  0x17   :  { %197 = vmatpush3.bf16.msra.mxu0 %v211_v6 }
  0x18   :  { %198 = vmatprep.subr.bf16.mxu0 %v212_v7 }
  0x1b   :  { %199 = vmatpush3.bf16.msra.mxu0 %v212_v7 }
  0x1c   :  { %200 = vmatprep.subr.bf16.mxu0 %v213_v8 }
  0x1f   :  { %201 = vmatpush3.bf16.msra.mxu0 %v213_v8 }
  0x22   :  { %203 = vmatmul.mubr.bf16.vlgmr.msra.gmra.mrb[0].mxu0 %v215_v9 }
  0xf5   :  { %v204_v10 = vpop.f32.mrb[0].mxu0 }
  0xf6   :  { %161 = vst [vmem:[%s272_s2 + $0x10] sm:$0xff] %v204_v10  ;;  %v133_v11 = vpop.f32.mrb[1].mxu0 }
  0xf7   :  { %159 = vst [vmem:[%s272_s2] sm:$0xff] %v133_v11  ;;  %v205_v12 = vpop.f32.mrb[2].mxu0 }
  0xf8   :  { %v136_v13 = vpop.f32.mrb[3].mxu0 }
  0xf9   :  { %160 = vst [vmem:[%s272_s2 + $0x8] sm:$0xff] %v136_v13 }

// kernel: dmpnn_forward.15
= control target key start
LH: loop header
LB: loop body
LE: loop exit
PB: predicated region body
PF: predicated region fallthrough
CT: control target
= control target key end

     0   :  { %v204_v0 = vmov 0   ;;  %vm28_vm0 = vcmask 261120   ;;  %vm30_vm1 = vcmask 257024   ;;  %v100_v49 = vlaneseq  ;;  %s287_s3 = inlined_call_operand.<no memory space> [shape: f32[1,1], index: 3, kind: input, shape index: {}]   ;;  %s288_s4 = inlined_call_operand.vmem [shape: bf16[32,192], index: 4, kind: input, shape index: {}]   ;;  %s289_s0 = inlined_call_operand.vmem [shape: f32[12,32], index: 0, kind: input, shape index: {}]   ;;  %s290_s1 = inlined_call_operand.vmem [shape: f32[1,32], index: 1, kind: input, shape index: {}]   ;;  %s291_s2 = inlined_call_operand.vmem [shape: f32[1,32], index: 2, kind: input, shape index: {}]   ;;  %s292_s5 = inlined_call_operand.vmem [shape: f32[1,192], index: 5, kind: input, shape index: {}]   ;;  %s293_s6 = inlined_call_operand.vmem [shape: f32[12,192], index: 6, kind: output, shape index: {}]  }
   0x1   :  { %195 = vset.pattern.permute.xlu0 %v204_v0  ;;  %v11_v1 = vstv %s287_s3  ;;  %v196_v2 = vld [vmem:[%s288_s4 + $0x4] ss:$8 sps:$4 sm:$0xff]   ;;  %165 = vmatprep.mubr.bf16.mxu0 %v204_v0  ;;  %v198_v3 = vld [vmem:[%s288_s4] ss:$8 sps:$4 sm:$0xff]   ;;  %v199_v5 = vld [vmem:[%s288_s4 + $0x14] ss:$8 sps:$4 sm:$0xff]  }
   0x2   :  { %12 = vst [vmem:[#allocation2] sm:$0x1] %v11_v1  ;;  %133 = vmatprep.subr.bf16.mxu0 %v196_v2  ;;  %v201_v6 = vld [vmem:[%s288_s4 + $0x10] ss:$8 sps:$4 sm:$0xff]   ;;  %v26_v7 = vld [vmem:[%s289_s0] sm:$0xff]  ;;  %v101_v50 = vshrl.u32 %v100_v49, 7 }
   0x3   :  { %134 = vmatpush1.bf16.msra.mxu0 %v198_v3  ;;  %v27_v8 = vld [vmem:[%s289_s0 + $0x8] sm:$0xf]  ;;  %v29_v9 = vsel %vm28_vm0, %v26_v7, 0.0  ;;  %v186_v37 = vld [vmem:[%s290_s1] ss:$0 sm:$0xff]  ;;  %vm177_vm4 = vcmask 523264  }
   0x4   :  { %135 = vmatprep.subr.bf16.mxu0 %v199_v5  ;;  %v31_v10 = vsel %vm30_vm1, %v27_v8, 0.0  ;;  %v187_v40 = vld [vmem:[%s291_s2] ss:$0 sm:$0xff]  ;;  %v102_v51 = vsub.s32 0, %v101_v50  ;;  %v106_v53 = vsub.s32 1, %v101_v50  ;;  %vm180_vm5 = vcmask 519168  }
   0x5   :  { %v32_v11 = vadd.f32 %v31_v10, %v29_v9  ;;  %v98_v52 = vld [vmem:[%s292_s5] sm:$0x3] }
   0x6   :  { %v103_v54 = vrot.slane %v98_v52, %v102_v51  ;;  %v107_v55 = vrot.slane %v98_v52, %v106_v53 }
   0x7   :  { %136 = vmatpush1.bf16.msra.mxu0 %v201_v6  ;;  %v33_v12 = vrot.slane %v32_v11, 4 }
   0x9   :  { %v188_v4 = vld [vmem:[#allocation2] ss:$0 sm:$0xff]  ;;  %v34_v13 = vadd.f32 %v33_v12, %v32_v11 }
   0xa   :  { %86 = vperm.xlu0 %195, %v188_v4  }
   0xb   :  { %v35_v14 = vrot.slane %v34_v13, 2 }
   0xd   :  { %v36_v15 = vadd.f32 %v35_v14, %v34_v13 }
   0xf   :  { %v37_v16 = vrot.slane %v36_v15, 1 }
  0x11   :  { %v38_v17 = vadd.f32 %v37_v16, %v36_v15 }
  0x13   :  { %v40_v18 = vmul.f32 0.083333336, %v38_v17 }
  0x15   :  { %v41_v19 = vsub.f32 %v26_v7, %v40_v18  ;;  %v42_v20 = vsub.f32 %v27_v8, %v40_v18 }
  0x17   :  { %v43_v21 = vmul.f32 %v41_v19, %v41_v19  ;;  %v44_v22 = vmul.f32 %v42_v20, %v42_v20 }
  0x19   :  { %v45_v23 = vsel %vm28_vm0, %v43_v21, 0.0  ;;  %v46_v24 = vsel %vm30_vm1, %v44_v22, 0.0 }
  0x1a   :  { %v47_v25 = vadd.f32 %v46_v24, %v45_v23 }
  0x1c   :  { %v48_v26 = vrot.slane %v47_v25, 4 }
  0x1e   :  { %v49_v27 = vadd.f32 %v48_v26, %v47_v25 }
  0x20   :  { %v50_v28 = vrot.slane %v49_v27, 2 }
  0x22   :  { %v51_v29 = vadd.f32 %v50_v28, %v49_v27 }
  0x24   :  { %v52_v30 = vrot.slane %v51_v29, 1 }
  0x26   :  { %v53_v31 = vadd.f32 %v52_v30, %v51_v29 }
  0x28   :  { %v54_v32 = vmul.f32 0.083333336, %v53_v31 }
  0x2a   :  { %v55_v33 = vadd.f32 1e-05, %v54_v32 }
  0x2c   :  { %202 = vrsqrt.f32 %v55_v33 }
  0x36   :  { %v203_v34 = vpop.eup %202 }
  0x37   :  { %v57_v35 = vmul.f32 %v203_v34, %v41_v19  ;;  %v58_v36 = vmul.f32 %v203_v34, %v42_v20 }
  0x39   :  { %v66_v38 = vmul.f32 %v186_v37, %v57_v35  ;;  %v67_v39 = vmul.f32 %v186_v37, %v58_v36 }
  0x3b   :  { %v75_v41 = vadd.f32 %v187_v40, %v66_v38  ;;  %v76_v42 = vadd.f32 %v187_v40, %v67_v39 }
  0x3d   :  { %vm77_vm2 = vcmp.ge.f32.partialorder %v75_v41, 0.0  ;;  %vm78_vm3 = vcmp.ge.f32.partialorder %v76_v42, 0.0 }
  0x89   :  { %v87_v43 = vpop.permute.xlu0 %86 }
  0x8a   :  { %v89_v44 = vmul.f32 %v87_v43, %v75_v41  ;;  %v90_v45 = vmul.f32 %v87_v43, %v76_v42 }
  0x8c   :  { %v91_v46 = vsel %vm77_vm2, %v75_v41, %v89_v44  ;;  %v92_v47 = vsel %vm78_vm3, %v76_v42, %v90_v45 }
  0x8d   :  { %v93_v48 = vpack.c.bf16 %v92_v47, %v91_v46 }
  0x8f   :  { %193 = vmatmul.mubr.msk.bf16.vlgmr.msra.gmra.mrb[0].mxu0 %vm28_vm0, %v93_v48 }
 0x162   :  { %v167_v56 = vpop.f32.mrb[0].mxu0 }
 0x163   :  { %v168_v57 = vadd.f32 %v167_v56, %v103_v54  ;;  %v169_v58 = vpop.f32.mrb[1].mxu0 }
 0x164   :  { %v170_v59 = vadd.f32 %v169_v58, %v107_v55  ;;  %v171_v60 = vpop.f32.mrb[2].mxu0 }
 0x165   :  { %176 = vst [vmem:[%s293_s6] sm:$0xff] %v168_v57  ;;  %v172_v61 = vadd.f32 %v171_v60, %v103_v54  ;;  %v173_v62 = vpop.f32.mrb[3].mxu0 }
 0x166   :  { %178 = vst.msk [vmem:[%s293_s6 + $0x8] sm:$0xff] %vm177_vm4, %v170_v59  ;;  %v174_v63 = vadd.f32 %v173_v62, %v107_v55 }
 0x167   :  { %179 = vst [vmem:[%s293_s6 + $0x10] sm:$0xf] %v172_v61 }
 0x168   :  { %181 = vst.msk [vmem:[%s293_s6 + $0x18] sm:$0xf] %vm180_vm5, %v174_v63 }

// kernel: dmpnn_forward.13
= control target key start
LH: loop header
LB: loop body
LE: loop exit
PB: predicated region body
PF: predicated region fallthrough
CT: control target
= control target key end

     0   :  { %vm390_vm0 = vcmask 261120   ;;  %vm3735_vm1 = vmmov 0   ;;  %vm548_vm2 = vcmask 7168   ;;  %vm707_vm3 = vcmask 15360   ;;  %s5665_s0 = inlined_call_operand.vmem [shape: f32[128,32], index: 0, kind: input, shape index: {}]   ;;  %s5666_s1 = inlined_call_operand.vmem [shape: bf16[128,128], index: 1, kind: input, shape index: {}]   ;;  %s5667_s5 = inlined_call_operand.vmem [shape: f32[1,32], index: 5, kind: input, shape index: {}]   ;;  %s5668_s9 = inlined_call_operand.vmem [shape: f32[3,128,32], index: 9, kind: output, shape index: {0}]   ;;  %s5669_s6 = inlined_call_operand.<no memory space> [shape: f32[1,1], index: 6, kind: input, shape index: {}]   ;;  %s5670_s4 = inlined_call_operand.vmem [shape: f32[1,32], index: 4, kind: input, shape index: {}]   ;;  %s5671_s2 = inlined_call_operand.vmem [shape: f32[2,128], index: 2, kind: input, shape index: {}]   ;;  %s5672_s3 = inlined_call_operand.vmem [shape: f32[128,2], index: 3, kind: input, shape index: {}]   ;;  %s5673_s7 = inlined_call_operand.vmem [shape: bf16[32,32], index: 7, kind: input, shape index: {}]   ;;  %s5674_s8 = inlined_call_operand.vmem [shape: f32[1,32], index: 8, kind: input, shape index: {}]   ;;  %s5675_s10 = inlined_call_operand.vmem [shape: f32[3,2,32], index: 10, kind: output, shape index: {1}]  }
   0x1   :  { %v3796_v0 = vld [vmem:[%s5665_s0] sm:$0xff]  ;;  %v3801_v1 = vld [vmem:[%s5665_s0 + $0x8] sm:$0xff]  ;;  %v3806_v2 = vld [vmem:[%s5665_s0 + $0x10] sm:$0xff]  ;;  %vm756_vm4 = vcmask 1041408   ;;  %vm1144_vm5 = vcmask 254976  }
   0x2   :  { %v94_v3 = vpack.c.bf16 %v3801_v1, %v3796_v0  ;;  %v3813_v4 = vld [vmem:[%s5665_s0 + $0x18] sm:$0xff]  ;;  %v3820_v6 = vld [vmem:[%s5665_s0 + $0x20] sm:$0xff]  ;;  %v3825_v7 = vld [vmem:[%s5665_s0 + $0x28] sm:$0xff] }
   0x3   :  { %v95_v5 = vpack.c.bf16 %v3813_v4, %v3806_v2  ;;  %v3830_v8 = vld [vmem:[%s5665_s0 + $0x30] sm:$0xff]  ;;  %v96_v9 = vpack.c.bf16 %v3825_v7, %v3820_v6  ;;  %v3837_v10 = vld [vmem:[%s5665_s0 + $0x38] sm:$0xff]  ;;  %v3569_v11 = vld [vmem:[%s5666_s1] sm:$0xff]  }
   0x4   :  { %3096 = vmatprep.subr.bf16.mxu0 %v94_v3  ;;  %3112 = vmatprep.mubr.bf16.mxu0 %v3569_v11  ;;  %v97_v12 = vpack.c.bf16 %v3837_v10, %v3830_v8  ;;  %v3847_v13 = vld [vmem:[%s5665_s0 + $0x40] sm:$0xff]  ;;  %v3852_v14 = vld [vmem:[%s5665_s0 + $0x48] sm:$0xff]  ;;  %v3859_v16 = vld [vmem:[%s5665_s0 + $0x50] sm:$0xff] }
   0x5   :  { %3097 = vmatpush3.bf16.msra.mxu0 %v94_v3  ;;  %3144 = vmatprep.mubr.bf16.mxu1 %v3569_v11  ;;  %v98_v15 = vpack.c.bf16 %v3852_v14, %v3847_v13  ;;  %v3864_v17 = vld [vmem:[%s5665_s0 + $0x58] sm:$0xff]  ;;  %v3871_v19 = vld [vmem:[%s5665_s0 + $0x60] sm:$0xff]  ;;  %v3876_v20 = vld [vmem:[%s5665_s0 + $0x68] sm:$0xff] }
   0x6   :  { %3098 = vmatprep.subr.bf16.mxu0 %v95_v5  ;;  %v99_v18 = vpack.c.bf16 %v3864_v17, %v3859_v16  ;;  %v100_v21 = vpack.c.bf16 %v3876_v20, %v3871_v19  ;;  %v3883_v22 = vld [vmem:[%s5665_s0 + $0x70] sm:$0xff]  ;;  %v3888_v23 = vld [vmem:[%s5665_s0 + $0x78] sm:$0xff]  ;;  %v3895_v25 = vld [vmem:[%s5666_s1 + $0x8] sm:$0xff]  }
   0x7   :  { %v101_v24 = vpack.c.bf16 %v3888_v23, %v3883_v22  ;;  %v3900_v26 = vld [vmem:[%s5666_s1 + $0x10] sm:$0xff]   ;;  %v3907_v27 = vld [vmem:[%s5666_s1 + $0x18] sm:$0xff]   ;;  %v3912_v28 = vld [vmem:[%s5666_s1 + $0x20] sm:$0xff]  }
   0x8   :  { %v3919_v29 = vld [vmem:[%s5666_s1 + $0x28] sm:$0xff]   ;;  %v3924_v30 = vld [vmem:[%s5666_s1 + $0x30] sm:$0xff]   ;;  %v3931_v31 = vld [vmem:[%s5666_s1 + $0x38] sm:$0xff]  }
   0x9   :  { %3099 = vmatpush3.bf16.msra.mxu0 %v95_v5  ;;  %v3937_v33 = vld [vmem:[%s5667_s5] ss:$0 sm:$0xff] }
   0xa   :  { %3100 = vmatprep.subr.bf16.mxu0 %v96_v9 }
   0xd   :  { %3101 = vmatpush3.bf16.msra.mxu0 %v96_v9 }
   0xe   :  { %3102 = vmatprep.subr.bf16.mxu0 %v97_v12 }
  0x11   :  { %3103 = vmatpush3.bf16.msra.mxu0 %v97_v12 }
  0x12   :  { %3104 = vmatprep.subr.bf16.mxu0 %v98_v15 }
  0x15   :  { %3105 = vmatpush3.bf16.msra.mxu0 %v98_v15 }
  0x16   :  { %3106 = vmatprep.subr.bf16.mxu0 %v99_v18 }
  0x19   :  { %3107 = vmatpush3.bf16.msra.mxu0 %v99_v18 }
  0x1a   :  { %3108 = vmatprep.subr.bf16.mxu0 %v100_v21 }
  0x1d   :  { %3109 = vmatpush3.bf16.msra.mxu0 %v100_v21 }
  0x1e   :  { %3110 = vmatprep.subr.bf16.mxu0 %v101_v24 }
  0x21   :  { %3111 = vmatpush3.bf16.msra.mxu0 %v101_v24 }
  0x24   :  { %3113 = vmatmul.mubr.bf16.vlgmr.msra.gmra.mrb[0].mxu0 %v3895_v25 }
  0x25   :  { %3116 = vmatprep.mubr.bf16.mxu0 %v3900_v26 }
  0x2c   :  { %3117 = vmatmul.mubr.bf16.gmra.mrb[4].mxu0 %v3907_v27 }
  0x2d   :  { %3120 = vmatprep.mubr.bf16.mxu0 %v3912_v28 }
  0x34   :  { %3121 = vmatmul.mubr.bf16.gmra.mrb[8].mxu0 %v3919_v29 }
  0x35   :  { %3124 = vmatprep.mubr.bf16.mxu0 %v3924_v30 }
  0x3c   :  { %3125 = vmatmul.mubr.bf16.gmra.mrb[12].mxu0 %v3931_v31 }
  0xf7   :  { %v3114_v32 = vpop.f32.mrb[0].mxu0 }
  0xf8   :  { %v3940_v34 = vadd.f32 %v3114_v32, %v3806_v2  ;;  %v184_v35 = vpop.f32.mrb[1].mxu0 }
  0xf9   :  { %v3943_v36 = vadd.f32 %v184_v35, %v3796_v0  ;;  %v3115_v37 = vpop.f32.mrb[2].mxu0 }
  0xfa   :  { %1130 = vst.msk [vmem:[%s5668_s9 + $0x10] sm:$0xff] %vm390_vm0, %v3940_v34  ;;  %v3951_v38 = vadd.f32 %v3115_v37, %v3813_v4  ;;  %v187_v39 = vpop.f32.mrb[3].mxu0  ;;  %v447_v40 = vmul.f32 %v3937_v33, %v3940_v34 }
  0xfb   :  { %1128 = vst.msk [vmem:[%s5668_s9] sm:$0xff] %vm390_vm0, %v3943_v36  ;;  %v3961_v41 = vadd.f32 %v187_v39, %v3801_v1  ;;  %v445_v44 = vmul.f32 %v3937_v33, %v3943_v36 }
  0xfc   :  { %1131 = vst.msk [vmem:[%s5668_s9 + $0x18] sm:$0xff] %vm390_vm0, %v3951_v38  ;;  %v467_v42 = vsel %vm390_vm0, %v447_v40, 0.0  ;;  %v448_v43 = vmul.f32 %v3937_v33, %v3951_v38  ;;  %v264_v49 = vpack.c.bf16 %v3951_v38, %v3940_v34 }
  0xfd   :  { %1129 = vst.msk [vmem:[%s5668_s9 + $0x8] sm:$0xff] %vm390_vm0, %v3961_v41  ;;  %468 = vadd.xlane.f32.xlu0 %v467_v42  ;;  %v263_v45 = vpack.c.bf16 %v3961_v41, %v3943_v36  ;;  %v446_v47 = vmul.f32 %v3937_v33, %v3961_v41  ;;  %v461_v52 = vsel %vm390_vm0, %v445_v44, 0.0 }
  0xfe   :  { %v470_v46 = vsel %vm390_vm0, %v448_v43, 0.0 }
  0xff   :  { %471 = vadd.xlane.f32.xlu1 %v470_v46  ;;  %v3118_v48 = vpop.f32.mrb[4].mxu0  ;;  %3128 = vmatprep.subr.bf16.mxu1 %v263_v45  ;;  %v464_v57 = vsel %vm390_vm0, %v446_v47, 0.0 }
 0x100   :  { %v3986_v50 = vadd.f32 %v3118_v48, %v3830_v8  ;;  %v200_v51 = vpop.f32.mrb[5].mxu0  ;;  %3129 = vmatpush3.bf16.msra.mxu1 %v263_v45 }
 0x101   :  { %v3990_v53 = vadd.f32 %v200_v51, %v3820_v6  ;;  %462 = vadd.xlane.f32.xlu0 %v461_v52  ;;  %v3119_v54 = vpop.f32.mrb[6].mxu0  ;;  %3130 = vmatprep.subr.bf16.mxu1 %v264_v49 }
 0x102   :  { %5732 = vst [vmem:[#allocation3_spill] sm:$0xff] %v3986_v50  ;;  %1134 = vst.msk [vmem:[%s5668_s9 + $0x30] sm:$0xff] %vm390_vm0, %v3986_v50  ;;  %v3998_v55 = vadd.f32 %v3119_v54, %v3837_v10  ;;  %v203_v56 = vpop.f32.mrb[7].mxu0  ;;  %v451_v58 = vmul.f32 %v3937_v33, %v3986_v50 }
 0x103   :  { %1132 = vst.msk [vmem:[%s5668_s9 + $0x20] sm:$0xff] %vm390_vm0, %v3990_v53  ;;  %v4009_v59 = vadd.f32 %v203_v56, %v3825_v7  ;;  %465 = vadd.xlane.f32.xlu1 %v464_v57  ;;  %v449_v62 = vmul.f32 %v3937_v33, %v3990_v53 }
 0x104   :  { %1135 = vst.msk [vmem:[%s5668_s9 + $0x38] sm:$0xff] %vm390_vm0, %v3998_v55  ;;  %3131 = vmatpush3.bf16.msra.mxu1 %v264_v49  ;;  %v479_v60 = vsel %vm390_vm0, %v451_v58, 0.0  ;;  %v452_v61 = vmul.f32 %v3937_v33, %v3998_v55  ;;  %v266_v11 = vpack.c.bf16 %v3998_v55, %v3986_v50 }
 0x105   :  { %1133 = vst.msk [vmem:[%s5668_s9 + $0x28] sm:$0xff] %vm390_vm0, %v4009_v59  ;;  %480 = vadd.xlane.f32.xlu0 %v479_v60  ;;  %v265_v63 = vpack.c.bf16 %v4009_v59, %v3990_v53  ;;  %v450_v5 = vmul.f32 %v3937_v33, %v4009_v59  ;;  %v473_v18 = vsel %vm390_vm0, %v449_v62, 0.0 }
 0x106   :  { %v482_v3 = vsel %vm390_vm0, %v452_v61, 0.0 }
 0x107   :  { %483 = vadd.xlane.f32.xlu1 %v482_v3  ;;  %v3122_v9 = vpop.f32.mrb[8].mxu0  ;;  %3132 = vmatprep.subr.bf16.mxu1 %v265_v63  ;;  %v476_v37 = vsel %vm390_vm0, %v450_v5, 0.0 }
 0x108   :  { %v4034_v12 = vadd.f32 %v3122_v9, %v3859_v16  ;;  %v216_v15 = vpop.f32.mrb[9].mxu0  ;;  %3133 = vmatpush3.bf16.msra.mxu1 %v265_v63 }
 0x109   :  { %v4038_v21 = vadd.f32 %v216_v15, %v3847_v13  ;;  %474 = vadd.xlane.f32.xlu0 %v473_v18  ;;  %v3123_v24 = vpop.f32.mrb[10].mxu0  ;;  %3134 = vmatprep.subr.bf16.mxu1 %v266_v11  ;;  %v16_v18 = vstv %s5669_s6 }
 0x10a   :  { %5733 = vst [vmem:[#allocation4_spill] sm:$0xff] %v4034_v12  ;;  %1138 = vst.msk [vmem:[%s5668_s9 + $0x50] sm:$0xff] %vm390_vm0, %v4034_v12  ;;  %v4046_v32 = vadd.f32 %v3123_v24, %v3864_v17  ;;  %v219_v35 = vpop.f32.mrb[11].mxu0  ;;  %v455_v39 = vmul.f32 %v3937_v33, %v4034_v12 }
 0x10b   :  { %5734 = vst [vmem:[#allocation5_spill] sm:$0xff] %v4038_v21  ;;  %1136 = vst.msk [vmem:[%s5668_s9 + $0x40] sm:$0xff] %vm390_vm0, %v4038_v21  ;;  %v4057_v40 = vadd.f32 %v219_v35, %v3852_v14  ;;  %477 = vadd.xlane.f32.xlu1 %v476_v37  ;;  %v453_v44 = vmul.f32 %v3937_v33, %v4038_v21 }
 0x10c   :  { %5735 = vst [vmem:[#allocation6_spill] sm:$0xff] %v4046_v32  ;;  %1139 = vst.msk [vmem:[%s5668_s9 + $0x58] sm:$0xff] %vm390_vm0, %v4046_v32  ;;  %3135 = vmatpush3.bf16.msra.mxu1 %v266_v11  ;;  %v491_v42 = vsel %vm390_vm0, %v455_v39, 0.0  ;;  %v456_v43 = vmul.f32 %v3937_v33, %v4046_v32  ;;  %v268_v49 = vpack.c.bf16 %v4046_v32, %v4034_v12 }
 0x10d   :  { %5736 = vst [vmem:[#allocation7_spill] sm:$0xff] %v4057_v40  ;;  %1137 = vst.msk [vmem:[%s5668_s9 + $0x48] sm:$0xff] %vm390_vm0, %v4057_v40  ;;  %492 = vadd.xlane.f32.xlu0 %v491_v42  ;;  %v267_v45 = vpack.c.bf16 %v4057_v40, %v4038_v21  ;;  %v454_v47 = vmul.f32 %v3937_v33, %v4057_v40  ;;  %v485_v54 = vsel %vm390_vm0, %v453_v44, 0.0 }
 0x10e   :  { %v494_v46 = vsel %vm390_vm0, %v456_v43, 0.0  ;;  %17 = vst [vmem:[#allocation2] sm:$0x1] %v16_v18 }
 0x10f   :  { %495 = vadd.xlane.f32.xlu1 %v494_v46  ;;  %v3126_v48 = vpop.f32.mrb[12].mxu0  ;;  %3136 = vmatprep.subr.bf16.mxu1 %v267_v45  ;;  %v488_v61 = vsel %vm390_vm0, %v454_v47, 0.0 }
 0x110   :  { %v4082_v51 = vadd.f32 %v3126_v48, %v3883_v22  ;;  %v232_v52 = vpop.f32.mrb[13].mxu0  ;;  %3137 = vmatpush3.bf16.msra.mxu1 %v267_v45 }
 0x111   :  { %v4086_v56 = vadd.f32 %v232_v52, %v3871_v19  ;;  %486 = vadd.xlane.f32.xlu0 %v485_v54  ;;  %v3127_v57 = vpop.f32.mrb[14].mxu0  ;;  %3138 = vmatprep.subr.bf16.mxu1 %v268_v49 }
 0x112   :  { %5737 = vst [vmem:[#allocation8_spill] sm:$0xff] %v4082_v51  ;;  %1142 = vst.msk [vmem:[%s5668_s9 + $0x70] sm:$0xff] %vm390_vm0, %v4082_v51  ;;  %v4094_v58 = vadd.f32 %v3127_v57, %v3888_v23  ;;  %v235_v60 = vpop.f32.mrb[15].mxu0 }
 0x113   :  { %5738 = vst [vmem:[#allocation9_spill] sm:$0xff] %v4086_v56  ;;  %1140 = vst.msk [vmem:[%s5668_s9 + $0x60] sm:$0xff] %vm390_vm0, %v4086_v56  ;;  %v4103_v62 = vadd.f32 %v235_v60, %v3876_v20  ;;  %489 = vadd.xlane.f32.xlu1 %v488_v61  ;;  %v457_v63 = vmul.f32 %v3937_v33, %v4086_v56 }
 0x114   :  { %5739 = vst [vmem:[#allocation10_spill] sm:$0xff] %v4094_v58  ;;  %1143 = vst.msk [vmem:[%s5668_s9 + $0x78] sm:$0xff] %vm390_vm0, %v4094_v58  ;;  %3139 = vmatpush3.bf16.msra.mxu1 %v268_v49  ;;  %v270_v15 = vpack.c.bf16 %v4094_v58, %v4082_v51 }
 0x115   :  { %5740 = vst [vmem:[#allocation11_spill] sm:$0xff] %v4103_v62  ;;  %1141 = vst.msk [vmem:[%s5668_s9 + $0x68] sm:$0xff] %vm390_vm0, %v4103_v62  ;;  %v497_v3 = vsel %vm390_vm0, %v457_v63, 0.0  ;;  %v269_v5 = vpack.c.bf16 %v4103_v62, %v4086_v56  ;;  %v458_v9 = vmul.f32 %v3937_v33, %v4103_v62 }
 0x116   :  { %498 = vadd.xlane.f32.xlu0 %v497_v3 }
 0x117   :  { %3140 = vmatprep.subr.bf16.mxu1 %v269_v5  ;;  %v500_v11 = vsel %vm390_vm0, %v458_v9, 0.0 }
 0x118   :  { %501 = vadd.xlane.f32.xlu1 %v500_v11  ;;  %3141 = vmatpush3.bf16.msra.mxu1 %v269_v5 }
 0x119   :  { %3142 = vmatprep.subr.bf16.mxu1 %v270_v15 }
 0x11c   :  { %3143 = vmatpush3.bf16.msra.mxu1 %v270_v15 }
 0x11f   :  { %3145 = vmatmul.mubr.bf16.vlgmr.msra.gmra.mrb[0].mxu1 %v3895_v25  ;;  %v4138_v25 = vld [vmem:[%s5670_s4] ss:$0 sm:$0xff] }
 0x120   :  { %3148 = vmatprep.mubr.bf16.mxu1 %v3900_v26 }
 0x127   :  { %3149 = vmatmul.mubr.bf16.gmra.mrb[4].mxu1 %v3907_v27 }
 0x128   :  { %3152 = vmatprep.mubr.bf16.mxu1 %v3912_v28 }
 0x12f   :  { %3153 = vmatmul.mubr.bf16.gmra.mrb[8].mxu1 %v3919_v29 }
 0x130   :  { %3156 = vmatprep.mubr.bf16.mxu1 %v3924_v30 }
 0x137   :  { %3157 = vmatmul.mubr.bf16.gmra.mrb[12].mxu1 %v3931_v31 }
 0x1f2   :  { %v3146_v26 = vpop.f32.mrb[0].mxu1 }
 0x1f3   :  { %v376_v27 = vmul.f32 %v3146_v26, %v4138_v25  ;;  %v4142_v28 = vadd.f32 %v3146_v26, %v3806_v2  ;;  %v305_v29 = vpop.f32.mrb[1].mxu1 }
 0x1f4   :  { %v374_v30 = vmul.f32 %v4138_v25, %v305_v29  ;;  %v4146_v31 = vadd.f32 %v305_v29, %v3796_v0  ;;  %v3147_v24 = vpop.f32.mrb[2].mxu1 }
 0x1f5   :  { %5741 = vst [vmem:[#allocation12_spill] sm:$0xff] %v4142_v28  ;;  %2843 = vst.msk [vmem:[%s5668_s9 + $0x90] sm:$0xff] %vm390_vm0, %v4142_v28  ;;  %v377_v35 = vmul.f32 %v3147_v24, %v4138_v25  ;;  %v4155_v37 = vadd.f32 %v3147_v24, %v3813_v4  ;;  %v308_v2 = vpop.f32.mrb[3].mxu1  ;;  %v397_v39 = vsel %vm390_vm0, %v376_v27, 0.0 }
 0x1f6   :  { %5742 = vst [vmem:[#allocation13_spill] sm:$0xff] %v4146_v31  ;;  %2841 = vst.msk [vmem:[%s5668_s9 + $0x80] sm:$0xff] %vm390_vm0, %v4146_v31  ;;  %v375_v0 = vmul.f32 %v4138_v25, %v308_v2  ;;  %v4165_v42 = vadd.f32 %v308_v2, %v3801_v1  ;;  %398 = vadd.xlane.f32.xlu1 %v397_v39  ;;  %v391_v43 = vsel %vm390_vm0, %v374_v30, 0.0 }
 0x1f7   :  { %5743 = vst [vmem:[#allocation14_spill] sm:$0xff] %v4155_v37  ;;  %2844 = vst.msk [vmem:[%s5668_s9 + $0x98] sm:$0xff] %vm390_vm0, %v4155_v37  ;;  %392 = vadd.xlane.f32.xlu0 %v391_v43  ;;  %v400_v4 = vsel %vm390_vm0, %v377_v35, 0.0 }
 0x1f8   :  { %2842 = vst.msk [vmem:[%s5668_s9 + $0x88] sm:$0xff] %vm390_vm0, %v4165_v42  ;;  %v394_v44 = vsel %vm390_vm0, %v375_v0, 0.0 }
 0x1fa   :  { %401 = vadd.xlane.f32.xlu1 %v400_v4  ;;  %v3150_v1 = vpop.f32.mrb[4].mxu1 }
 0x1fb   :  { %v380_v45 = vmul.f32 %v3150_v1, %v4138_v25  ;;  %v4182_v46 = vadd.f32 %v3150_v1, %v3830_v8  ;;  %395 = vadd.xlane.f32.xlu0 %v394_v44  ;;  %v321_v47 = vpop.f32.mrb[5].mxu1 }
 0x1fc   :  { %v4185_v48 = vadd.f32 %v321_v47, %v3820_v6  ;;  %v3151_v49 = vpop.f32.mrb[6].mxu1  ;;  %v378_v60 = vmul.f32 %v4138_v25, %v321_v47 }
 0x1fd   :  { %5744 = vst [vmem:[#allocation15_spill] sm:$0xff] %v4182_v46  ;;  %2847 = vst.msk [vmem:[%s5668_s9 + $0xb0] sm:$0xff] %vm390_vm0, %v4182_v46  ;;  %v381_v52 = vmul.f32 %v3151_v49, %v4138_v25  ;;  %v4194_v54 = vadd.f32 %v3151_v49, %v3837_v10  ;;  %v324_v57 = vpop.f32.mrb[7].mxu1  ;;  %v409_v8 = vsel %vm390_vm0, %v380_v45, 0.0 }
 0x1fe   :  { %5745 = vst [vmem:[#allocation16_spill] sm:$0xff] %v4185_v48  ;;  %2845 = vst.msk [vmem:[%s5668_s9 + $0xa0] sm:$0xff] %vm390_vm0, %v4185_v48  ;;  %v4204_v6 = vadd.f32 %v324_v57, %v3825_v7  ;;  %v379_v10 = vmul.f32 %v4138_v25, %v324_v57  ;;  %v403_v63 = vsel %vm390_vm0, %v378_v60, 0.0  ;;  %v459_v57 = vmul.f32 %v3937_v33, %v4082_v51 }
 0x1ff   :  { %5746 = vst [vmem:[#allocation17_spill] sm:$0xff] %v4194_v54  ;;  %2848 = vst.msk [vmem:[%s5668_s9 + $0xb8] sm:$0xff] %vm390_vm0, %v4194_v54  ;;  %410 = vadd.xlane.f32.xlu0 %v409_v8  ;;  %v412_v61 = vsel %vm390_vm0, %v381_v52, 0.0 }
 0x200   :  { %5747 = vst [vmem:[#allocation18_spill] sm:$0xff] %v4204_v6  ;;  %2846 = vst.msk [vmem:[%s5668_s9 + $0xa8] sm:$0xff] %vm390_vm0, %v4204_v6  ;;  %413 = vadd.xlane.f32.xlu1 %v412_v61  ;;  %v406_v11 = vsel %vm390_vm0, %v379_v10, 0.0  ;;  %v503_v60 = vsel %vm390_vm0, %v459_v57, 0.0  ;;  %v5678_v61 = vmov 0.0|0.0  }
 0x201   :  { %3491 = vmatprep.subr.bf16.mxu1 %v5678_v61 }
 0x202   :  { %v3154_v7 = vpop.f32.mrb[8].mxu1 }
 0x203   :  { %v384_v3 = vmul.f32 %v3154_v7, %v4138_v25  ;;  %v4221_v5 = vadd.f32 %v3154_v7, %v3859_v16  ;;  %404 = vadd.xlane.f32.xlu0 %v403_v63  ;;  %v337_v9 = vpop.f32.mrb[9].mxu1  ;;  %v472_v7 = vpop.xlane.xlu1 %471 }
 0x204   :  { %v4225_v15 = vadd.f32 %v337_v9, %v3847_v13  ;;  %407 = vadd.xlane.f32.xlu1 %v406_v11  ;;  %v3155_v18 = vpop.f32.mrb[10].mxu1  ;;  %v382_v30 = vmul.f32 %v4138_v25, %v337_v9  ;;  %v469_v63 = vpop.xlane.xlu0 %468 }
 0x205   :  { %5748 = vst [vmem:[#allocation19_spill] sm:$0xff] %v4221_v5  ;;  %2851 = vst.msk [vmem:[%s5668_s9 + $0xd0] sm:$0xff] %vm390_vm0, %v4221_v5  ;;  %v385_v26 = vmul.f32 %v3155_v18, %v4138_v25  ;;  %v4234_v16 = vadd.f32 %v3155_v18, %v3864_v17  ;;  %v340_v27 = vpop.f32.mrb[11].mxu1  ;;  %v421_v29 = vsel %vm390_vm0, %v384_v3, 0.0 }
 0x206   :  { %5749 = vst [vmem:[#allocation20_spill] sm:$0xff] %v4225_v15  ;;  %2849 = vst.msk [vmem:[%s5668_s9 + $0xc0] sm:$0xff] %vm390_vm0, %v4225_v15  ;;  %v4244_v13 = vadd.f32 %v340_v27, %v3852_v14  ;;  %v383_v17 = vmul.f32 %v4138_v25, %v340_v27  ;;  %v415_v35 = vsel %vm390_vm0, %v382_v30, 0.0  ;;  %v5676_v27 = vmov 0.0  }
 0x207   :  { %5750 = vst [vmem:[#allocation21_spill] sm:$0xff] %v4234_v16  ;;  %2852 = vst.msk [vmem:[%s5668_s9 + $0xd8] sm:$0xff] %vm390_vm0, %v4234_v16  ;;  %422 = vadd.xlane.f32.xlu0 %v421_v29  ;;  %v424_v24 = vsel %vm390_vm0, %v385_v26, 0.0  ;;  %v466_v3 = vpop.xlane.xlu1 %465  ;;  %3192 = vmatprep.mubr.msk.f32.mxu1 %vm3735_vm1, %v5676_v27 }
 0x208   :  { %5751 = vst [vmem:[#allocation22_spill] sm:$0xff] %v4244_v13  ;;  %2850 = vst.msk [vmem:[%s5668_s9 + $0xc8] sm:$0xff] %vm390_vm0, %v4244_v13  ;;  %425 = vadd.xlane.f32.xlu1 %v424_v24  ;;  %v418_v43 = vsel %vm390_vm0, %v383_v17, 0.0  ;;  %v463_v9 = vpop.xlane.xlu0 %462  ;;  %3221 = vmatprep.subr.bf16.mxu0 %v5676_v27 }
 0x209   :  { %3237 = vmatprep.mubr.msk.bf16.mxu0 %vm3735_vm1, %v5676_v27 }
 0x20a   :  { %v3158_v14 = vpop.f32.mrb[12].mxu1 }
 0x20b   :  { %v388_v2 = vmul.f32 %v3158_v14, %v4138_v25  ;;  %v4261_v39 = vadd.f32 %v3158_v14, %v3883_v22  ;;  %416 = vadd.xlane.f32.xlu0 %v415_v35  ;;  %v353_v0 = vpop.f32.mrb[13].mxu1  ;;  %v484_v11 = vpop.xlane.xlu1 %483 }
 0x20c   :  { %v4265_v4 = vadd.f32 %v353_v0, %v3871_v19  ;;  %419 = vadd.xlane.f32.xlu1 %v418_v43  ;;  %v3159_v1 = vpop.f32.mrb[14].mxu1  ;;  %v386_v49 = vmul.f32 %v4138_v25, %v353_v0  ;;  %v481_v18 = vpop.xlane.xlu0 %480 }
 0x20d   :  { %5752 = vst [vmem:[#allocation23_spill] sm:$0xff] %v4261_v39  ;;  %2855 = vst.msk [vmem:[%s5668_s9 + $0xf0] sm:$0xff] %vm390_vm0, %v4261_v39  ;;  %v389_v44 = vmul.f32 %v3159_v1, %v4138_v25  ;;  %v4274_v22 = vadd.f32 %v3159_v1, %v3888_v23  ;;  %v356_v45 = vpop.f32.mrb[15].mxu1  ;;  %v433_v47 = vsel %vm390_vm0, %v388_v2, 0.0 }
 0x20e   :  { %5753 = vst [vmem:[#allocation24_spill] sm:$0xff] %v4265_v4  ;;  %2853 = vst.msk [vmem:[%s5668_s9 + $0xe0] sm:$0xff] %vm390_vm0, %v4265_v4  ;;  %v4284_v19 = vadd.f32 %v356_v45, %v3876_v20  ;;  %v387_v23 = vmul.f32 %v4138_v25, %v356_v45  ;;  %v427_v20 = vsel %vm390_vm0, %v386_v49, 0.0  ;;  %v460_v25 = vmul.f32 %v3937_v33, %v4094_v58 }
 0x20f   :  { %5754 = vst [vmem:[#allocation25_spill] sm:$0xff] %v4274_v22  ;;  %2856 = vst.msk [vmem:[%s5668_s9 + $0xf8] sm:$0xff] %vm390_vm0, %v4274_v22  ;;  %434 = vadd.xlane.f32.xlu0 %v433_v47  ;;  %v436_v52 = vsel %vm390_vm0, %v389_v44, 0.0  ;;  %v478_v26 = vpop.xlane.xlu1 %477 }
 0x210   :  { %5755 = vst [vmem:[#allocation26_spill] sm:$0xff] %v4284_v19  ;;  %2854 = vst.msk [vmem:[%s5668_s9 + $0xe8] sm:$0xff] %vm390_vm0, %v4284_v19  ;;  %437 = vadd.xlane.f32.xlu1 %v436_v52  ;;  %v430_v8 = vsel %vm390_vm0, %v387_v23, 0.0  ;;  %v506_v10 = vsel %vm390_vm0, %v460_v25, 0.0  ;;  %v475_v33 = vpop.xlane.xlu0 %474 }
 0x213   :  { %428 = vadd.xlane.f32.xlu0 %v427_v20  ;;  %v496_v29 = vpop.xlane.xlu1 %495 }
 0x214   :  { %431 = vadd.xlane.f32.xlu1 %v430_v8  ;;  %v493_v30 = vpop.xlane.xlu0 %492 }
 0x217   :  { %504 = vadd.xlane.f32.xlu0 %v503_v60  ;;  %v490_v17 = vpop.xlane.xlu1 %489 }
 0x218   :  { %507 = vadd.xlane.f32.xlu1 %v506_v10  ;;  %v487_v24 = vpop.xlane.xlu0 %486  ;;  %v2800_v10 = vld [vmem:[#allocation2] ss:$0 sm:$0xff] }
 0x21b   :  { %v502_v14 = vpop.xlane.xlu1 %501 }
 0x21c   :  { %v499_v35 = vpop.xlane.xlu0 %498 }
 0x283   :  { %v399_v2 = vpop.xlane.xlu1 %398 }
 0x284   :  { %v393_v0 = vpop.xlane.xlu0 %392  ;;  %v511_v8 = vadd.f32 %v469_v63, %v399_v2 }
 0x285   :  { %v509_v25 = vadd.f32 %v463_v9, %v393_v0 }
 0x286   :  { %v4314_v32 = vadd.f32 %v2800_v10, %v511_v8 }
 0x287   :  { %v402_v1 = vpop.xlane.xlu1 %401  ;;  %v4316_v21 = vadd.f32 %v2800_v10, %v509_v25 }
 0x288   :  { %v396_v43 = vpop.xlane.xlu0 %395  ;;  %v512_v22 = vadd.f32 %v472_v7, %v402_v1 }
 0x289   :  { %v510_v39 = vadd.f32 %v466_v3, %v396_v43 }
 0x28a   :  { %v4322_v7 = vadd.f32 %v2800_v10, %v512_v22 }
 0x28b   :  { %v533_v3 = vadd.f32 %v2800_v10, %v510_v39 }
 0x28c   :  { %v411_v44 = vpop.xlane.xlu0 %410  ;;  %v552_v0 = vsel %vm548_vm2, %v4322_v7, -inf }
 0x28d   :  { %v414_v45 = vpop.xlane.xlu1 %413  ;;  %v515_v20 = vadd.f32 %v481_v18, %v411_v44  ;;  %v550_v43 = vsel %vm548_vm2, %v533_v3, -inf }
 0x28e   :  { %v516_v58 = vadd.f32 %v484_v11, %v414_v45 }
 0x28f   :  { %v4312_v51 = vadd.f32 %v2800_v10, %v515_v20 }
 0x290   :  { %v405_v47 = vpop.xlane.xlu0 %404 }
 0x291   :  { %v408_v49 = vpop.xlane.xlu1 %407  ;;  %v513_v27 = vadd.f32 %v475_v33, %v405_v47  ;;  %v557_v11 = vsel %vm548_vm2, %v4312_v51, -inf  ;;  %v4326_v33 = vadd.f32 %v2800_v10, %v516_v58 }
 0x292   :  { %v514_v61 = vadd.f32 %v478_v26, %v408_v49 }
 0x293   :  { %v4318_v63 = vadd.f32 %v2800_v10, %v513_v27  ;;  %v551_v27 = vsel %vm548_vm2, %v4314_v32, -inf }
 0x294   :  { %v423_v23 = vpop.xlane.xlu0 %422  ;;  %v4320_v9 = vadd.f32 %v2800_v10, %v514_v61  ;;  %v549_v61 = vsel %vm548_vm2, %v4316_v21, -inf  ;;  %v558_v1 = vmax.f32 %v551_v27, %v557_v11 }
 0x295   :  { %v426_v52 = vpop.xlane.xlu1 %425  ;;  %v519_v18 = vadd.f32 %v493_v30, %v423_v23  ;;  %v553_v2 = vsel %vm548_vm2, %v4318_v63, -inf }
 0x296   :  { %v520_v26 = vadd.f32 %v496_v29, %v426_v52  ;;  %v554_v52 = vmax.f32 %v549_v61, %v553_v2 }
 0x297   :  { %v4336_v29 = vadd.f32 %v2800_v10, %v519_v18 }
 0x298   :  { %v417_v57 = vpop.xlane.xlu0 %416  ;;  %v4342_v58 = vadd.f32 %v2800_v10, %v520_v26 }
 0x299   :  { %v420_v60 = vpop.xlane.xlu1 %419  ;;  %v517_v56 = vadd.f32 %v487_v24, %v417_v57  ;;  %v565_v57 = vsel %vm548_vm2, %v4336_v29, -inf }
 0x29a   :  { %v518_v62 = vadd.f32 %v490_v17, %v420_v60  ;;  %v567_v60 = vsel %vm548_vm2, %v4342_v58, -inf }
 0x29b   :  { %v4328_v17 = vadd.f32 %v2800_v10, %v517_v56  ;;  %v555_v56 = vsel %vm548_vm2, %v4320_v9, -inf }
 0x29c   :  { %v435_v12 = vpop.xlane.xlu0 %434  ;;  %v4330_v24 = vadd.f32 %v2800_v10, %v518_v62  ;;  %v556_v20 = vmax.f32 %v550_v43, %v555_v56 }
 0x29d   :  { %v438_v44 = vpop.xlane.xlu1 %437  ;;  %v561_v47 = vsel %vm548_vm2, %v4328_v17, -inf }
 0x29e   :  { %v563_v49 = vsel %vm548_vm2, %v4330_v24, -inf  ;;  %v562_v27 = vmax.f32 %v554_v52, %v561_v47 }
 0x2a0   :  { %v429_v30 = vpop.xlane.xlu0 %428 }
 0x2a1   :  { %v521_v22 = vadd.f32 %v499_v35, %v429_v30  ;;  %v432_v39 = vpop.xlane.xlu1 %431  ;;  %v559_v35 = vsel %vm548_vm2, %v4326_v33, -inf }
 0x2a2   :  { %v522_v62 = vadd.f32 %v502_v14, %v432_v39  ;;  %v560_v30 = vmax.f32 %v552_v0, %v559_v35  ;;  %v566_v39 = vmax.f32 %v558_v1, %v565_v57 }
 0x2a3   :  { %v4347_v45 = vadd.f32 %v2800_v10, %v521_v22  ;;  %v564_v22 = vmax.f32 %v556_v20, %v563_v49 }
 0x2a4   :  { %v4355_v23 = vadd.f32 %v2800_v10, %v522_v62  ;;  %v505_v14 = vpop.xlane.xlu0 %504 }
 0x2a5   :  { %v523_v8 = vadd.f32 %v505_v14, %v435_v12  ;;  %v508_v25 = vpop.xlane.xlu1 %507  ;;  %v569_v18 = vsel %vm548_vm2, %v4347_v45, -inf  ;;  %v568_v12 = vmax.f32 %v560_v30, %v567_v60 }
 0x2a6   :  { %v571_v26 = vsel %vm548_vm2, %v4355_v23, -inf  ;;  %v524_v11 = vadd.f32 %v508_v25, %v438_v44  ;;  %v570_v56 = vmax.f32 %v562_v27, %v569_v18 }
 0x2a7   :  { %v4365_v61 = vadd.f32 %v2800_v10, %v523_v8  ;;  %v572_v62 = vmax.f32 %v564_v22, %v571_v26 }
 0x2a8   :  { %v4367_v2 = vadd.f32 %v2800_v10, %v524_v11 }
 0x2a9   :  { %v573_v43 = vsel %vm548_vm2, %v4365_v61, -inf  ;;  %v577_v44 = vmax.f32 %v570_v56, %v572_v62 }
 0x2aa   :  { %v574_v14 = vmax.f32 %v566_v39, %v573_v43  ;;  %v575_v40 = vsel %vm548_vm2, %v4367_v2, -inf }
 0x2ab   :  { %v576_v50 = vmax.f32 %v568_v12, %v575_v40 }
 0x2ad   :  { %v578_v0 = vmax.f32 %v574_v14, %v576_v50 }
 0x2af   :  { %v579_v35 = vmax.f32 %v577_v44, %v578_v0  ;;  %v5756_v44 = vmov 0.0|0.0  }
 0x2b1   :  { %v580_v47 = vrot.slane %v579_v35, 4 }
 0x2b3   :  { %v581_v49 = vmax.f32 %v579_v35, %v580_v47 }
 0x2b5   :  { %v582_v52 = vrot.slane %v581_v49, 2 }
 0x2b7   :  { %v583_v1 = vmax.f32 %v581_v49, %v582_v52 }
 0x2b9   :  { %v584_v10 = vrot.slane %v583_v1, 1 }
 0x2bb   :  { %v4373_v20 = vmax.f32 %v583_v1, %v584_v10 }
 0x2bd   :  { %v586_v57 = vsub.f32 %v4316_v21, %v4373_v20  ;;  %v587_v8 = vsub.f32 %v533_v3, %v4373_v20  ;;  %v588_v25 = vsub.f32 %v4314_v32, %v4373_v20  ;;  %v589_v40 = vsub.f32 %v4322_v7, %v4373_v20 }
 0x2be   :  { %v590_v26 = vsub.f32 %v4318_v63, %v4373_v20  ;;  %v591_v30 = vsub.f32 %v4320_v9, %v4373_v20  ;;  %v592_v32 = vsub.f32 %v4312_v51, %v4373_v20  ;;  %v593_v7 = vsub.f32 %v4326_v33, %v4373_v20 }
 0x2bf   :  { %v602_v50 = vmul.f32 1.442695, %v586_v57  ;;  %v604_v60 = vmul.f32 1.442695, %v587_v8  ;;  %v606_v18 = vmul.f32 1.442695, %v588_v25  ;;  %v594_v63 = vsub.f32 %v4328_v17, %v4373_v20 }
 0x2c0   :  { %v608_v11 = vmul.f32 1.442695, %v589_v40  ;;  %v610_v21 = vmul.f32 1.442695, %v590_v26  ;;  %v612_v3 = vmul.f32 1.442695, %v591_v30  ;;  %v595_v9 = vsub.f32 %v4330_v24, %v4373_v20 }
 0x2c1   :  { %3579 = vpow2.f32 %v602_v50  ;;  %v614_v27 = vmul.f32 1.442695, %v592_v32  ;;  %v616_v22 = vmul.f32 1.442695, %v593_v7  ;;  %v618_v12 = vmul.f32 1.442695, %v594_v63 }
 0x2c2   :  { %3581 = vpow2.f32 %v604_v60  ;;  %v596_v51 = vsub.f32 %v4336_v29, %v4373_v20  ;;  %v620_v33 = vmul.f32 1.442695, %v595_v9  ;;  %v597_v62 = vsub.f32 %v4342_v58, %v4373_v20  ;;  %v70_v63 = vld [vmem:[%s5672_s3] sm:$0xff] }
 0x2c3   :  { %3583 = vpow2.f32 %v606_v18  ;;  %v598_v29 = vsub.f32 %v4347_v45, %v4373_v20  ;;  %v599_v58 = vsub.f32 %v4355_v23, %v4373_v20  ;;  %v601_v52 = vsub.f32 %v4367_v2, %v4373_v20 }
 0x2c4   :  { %3585 = vpow2.f32 %v608_v11  ;;  %v622_v14 = vmul.f32 1.442695, %v596_v51  ;;  %v624_v0 = vmul.f32 1.442695, %v597_v62  ;;  %v600_v23 = vsub.f32 %v4365_v61, %v4373_v20  ;;  %v72_v62 = vld [vmem:[%s5672_s3 + $0x10] sm:$0xff] }
 0x2c5   :  { %3587 = vpow2.f32 %v610_v21  ;;  %v626_v45 = vmul.f32 1.442695, %v598_v29  ;;  %v628_v1 = vmul.f32 1.442695, %v599_v58  ;;  %v632_v25 = vmul.f32 1.442695, %v601_v52 }
 0x2c6   :  { %3589 = vpow2.f32 %v612_v3  ;;  %v630_v2 = vmul.f32 1.442695, %v600_v23  ;;  %v75_v29 = vld [vmem:[%s5672_s3 + $0x28] sm:$0xff]  ;;  %v77_v58 = vld [vmem:[%s5672_s3 + $0x38] sm:$0xff]  ;;  %v82_v23 = vld [vmem:[%s5672_s3 + $0x60] sm:$0xff] }
 0x2c7   :  { %3591 = vpow2.f32 %v614_v27  ;;  %v4464_v27 = vld [vmem:[%s5671_s2] sm:$0x3]  ;;  %v79_v52 = vld [vmem:[%s5672_s3 + $0x48] sm:$0xff] }
 0x2c8   :  { %3593 = vpow2.f32 %v616_v22 }
 0x2c9   :  { %3595 = vpow2.f32 %v618_v12 }
 0x2ca   :  { %3597 = vpow2.f32 %v620_v33  ;;  %v71_v33 = vld [vmem:[%s5672_s3 + $0x8] sm:$0xff] }
 0x2cb   :  { %v4394_v39 = vpop.eup %3579  ;;  %3599 = vpow2.f32 %v622_v14  ;;  %v74_v14 = vld [vmem:[%s5672_s3 + $0x20] sm:$0xff] }
 0x2cc   :  { %v4398_v56 = vpop.eup %3581  ;;  %3601 = vpow2.f32 %v624_v0  ;;  %v76_v0 = vld [vmem:[%s5672_s3 + $0x30] sm:$0xff] }
 0x2cd   :  { %v4402_v17 = vpop.eup %3583  ;;  %v3492_v43 = vpack.c.bf16 %v4398_v56, %v4394_v39  ;;  %3603 = vpow2.f32 %v626_v45  ;;  %v80_v45 = vld [vmem:[%s5672_s3 + $0x50] sm:$0xff] }
 0x2ce   :  { %v4406_v24 = vpop.eup %3585  ;;  %3605 = vpow2.f32 %v628_v1  ;;  %v81_v1 = vld [vmem:[%s5672_s3 + $0x58] sm:$0xff] }
 0x2cf   :  { %3493 = vmatpush3.bf16.msra.mxu1 %v3492_v43  ;;  %v4413_v35 = vpop.eup %3587  ;;  %v3495_v47 = vpack.c.bf16 %v4406_v24, %v4402_v17  ;;  %3607 = vpow2.f32 %v632_v25  ;;  %v73_v43 = vld [vmem:[%s5672_s3 + $0x18] sm:$0xff]  ;;  %v84_v25 = vld [vmem:[%s5672_s3 + $0x70] sm:$0xff] }
 0x2d0   :  { %3494 = vmatprep.subr.bf16.mxu1 %v5756_v44  ;;  %v4417_v49 = vpop.eup %3589  ;;  %3609 = vpow2.f32 %v630_v2  ;;  %v85_v2 = vld [vmem:[%s5672_s3 + $0x78] sm:$0xff] }
 0x2d1   :  { %v4424_v10 = vpop.eup %3591  ;;  %v3498_v57 = vpack.c.bf16 %v4417_v49, %v4413_v35 }
 0x2d2   :  { %v4428_v8 = vpop.eup %3593 }
 0x2d3   :  { %3496 = vmatpush3.bf16.msra.mxu1 %v3495_v47  ;;  %v4431_v40 = vpop.eup %3595  ;;  %v3501_v50 = vpack.c.bf16 %v4428_v8, %v4424_v10  ;;  %v78_v47 = vld [vmem:[%s5672_s3 + $0x40] sm:$0xff] }
 0x2d4   :  { %3497 = vmatprep.subr.bf16.mxu1 %v5756_v44  ;;  %v4435_v61 = vpop.eup %3597 }
 0x2d5   :  { %v4438_v20 = vpop.eup %3599  ;;  %v3504_v60 = vpack.c.bf16 %v4435_v61, %v4431_v40 }
 0x2d6   :  { %v4442_v18 = vpop.eup %3601 }
 0x2d7   :  { %3499 = vmatpush3.bf16.msra.mxu1 %v3498_v57  ;;  %v4445_v26 = vpop.eup %3603  ;;  %v3507_v11 = vpack.c.bf16 %v4442_v18, %v4438_v20  ;;  %v83_v57 = vld [vmem:[%s5672_s3 + $0x68] sm:$0xff] }
 0x2d8   :  { %3500 = vmatprep.subr.bf16.mxu1 %v5756_v44  ;;  %v4449_v30 = vpop.eup %3605 }
 0x2d9   :  { %v4452_v21 = vpop.eup %3607  ;;  %v3510_v32 = vpack.c.bf16 %v4449_v30, %v4445_v26 }
 0x2da   :  { %v4456_v3 = vpop.eup %3609 }
 0x2db   :  { %3502 = vmatpush3.bf16.msra.mxu1 %v3501_v50  ;;  %v3513_v7 = vpack.c.bf16 %v4452_v21, %v4456_v3  ;;  %v5757_v50 = vmov 0.0  }
 0x2dc   :  { %3503 = vmatprep.subr.bf16.mxu1 %v5756_v44 }
 0x2df   :  { %3505 = vmatpush3.bf16.msra.mxu1 %v3504_v60  ;;  %v3737_v60 = vmov 0  }
 0x2e0   :  { %3506 = vmatprep.subr.bf16.mxu1 %v5756_v44  ;;  %3568 = vset.pattern.permute.xlu1 %v3737_v60 }
 0x2e1   :  { %3567 = vset.pattern.permute.xlu0 %v3737_v60 }
 0x2e3   :  { %3508 = vmatpush3.bf16.msra.mxu1 %v3507_v11 }
 0x2e4   :  { %3509 = vmatprep.subr.bf16.mxu1 %v5756_v44 }
 0x2e7   :  { %3511 = vmatpush3.bf16.msra.mxu1 %v3510_v32 }
 0x2e8   :  { %3512 = vmatprep.subr.bf16.mxu1 %v5756_v44 }
 0x2eb   :  { %3514 = vmatpush3.bf16.msra.mxu1 %v3513_v7 }
 0x2ee   :  { %3193 = vmatmul.mubr.f32.vlgmr.msra.gmra.mrb[16].mxu1 %v4464_v27 }
 0x2ef   :  { %3197 = vmatprep.mubr.msk.f32.mxu1 %vm707_vm3, %v70_v63 }
 0x3c1   :  { %v700_v22 = vpop.f32.mrb[16].mxu1 }
 0x3c2   :  { %v704_v9 = vmax.f32 %v700_v22, 1e-30  ;;  %v3194_v12 = vpop.f32.mrb[17].mxu1 }
 0x3c4   :  { %3611 = vrcp.f32 %v704_v9 }
 0x3ce   :  { %v3612_v51 = vpop.eup %3611 }
 0x3cf   :  { %3195 = vmatprep.subr.msk.mxu1 %vm756_vm4, %v3612_v51 }
 0x3d0   :  { %3196 = vmatpush3.msk.msra.mxu1 %vm756_vm4, %v3612_v51 }
 0x3d1   :  { %3198 = vmatmul.mubr.msk.f32.vlgmr.msra.gmra.mrb[18].mxu1 %vm707_vm3, %v71_v33  ;;  %3515 = vmatprep.subr.bf16.mxu1 %v5756_v44 }
 0x3d2   :  { %3200 = vmatprep.mubr.msk.f32.mxu1 %vm707_vm3, %v72_v62 }
 0x3d5   :  { %3201 = vmatmul.mubr.msk.f32.gmra.mrb[20].mxu1 %vm707_vm3, %v73_v43 }
 0x3d6   :  { %3203 = vmatprep.mubr.msk.f32.mxu1 %vm707_vm3, %v74_v14 }
 0x3d9   :  { %3204 = vmatmul.mubr.msk.f32.gmra.mrb[22].mxu1 %vm707_vm3, %v75_v29 }
 0x3da   :  { %3206 = vmatprep.mubr.msk.f32.mxu1 %vm707_vm3, %v76_v0 }
 0x3dd   :  { %3207 = vmatmul.mubr.msk.f32.gmra.mrb[24].mxu1 %vm707_vm3, %v77_v58 }
 0x3de   :  { %3209 = vmatprep.mubr.msk.f32.mxu1 %vm707_vm3, %v78_v47 }
 0x3e1   :  { %3210 = vmatmul.mubr.msk.f32.gmra.mrb[26].mxu1 %vm707_vm3, %v79_v52 }
 0x3e2   :  { %3212 = vmatprep.mubr.msk.f32.mxu1 %vm707_vm3, %v80_v45 }
 0x3e5   :  { %3213 = vmatmul.mubr.msk.f32.gmra.mrb[28].mxu1 %vm707_vm3, %v81_v1 }
 0x3e6   :  { %3215 = vmatprep.mubr.msk.f32.mxu1 %vm707_vm3, %v82_v23 }
 0x3e9   :  { %3216 = vmatmul.mubr.msk.f32.gmra.mrb[30].mxu1 %vm707_vm3, %v83_v57 }
 0x3ea   :  { %3218 = vmatprep.mubr.msk.f32.mxu1 %vm707_vm3, %v84_v25 }
 0x3ed   :  { %3219 = vmatmul.mubr.msk.f32.gmra.mrb[32].mxu1 %vm707_vm3, %v85_v2 }
 0x3ee   :  { %3313 = vmatprep.mubr.msk.f32.mxu1 %vm3735_vm1, %v5757_v50 }
 0x4a4   :  { %v3199_v11 = vpop.f32.mrb[18].mxu1 }
 0x4a5   :  { %v906_v32 = vmul.f32 %v4398_v56, %v3199_v11  ;;  %v826_v7 = vpop.f32.mrb[19].mxu1 }
 0x4a6   :  { %v905_v63 = vmul.f32 %v4394_v39, %v826_v7 }
 0x4a7   :  { %928 = vperm.xlu1 %3568, %v906_v32  }
 0x4a8   :  { %923 = vperm.xlu0 %3567, %v905_v63   ;;  %v3202_v22 = vpop.f32.mrb[20].mxu1 }
 0x4a9   :  { %v908_v9 = vmul.f32 %v4406_v24, %v3202_v22  ;;  %v836_v12 = vpop.f32.mrb[21].mxu1 }
 0x4aa   :  { %v907_v33 = vmul.f32 %v4402_v17, %v836_v12 }
 0x4ab   :  { %938 = vperm.xlu1 %3568, %v908_v9  }
 0x4ac   :  { %v3205_v51 = vpop.f32.mrb[22].mxu1 }
 0x4ad   :  { %v846_v62 = vpop.f32.mrb[23].mxu1  ;;  %v910_v14 = vmul.f32 %v4417_v49, %v3205_v51 }
 0x4ae   :  { %v909_v39 = vmul.f32 %v4413_v35, %v846_v62 }
 0x4af   :  { %933 = vperm.xlu1 %3568, %v907_v33  }
 0x4b0   :  { %v3208_v43 = vpop.f32.mrb[24].mxu1 }
 0x4b1   :  { %v856_v29 = vpop.f32.mrb[25].mxu1  ;;  %v912_v47 = vmul.f32 %v4428_v8, %v3208_v43 }
 0x4b2   :  { %v911_v49 = vmul.f32 %v4424_v10, %v856_v29 }
 0x4b3   :  { %948 = vperm.xlu1 %3568, %v910_v14  }
 0x4b4   :  { %v3211_v56 = vpop.f32.mrb[26].mxu1 }
 0x4b5   :  { %v914_v0 = vmul.f32 %v4435_v61, %v3211_v56  ;;  %v866_v58 = vpop.f32.mrb[27].mxu1 }
 0x4b6   :  { %v913_v61 = vmul.f32 %v4431_v40, %v866_v58 }
 0x4b7   :  { %943 = vperm.xlu1 %3568, %v909_v39   ;;  %968 = vperm.xlu0 %3567, %v914_v0  }
 0x4b8   :  { %v3214_v24 = vpop.f32.mrb[28].mxu1 }
 0x4b9   :  { %v916_v17 = vmul.f32 %v4442_v18, %v3214_v24  ;;  %v876_v52 = vpop.f32.mrb[29].mxu1 }
 0x4ba   :  { %v915_v8 = vmul.f32 %v4438_v20, %v876_v52 }
 0x4bb   :  { %958 = vperm.xlu1 %3568, %v912_v47   ;;  %978 = vperm.xlu0 %3567, %v916_v17  }
 0x4bc   :  { %v3217_v45 = vpop.f32.mrb[30].mxu1 }
 0x4bd   :  { %v918_v1 = vmul.f32 %v4449_v30, %v3217_v45  ;;  %v886_v23 = vpop.f32.mrb[31].mxu1  ;;  %v4555_v30 = vld [vmem:[%s5667_s5] ss:$0 sm:$0xff] }
 0x4be   :  { %v917_v18 = vmul.f32 %v4445_v26, %v886_v23  ;;  %v1331_v40 = vmul.f32 %v4555_v30, %v4146_v31  ;;  %v1333_v20 = vmul.f32 %v4555_v30, %v4142_v28  ;;  %v1337_v60 = vmul.f32 %v4555_v30, %v4182_v46 }
 0x4bf   :  { %953 = vperm.xlu1 %3568, %v911_v49   ;;  %988 = vperm.xlu0 %3567, %v918_v1   ;;  %v1339_v32 = vmul.f32 %v4555_v30, %v4225_v15  ;;  %v1332_v7 = vmul.f32 %v4555_v30, %v4165_v42  ;;  %v1341_v22 = vmul.f32 %v4555_v30, %v4221_v5 }
 0x4c0   :  { %v3220_v35 = vpop.f32.mrb[32].mxu1  ;;  %v1353_v26 = vsel %vm390_vm0, %v1333_v20, 0.0  ;;  %v1365_v11 = vsel %vm390_vm0, %v1337_v60, 0.0  ;;  %v1334_v12 = vmul.f32 %v4555_v30, %v4155_v37  ;;  %v1343_v33 = vmul.f32 %v4555_v30, %v4265_v4 }
 0x4c1   :  { %v920_v57 = vmul.f32 %v4452_v21, %v3220_v35  ;;  %v896_v25 = vpop.f32.mrb[33].mxu1  ;;  %v1347_v21 = vsel %vm390_vm0, %v1331_v40, 0.0  ;;  %v1371_v63 = vsel %vm390_vm0, %v1339_v32, 0.0  ;;  %v1350_v9 = vsel %vm390_vm0, %v1332_v7, 0.0  ;;  %v5759_v7 = vld [vmem:[#allocation7_spill] sm:$0xff] }
 0x4c2   :  { %v919_v10 = vmul.f32 %v4456_v3, %v896_v25  ;;  %v1335_v3 = vmul.f32 %v4555_v30, %v4185_v48  ;;  %v1377_v51 = vsel %vm390_vm0, %v1341_v22, 0.0  ;;  %v1356_v62 = vsel %vm390_vm0, %v1334_v12, 0.0  ;;  %v5760_v22 = vld [vmem:[#allocation5_spill] sm:$0xff] }
 0x4c3   :  { %963 = vperm.xlu1 %3568, %v913_v61   ;;  %998 = vperm.xlu0 %3567, %v920_v57   ;;  %v1336_v43 = vmul.f32 %v4555_v30, %v4204_v6  ;;  %v1383_v14 = vsel %vm390_vm0, %v1343_v33, 0.0  ;;  %v1338_v56 = vmul.f32 %v4555_v30, %v4194_v54  ;;  %v1340_v0 = vmul.f32 %v4555_v30, %v4244_v13 }
 0x4c4   :  { %v1359_v2 = vsel %vm390_vm0, %v1335_v3, 0.0  ;;  %v1342_v24 = vmul.f32 %v4555_v30, %v4234_v16  ;;  %v1344_v17 = vmul.f32 %v4555_v30, %v4284_v19 }
 0x4c5   :  { %v1362_v29 = vsel %vm390_vm0, %v1336_v43, 0.0  ;;  %v1368_v39 = vsel %vm390_vm0, %v1338_v56, 0.0  ;;  %v1374_v58 = vsel %vm390_vm0, %v1340_v0, 0.0 }
 0x4c6   :  { %v1380_v47 = vsel %vm390_vm0, %v1342_v24, 0.0  ;;  %v1386_v52 = vsel %vm390_vm0, %v1344_v17, 0.0  ;;  %v5765_v17 = vld [vmem:[#allocation10_spill] sm:$0xff] }
 0x4c7   :  { %973 = vperm.xlu1 %3568, %v915_v8  }
 0x4cb   :  { %983 = vperm.xlu1 %3568, %v917_v18  }
 0x4cf   :  { %993 = vperm.xlu1 %3568, %v919_v10  }
 0x4e2   :  { %1348 = vadd.xlane.f32.xlu0 %v1347_v21 }
 0x4e6   :  { %1354 = vadd.xlane.f32.xlu0 %v1353_v26 }
 0x4ea   :  { %1360 = vadd.xlane.f32.xlu0 %v1359_v2 }
 0x4ee   :  { %1366 = vadd.xlane.f32.xlu0 %v1365_v11 }
 0x4f2   :  { %1372 = vadd.xlane.f32.xlu0 %v1371_v63 }
 0x4f3   :  { %1351 = vadd.xlane.f32.xlu1 %v1350_v9 }
 0x4f6   :  { %1378 = vadd.xlane.f32.xlu0 %v1377_v51  ;;  %v5761_v51 = vld [vmem:[#allocation6_spill] sm:$0xff] }
 0x4f7   :  { %1357 = vadd.xlane.f32.xlu1 %v1356_v62  ;;  %v5762_v62 = vld [vmem:[#allocation4_spill] sm:$0xff] }
 0x4fa   :  { %1384 = vadd.xlane.f32.xlu0 %v1383_v14 }
 0x4fb   :  { %1363 = vadd.xlane.f32.xlu1 %v1362_v29  ;;  %v5763_v29 = vld [vmem:[#allocation11_spill] sm:$0xff] }
 0x4ff   :  { %1369 = vadd.xlane.f32.xlu1 %v1368_v39  ;;  %v5764_v39 = vld [vmem:[#allocation9_spill] sm:$0xff] }
 0x503   :  { %1375 = vadd.xlane.f32.xlu1 %v1374_v58 }
 0x507   :  { %1381 = vadd.xlane.f32.xlu1 %v1380_v47 }
 0x50b   :  { %1387 = vadd.xlane.f32.xlu1 %v1386_v52 }
 0x526   :  { %v929_v45 = vpop.permute.xlu1 %928 }
 0x527   :  { %v1002_v49 = vmul.f32 %v929_v45, %v3961_v41  ;;  %v924_v1 = vpop.permute.xlu0 %923  ;;  %v5766_v45 = vld [vmem:[#allocation8_spill] sm:$0xff] }
 0x528   :  { %v1001_v23 = vmul.f32 %v924_v1, %v3943_v36 }
 0x52a   :  { %v1017_v35 = vpack.c.bf16 %v1002_v49, %v1001_v23  ;;  %v939_v61 = vpop.permute.xlu1 %938  ;;  %v4624_v23 = vpack.c.bf16 %v4464_v27, %v4464_v27  ;;  %v1162_v27 = vpack.c.bf16 %v4165_v42, %v4146_v31 }
 0x52b   :  { %v1004_v25 = vmul.f32 %v939_v61, %v3951_v38  ;;  %v3578_v61 = vld [vmem:[%s5673_s7 + $0x8] sm:$0xff]  }
 0x52c   :  { %3222 = vmatpush3.bf16.msra.mxu0 %v1017_v35  ;;  %v3577_v35 = vld [vmem:[%s5673_s7] sm:$0xff]  }
 0x52d   :  { %3223 = vmatprep.subr.bf16.mxu0 %v5757_v50 }
 0x52e   :  { %v934_v57 = vpop.permute.xlu1 %933 }
 0x52f   :  { %v1003_v8 = vmul.f32 %v934_v57, %v3940_v34  ;;  %v5758_v34 = vld [vmem:[#allocation3_spill] sm:$0xff] }
 0x530   :  { %5767 = vst [vmem:[#allocation3_spill] sm:$0xff] %v4624_v23 }
 0x531   :  { %v1018_v18 = vpack.c.bf16 %v1004_v25, %v1003_v8 }
 0x532   :  { %v949_v10 = vpop.permute.xlu1 %948 }
 0x533   :  { %3224 = vmatpush3.bf16.msra.mxu0 %v1018_v18  ;;  %v1006_v41 = vmul.f32 %v949_v10, %v4009_v59 }
 0x534   :  { %3225 = vmatprep.subr.bf16.mxu0 %v5757_v50 }
 0x536   :  { %v944_v40 = vpop.permute.xlu1 %943  ;;  %v969_v20 = vpop.permute.xlu0 %968 }
 0x537   :  { %v1005_v36 = vmul.f32 %v944_v40, %v3990_v53  ;;  %v1010_v63 = vmul.f32 %v969_v20, %v5759_v7  ;;  %v1163_v40 = vpack.c.bf16 %v4155_v37, %v4142_v28  ;;  %v1166_v20 = vpack.c.bf16 %v4244_v13, %v4225_v15  ;;  %v4678_v7 = vld [vmem:[%s5666_s1 + $0x20] sm:$0xff]  }
 0x539   :  { %v1019_v21 = vpack.c.bf16 %v1006_v41, %v1005_v36  ;;  %v3688_v41 = vld [vmem:[%s5666_s1] sm:$0xff]   ;;  %v1164_v36 = vpack.c.bf16 %v4204_v6, %v4185_v48 }
 0x53a   :  { %v959_v26 = vpop.permute.xlu1 %958  ;;  %v979_v60 = vpop.permute.xlu0 %978 }
 0x53b   :  { %3226 = vmatpush3.bf16.msra.mxu0 %v1019_v21  ;;  %v1008_v38 = vmul.f32 %v959_v26, %v3998_v55  ;;  %v1012_v33 = vmul.f32 %v979_v60, %v5761_v51  ;;  %v1165_v21 = vpack.c.bf16 %v4194_v54, %v4182_v46  ;;  %v1167_v26 = vpack.c.bf16 %v4234_v16, %v4221_v5  ;;  %v4660_v60 = vld [vmem:[%s5666_s1 + $0x8] sm:$0xff]  }
 0x53c   :  { %3227 = vmatprep.subr.bf16.mxu0 %v5757_v50 }
 0x53e   :  { %v954_v3 = vpop.permute.xlu1 %953  ;;  %v989_v9 = vpop.permute.xlu0 %988 }
 0x53f   :  { %v1007_v2 = vmul.f32 %v954_v3, %v5758_v34  ;;  %v1014_v56 = vmul.f32 %v989_v9, %v5763_v29  ;;  %v1168_v3 = vpack.c.bf16 %v4284_v19, %v4265_v4  ;;  %v5769_v34 = vld [vmem:[#allocation25_spill] sm:$0xff] }
 0x541   :  { %v1020_v11 = vpack.c.bf16 %v1008_v38, %v1007_v2  ;;  %v5768_v38 = vld [vmem:[#allocation23_spill] sm:$0xff] }
 0x542   :  { %v964_v32 = vpop.permute.xlu1 %963  ;;  %v999_v58 = vpop.permute.xlu0 %998  ;;  %v1169_v2 = vpack.c.bf16 %v5769_v34, %v5768_v38 }
 0x543   :  { %v1009_v59 = vmul.f32 %v964_v32, %v5760_v22  ;;  %3228 = vmatpush3.bf16.msra.mxu0 %v1020_v11  ;;  %v1016_v52 = vmul.f32 %v999_v58, %v5765_v17  ;;  %v4666_v11 = vld [vmem:[%s5666_s1 + $0x10] sm:$0xff]   ;;  %v4672_v32 = vld [vmem:[%s5666_s1 + $0x18] sm:$0xff]  }
 0x544   :  { %3229 = vmatprep.subr.bf16.mxu0 %v5757_v50  ;;  %v4690_v22 = vld [vmem:[%s5666_s1 + $0x30] sm:$0xff]  }
 0x545   :  { %v1021_v53 = vpack.c.bf16 %v1010_v63, %v1009_v59  ;;  %v4684_v63 = vld [vmem:[%s5666_s1 + $0x28] sm:$0xff]   ;;  %v4696_v59 = vld [vmem:[%s5666_s1 + $0x38] sm:$0xff]  }
 0x546   :  { %v974_v12 = vpop.permute.xlu1 %973 }
 0x547   :  { %v1011_v43 = vmul.f32 %v974_v12, %v5762_v62  ;;  %3230 = vmatpush3.bf16.msra.mxu0 %v1021_v53  ;;  %v2818_v53 = vld [vmem:[%s5674_s8] ss:$0 sm:$0xff] }
 0x548   :  { %3231 = vmatprep.subr.bf16.mxu0 %v5757_v50 }
 0x549   :  { %v1022_v55 = vpack.c.bf16 %v1012_v33, %v1011_v43 }
 0x54a   :  { %v984_v14 = vpop.permute.xlu1 %983 }
 0x54b   :  { %v1013_v0 = vmul.f32 %v984_v14, %v5764_v39  ;;  %3232 = vmatpush3.bf16.msra.mxu0 %v1022_v55  ;;  %v4709_v14 = vld [vmem:[%s5670_s4] ss:$0 sm:$0xff] }
 0x54c   :  { %3233 = vmatprep.subr.bf16.mxu0 %v5757_v50 }
 0x54d   :  { %v1023_v24 = vpack.c.bf16 %v1014_v56, %v1013_v0  ;;  %v3697_v56 = vld [vmem:[%s5665_s0 + $0x10] sm:$0xff] }
 0x54e   :  { %v994_v47 = vpop.permute.xlu1 %993 }
 0x54f   :  { %v1015_v49 = vmul.f32 %v994_v47, %v5766_v45  ;;  %3234 = vmatpush3.bf16.msra.mxu0 %v1023_v24  ;;  %v3698_v24 = vld [vmem:[%s5665_s0] sm:$0xff] }
 0x550   :  { %3235 = vmatprep.subr.bf16.mxu0 %v5757_v50 }
 0x551   :  { %v1024_v1 = vpack.c.bf16 %v1016_v52, %v1015_v49  ;;  %v3699_v52 = vld [vmem:[%s5665_s0 + $0x18] sm:$0xff] }
 0x553   :  { %3236 = vmatpush3.bf16.msra.mxu0 %v1024_v1 }
 0x554   :  { %3241 = vmatprep.subr.bf16.mxu0 %v5757_v50 }
 0x556   :  { %3238 = vmatmul.mubr.bf16.vlgmr.msra.gmra.mrb[16].mxu0 %v4624_v23 }
 0x557   :  { %3242 = vmatpush3.bf16.msra.mxu0 %v3577_v35  ;;  %3245 = vmatprep.mubr.msk.bf16.mxu0 %vm3735_vm1, %v5757_v50 }
 0x558   :  { %3243 = vmatprep.subr.bf16.mxu0 %v5757_v50 }
 0x55b   :  { %3244 = vmatpush3.bf16.msra.mxu0 %v3578_v61 }
 0x55c   :  { %3249 = vmatprep.subr.bf16.mxu0 %v1162_v27 }
 0x629   :  { %v1059_v57 = vpop.f32.mrb[16].mxu0 }
 0x62a   :  { %v1065_v25 = vpack.c.bf16 %v1059_v57, %v1059_v57  ;;  %v3239_v8 = vpop.f32.mrb[17].mxu0 }
 0x62b   :  { %v1062_v18 = vpop.f32.mrb[18].mxu0 }
 0x62c   :  { %v3240_v10 = vpop.f32.mrb[19].mxu0  ;;  %3246 = vmatmul.mubr.msk.bf16.vlgmr.msra.gmra.mrb[20].mxu0 %vm390_vm0, %v1065_v25 }
 0x62d   :  { %3250 = vmatpush3.bf16.msra.mxu0 %v1162_v27  ;;  %3265 = vmatprep.mubr.bf16.mxu0 %v3688_v41  ;;  %v3700_v27 = vld [vmem:[%s5665_s0 + $0x8] sm:$0xff] }
 0x62e   :  { %3251 = vmatprep.subr.bf16.mxu0 %v1163_v40 }
 0x631   :  { %3252 = vmatpush3.bf16.msra.mxu0 %v1163_v40 }
 0x632   :  { %3253 = vmatprep.subr.bf16.mxu0 %v1164_v36 }
 0x635   :  { %3254 = vmatpush3.bf16.msra.mxu0 %v1164_v36 }
 0x636   :  { %3255 = vmatprep.subr.bf16.mxu0 %v1165_v21 }
 0x639   :  { %3256 = vmatpush3.bf16.msra.mxu0 %v1165_v21  ;;  %v3701_v21 = vld [vmem:[%s5665_s0 + $0x30] sm:$0xff] }
 0x63a   :  { %3257 = vmatprep.subr.bf16.mxu0 %v1166_v20 }
 0x63d   :  { %3258 = vmatpush3.bf16.msra.mxu0 %v1166_v20 }
 0x63e   :  { %3259 = vmatprep.subr.bf16.mxu0 %v1167_v26 }
 0x641   :  { %3260 = vmatpush3.bf16.msra.mxu0 %v1167_v26 }
 0x642   :  { %3261 = vmatprep.subr.bf16.mxu0 %v1168_v3 }
 0x645   :  { %3262 = vmatpush3.bf16.msra.mxu0 %v1168_v3  ;;  %v3702_v3 = vld [vmem:[%s5665_s0 + $0x20] sm:$0xff] }
 0x646   :  { %3263 = vmatprep.subr.bf16.mxu0 %v1169_v2 }
 0x649   :  { %3264 = vmatpush3.bf16.msra.mxu0 %v1169_v2 }
 0x64c   :  { %3266 = vmatmul.mubr.bf16.vlgmr.msra.gmra.mrb[24].mxu0 %v4660_v60 }
 0x64d   :  { %3269 = vmatprep.mubr.bf16.mxu0 %v4666_v11 }
 0x654   :  { %3270 = vmatmul.mubr.bf16.gmra.mrb[28].mxu0 %v4672_v32 }
 0x655   :  { %3273 = vmatprep.mubr.bf16.mxu0 %v4678_v7 }
 0x65c   :  { %3274 = vmatmul.mubr.bf16.gmra.mrb[32].mxu0 %v4684_v63 }
 0x65d   :  { %3277 = vmatprep.mubr.bf16.mxu0 %v4690_v22 }
 0x664   :  { %3278 = vmatmul.mubr.bf16.gmra.mrb[36].mxu0 %v4696_v59 }
 0x665   :  { %3386 = vmatprep.mubr.bf16.mxu0 %v3688_v41 }
 0x6ff   :  { %v1121_v9 = vpop.f32.mrb[20].mxu0 }
 0x700   :  { %v1122_v12 = vadd.f32 %v2818_v53, %v1121_v9  ;;  %v3247_v51 = vpop.f32.mrb[21].mxu0 }
 0x701   :  { %v1124_v33 = vpop.f32.mrb[22].mxu0  ;;  %v3703_v51 = vld [vmem:[%s5665_s0 + $0x38] sm:$0xff] }
 0x702   :  { %3613 = vtanh.f32 %v1122_v12  ;;  %v3248_v62 = vpop.f32.mrb[23].mxu0 }
 0x70c   :  { %v3614_v43 = vpop.eup %3613 }
 0x70d   :  { %1145 = vst.msk [vmem:[%s5675_s10] sm:$0x3] %vm1144_vm5, %v3614_v43 }
 0x71f   :  { %v3267_v55 = vpop.f32.mrb[24].mxu0 }
 0x720   :  { %v1269_v29 = vmul.f32 %v4709_v14, %v3267_v55  ;;  %v4715_v39 = vadd.f32 %v3697_v56, %v3267_v55  ;;  %v1204_v0 = vpop.f32.mrb[25].mxu0  ;;  %v3704_v55 = vld [vmem:[%s5665_s0 + $0x28] sm:$0xff] }
 0x721   :  { %v1267_v58 = vmul.f32 %v4709_v14, %v1204_v0  ;;  %v4721_v47 = vadd.f32 %v3698_v24, %v1204_v0  ;;  %v3268_v17 = vpop.f32.mrb[26].mxu0 }
 0x722   :  { %2879 = vst.msk [vmem:[%s5668_s9 + $0x110] sm:$0xff] %vm390_vm0, %v4715_v39  ;;  %v4731_v45 = vadd.f32 %v3699_v52, %v3268_v17  ;;  %v1207_v49 = vpop.f32.mrb[27].mxu0  ;;  %v1289_v1 = vsel %vm390_vm0, %v1269_v29, 0.0  ;;  %v1270_v35 = vmul.f32 %v4709_v14, %v3268_v17 }
 0x723   :  { %2877 = vst.msk [vmem:[%s5668_s9 + $0x100] sm:$0xff] %vm390_vm0, %v4721_v47  ;;  %v1268_v61 = vmul.f32 %v4709_v14, %v1207_v49  ;;  %v4744_v57 = vadd.f32 %v3700_v27, %v1207_v49  ;;  %1290 = vadd.xlane.f32.xlu0 %v1289_v1  ;;  %v1283_v25 = vsel %vm390_vm0, %v1267_v58, 0.0  ;;  %v3705_v1 = vld [vmem:[%s5665_s0 + $0x50] sm:$0xff] }
 0x724   :  { %2880 = vst.msk [vmem:[%s5668_s9 + $0x118] sm:$0xff] %vm390_vm0, %v4731_v45  ;;  %1284 = vadd.xlane.f32.xlu1 %v1283_v25  ;;  %v1292_v40 = vsel %vm390_vm0, %v1270_v35, 0.0  ;;  %v1981_v41 = vpack.c.bf16 %v4731_v45, %v4715_v39  ;;  %v3706_v25 = vld [vmem:[%s5665_s0 + $0x40] sm:$0xff] }
 0x725   :  { %2878 = vst.msk [vmem:[%s5668_s9 + $0x108] sm:$0xff] %vm390_vm0, %v4744_v57  ;;  %v1980_v8 = vpack.c.bf16 %v4744_v57, %v4721_v47  ;;  %v1286_v18 = vsel %vm390_vm0, %v1268_v61, 0.0 }
 0x727   :  { %3370 = vmatprep.subr.bf16.mxu0 %v1980_v8  ;;  %1287 = vadd.xlane.f32.xlu0 %v1286_v18  ;;  %v3271_v10 = vpop.f32.mrb[28].mxu0 }
 0x728   :  { %v1273_v36 = vmul.f32 %v4709_v14, %v3271_v10  ;;  %v4767_v20 = vadd.f32 %v3701_v21, %v3271_v10  ;;  %1293 = vadd.xlane.f32.xlu1 %v1292_v40  ;;  %v1220_v26 = vpop.f32.mrb[29].mxu0  ;;  %3371 = vmatpush3.bf16.msra.mxu0 %v1980_v8 }
 0x729   :  { %v4772_v2 = vadd.f32 %v3702_v3, %v1220_v26  ;;  %v3272_v53 = vpop.f32.mrb[30].mxu0  ;;  %3372 = vmatprep.subr.bf16.mxu0 %v1981_v41  ;;  %v1271_v9 = vmul.f32 %v4709_v14, %v1220_v26  ;;  %v3708_v3 = vld [vmem:[%s5665_s0 + $0x48] sm:$0xff] }
 0x72a   :  { %2883 = vst.msk [vmem:[%s5668_s9 + $0x130] sm:$0xff] %vm390_vm0, %v4767_v20  ;;  %v1274_v12 = vmul.f32 %v4709_v14, %v3272_v53  ;;  %v4784_v33 = vadd.f32 %v3703_v51, %v3272_v53  ;;  %v1223_v62 = vpop.f32.mrb[31].mxu0  ;;  %v1301_v43 = vsel %vm390_vm0, %v1273_v36, 0.0 }
 0x72b   :  { %2881 = vst.msk [vmem:[%s5668_s9 + $0x120] sm:$0xff] %vm390_vm0, %v4772_v2  ;;  %v4795_v29 = vadd.f32 %v3704_v55, %v1223_v62  ;;  %1302 = vadd.xlane.f32.xlu0 %v1301_v43  ;;  %v1272_v56 = vmul.f32 %v4709_v14, %v1223_v62  ;;  %v1295_v24 = vsel %vm390_vm0, %v1271_v9, 0.0 }
 0x72c   :  { %2884 = vst.msk [vmem:[%s5668_s9 + $0x138] sm:$0xff] %vm390_vm0, %v4784_v33  ;;  %3373 = vmatpush3.bf16.msra.mxu0 %v1981_v41  ;;  %v1304_v0 = vsel %vm390_vm0, %v1274_v12, 0.0  ;;  %v1983_v52 = vpack.c.bf16 %v4784_v33, %v4767_v20  ;;  %v3707_v41 = vld [vmem:[%s5665_s0 + $0x58] sm:$0xff] }
 0x72d   :  { %2882 = vst.msk [vmem:[%s5668_s9 + $0x128] sm:$0xff] %vm390_vm0, %v4795_v29  ;;  %1305 = vadd.xlane.f32.xlu1 %v1304_v0  ;;  %v1982_v58 = vpack.c.bf16 %v4795_v29, %v4772_v2  ;;  %v1298_v27 = vsel %vm390_vm0, %v1272_v56, 0.0  ;;  %v3709_v0 = vld [vmem:[%s5665_s0 + $0x70] sm:$0xff] }
 0x72f   :  { %1296 = vadd.xlane.f32.xlu0 %v1295_v24  ;;  %v3275_v17 = vpop.f32.mrb[32].mxu0  ;;  %3374 = vmatprep.subr.bf16.mxu0 %v1982_v58 }
 0x730   :  { %v1277_v49 = vmul.f32 %v4709_v14, %v3275_v17  ;;  %v4818_v35 = vadd.f32 %v3705_v1, %v3275_v17  ;;  %v1236_v61 = vpop.f32.mrb[33].mxu0  ;;  %3375 = vmatpush3.bf16.msra.mxu0 %v1982_v58 }
 0x731   :  { %v4824_v8 = vadd.f32 %v3706_v25, %v1236_v61  ;;  %3376 = vmatprep.subr.bf16.mxu0 %v1983_v52  ;;  %1299 = vadd.xlane.f32.xlu1 %v1298_v27  ;;  %v3276_v18 = vpop.f32.mrb[34].mxu0  ;;  %v1275_v10 = vmul.f32 %v4709_v14, %v1236_v61  ;;  %v3711_v25 = vld [vmem:[%s5665_s0 + $0x78] sm:$0xff] }
 0x732   :  { %2887 = vst.msk [vmem:[%s5668_s9 + $0x150] sm:$0xff] %vm390_vm0, %v4818_v35  ;;  %v1278_v40 = vmul.f32 %v4709_v14, %v3276_v18  ;;  %v4836_v36 = vadd.f32 %v3707_v41, %v3276_v18  ;;  %v1239_v21 = vpop.f32.mrb[35].mxu0  ;;  %v1313_v26 = vsel %vm390_vm0, %v1277_v49, 0.0  ;;  %v3712_v41 = vld [vmem:[%s5665_s0 + $0x68] sm:$0xff] }
 0x733   :  { %2885 = vst.msk [vmem:[%s5668_s9 + $0x140] sm:$0xff] %vm390_vm0, %v4824_v8  ;;  %v4847_v53 = vadd.f32 %v3708_v3, %v1239_v21  ;;  %1314 = vadd.xlane.f32.xlu0 %v1313_v26  ;;  %v1276_v9 = vmul.f32 %v4709_v14, %v1239_v21  ;;  %v1307_v62 = vsel %vm390_vm0, %v1275_v10, 0.0 }
 0x734   :  { %2888 = vst.msk [vmem:[%s5668_s9 + $0x158] sm:$0xff] %vm390_vm0, %v4836_v36  ;;  %3377 = vmatpush3.bf16.msra.mxu0 %v1983_v52  ;;  %v1316_v12 = vsel %vm390_vm0, %v1278_v40, 0.0  ;;  %v1985_v55 = vpack.c.bf16 %v4836_v36, %v4818_v35  ;;  %v3710_v52 = vld [vmem:[%s5665_s0 + $0x60] sm:$0xff] }
 0x735   :  { %2886 = vst.msk [vmem:[%s5668_s9 + $0x148] sm:$0xff] %vm390_vm0, %v4847_v53  ;;  %1317 = vadd.xlane.f32.xlu1 %v1316_v12  ;;  %v1984_v51 = vpack.c.bf16 %v4847_v53, %v4824_v8  ;;  %v1310_v17 = vsel %vm390_vm0, %v1276_v9, 0.0 }
 0x737   :  { %1308 = vadd.xlane.f32.xlu0 %v1307_v62  ;;  %v3279_v43 = vpop.f32.mrb[36].mxu0  ;;  %3378 = vmatprep.subr.bf16.mxu0 %v1984_v51 }
 0x738   :  { %v1281_v56 = vmul.f32 %v4709_v14, %v3279_v43  ;;  %v4870_v58 = vadd.f32 %v3709_v0, %v3279_v43  ;;  %v1252_v24 = vpop.f32.mrb[37].mxu0  ;;  %3379 = vmatpush3.bf16.msra.mxu0 %v1984_v51  ;;  %v1345_v51 = vmul.f32 %v4555_v30, %v5768_v38 }
 0x739   :  { %v4876_v49 = vadd.f32 %v3710_v52, %v1252_v24  ;;  %3380 = vmatprep.subr.bf16.mxu0 %v1985_v55  ;;  %1311 = vadd.xlane.f32.xlu1 %v1310_v17  ;;  %v3280_v1 = vpop.f32.mrb[38].mxu0  ;;  %v1279_v61 = vmul.f32 %v4709_v14, %v1252_v24  ;;  %v1352_v24 = vpop.xlane.xlu1 %1351 }
 0x73a   :  { %5770 = vst [vmem:[#allocation7_spill] sm:$0xff] %v4870_v58  ;;  %2891 = vst.msk [vmem:[%s5668_s9 + $0x170] sm:$0xff] %vm390_vm0, %v4870_v58  ;;  %v1282_v27 = vmul.f32 %v4709_v14, %v3280_v1  ;;  %v4888_v18 = vadd.f32 %v3711_v25, %v3280_v1  ;;  %v1255_v10 = vpop.f32.mrb[39].mxu0  ;;  %v1325_v40 = vsel %vm390_vm0, %v1281_v56, 0.0  ;;  %v1389_v56 = vsel %vm390_vm0, %v1345_v51, 0.0 }
 0x73b   :  { %2889 = vst.msk [vmem:[%s5668_s9 + $0x160] sm:$0xff] %vm390_vm0, %v4876_v49  ;;  %v4899_v21 = vadd.f32 %v3712_v41, %v1255_v10  ;;  %1326 = vadd.xlane.f32.xlu0 %v1325_v40  ;;  %v1280_v26 = vmul.f32 %v4709_v14, %v1255_v10  ;;  %v1319_v12 = vsel %vm390_vm0, %v1279_v61, 0.0 }
 0x73c   :  { %2892 = vst.msk [vmem:[%s5668_s9 + $0x178] sm:$0xff] %vm390_vm0, %v4888_v18  ;;  %3381 = vmatpush3.bf16.msra.mxu0 %v1985_v55  ;;  %v1328_v3 = vsel %vm390_vm0, %v1282_v27, 0.0  ;;  %v1987_v62 = vpack.c.bf16 %v4888_v18, %v4870_v58  ;;  %v1346_v55 = vmul.f32 %v4555_v30, %v5769_v34  ;;  %v1349_v30 = vpop.xlane.xlu0 %1348 }
 0x73d   :  { %2890 = vst.msk [vmem:[%s5668_s9 + $0x168] sm:$0xff] %vm390_vm0, %v4899_v21  ;;  %1329 = vadd.xlane.f32.xlu1 %v1328_v3  ;;  %v1986_v9 = vpack.c.bf16 %v4899_v21, %v4876_v49  ;;  %v1322_v43 = vsel %vm390_vm0, %v1280_v26, 0.0  ;;  %v1358_v52 = vpop.xlane.xlu1 %1357 }
 0x73e   :  { %v1392_v0 = vsel %vm390_vm0, %v1346_v55, 0.0 }
 0x73f   :  { %1320 = vadd.xlane.f32.xlu0 %v1319_v12  ;;  %3382 = vmatprep.subr.bf16.mxu0 %v1986_v9 }
 0x740   :  { %3383 = vmatpush3.bf16.msra.mxu0 %v1986_v9  ;;  %v1355_v17 = vpop.xlane.xlu0 %1354 }
 0x741   :  { %3384 = vmatprep.subr.bf16.mxu0 %v1987_v62  ;;  %1323 = vadd.xlane.f32.xlu1 %v1322_v43  ;;  %v1364_v1 = vpop.xlane.xlu1 %1363 }
 0x743   :  { %1390 = vadd.xlane.f32.xlu0 %v1389_v56 }
 0x744   :  { %3385 = vmatpush3.bf16.msra.mxu0 %v1987_v62 }
 0x745   :  { %1393 = vadd.xlane.f32.xlu1 %v1392_v0  ;;  %3463 = vmatprep.subr.bf16.mxu0 %v5757_v50  ;;  %v1370_v61 = vpop.xlane.xlu1 %1369  ;;  %v4935_v0 = vld [vmem:[#allocation2] ss:$0 sm:$0xff] }
 0x746   :  { %5771 = vst [vmem:[#allocation5_spill] sm:$0xff] %v4935_v0 }
 0x747   :  { %3387 = vmatmul.mubr.bf16.vlgmr.msra.gmra.mrb[40].mxu0 %v4660_v60  ;;  %v1361_v60 = vpop.xlane.xlu0 %1360 }
 0x748   :  { %3390 = vmatprep.mubr.bf16.mxu0 %v4666_v11 }
 0x749   :  { %v1376_v27 = vpop.xlane.xlu1 %1375 }
 0x74b   :  { %v1367_v11 = vpop.xlane.xlu0 %1366 }
 0x74d   :  { %v1382_v25 = vpop.xlane.xlu1 %1381 }
 0x74f   :  { %3391 = vmatmul.mubr.bf16.gmra.mrb[44].mxu0 %v4672_v32  ;;  %v1373_v32 = vpop.xlane.xlu0 %1372 }
 0x750   :  { %3394 = vmatprep.mubr.bf16.mxu0 %v4678_v7 }
 0x751   :  { %v1388_v10 = vpop.xlane.xlu1 %1387 }
 0x753   :  { %v1379_v7 = vpop.xlane.xlu0 %1378 }
 0x757   :  { %3395 = vmatmul.mubr.bf16.gmra.mrb[48].mxu0 %v4684_v63  ;;  %v1385_v63 = vpop.xlane.xlu0 %1384 }
 0x758   :  { %3398 = vmatprep.mubr.bf16.mxu0 %v4690_v22 }
 0x75f   :  { %3399 = vmatmul.mubr.bf16.gmra.mrb[52].mxu0 %v4696_v59 }
 0x760   :  { %3479 = vmatprep.mubr.msk.bf16.mxu0 %vm3735_vm1, %v5757_v50 }
 0x7b0   :  { %v1291_v22 = vpop.xlane.xlu0 %1290 }
 0x7b1   :  { %v1285_v40 = vpop.xlane.xlu1 %1284  ;;  %v1397_v55 = vadd.f32 %v1355_v17, %v1291_v22 }
 0x7b2   :  { %v1395_v23 = vadd.f32 %v1349_v30, %v1285_v40 }
 0x7b3   :  { %v4938_v13 = vadd.f32 %v4935_v0, %v1397_v55 }
 0x7b4   :  { %v1288_v59 = vpop.xlane.xlu0 %1287  ;;  %v4941_v17 = vadd.f32 %v4935_v0, %v1395_v23 }
 0x7b5   :  { %v1294_v41 = vpop.xlane.xlu1 %1293  ;;  %v1396_v34 = vadd.f32 %v1352_v24, %v1288_v59 }
 0x7b6   :  { %v1398_v46 = vadd.f32 %v1358_v52, %v1294_v41 }
 0x7b7   :  { %v4947_v24 = vadd.f32 %v4935_v0, %v1396_v34 }
 0x7b8   :  { %v1303_v26 = vpop.xlane.xlu0 %1302  ;;  %v1421_v34 = vadd.f32 %v4935_v0, %v1398_v46 }
 0x7b9   :  { %v1401_v4 = vadd.f32 %v1367_v11, %v1303_v26  ;;  %v1435_v46 = vsel %vm548_vm2, %v4947_v24, -inf }
 0x7ba   :  { %v1306_v3 = vpop.xlane.xlu1 %1305  ;;  %v1437_v26 = vsel %vm548_vm2, %v1421_v34, -inf }
 0x7bb   :  { %v1402_v19 = vadd.f32 %v1370_v61, %v1306_v3 }
 0x7bc   :  { %v1297_v9 = vpop.xlane.xlu0 %1296 }
 0x7bd   :  { %v1399_v5 = vadd.f32 %v1361_v60, %v1297_v9  ;;  %v4950_v60 = vadd.f32 %v4935_v0, %v1401_v4 }
 0x7be   :  { %v1300_v12 = vpop.xlane.xlu1 %1299 }
 0x7bf   :  { %v1400_v38 = vadd.f32 %v1364_v1, %v1300_v12  ;;  %v4953_v1 = vadd.f32 %v4935_v0, %v1402_v19  ;;  %v4956_v52 = vadd.f32 %v4935_v0, %v1399_v5  ;;  %v1434_v5 = vsel %vm548_vm2, %v4941_v17, -inf }
 0x7c0   :  { %v1315_v51 = vpop.xlane.xlu0 %1314 }
 0x7c1   :  { %v1405_v54 = vadd.f32 %v1379_v7, %v1315_v51  ;;  %v4944_v22 = vadd.f32 %v4935_v0, %v1400_v38  ;;  %v1436_v38 = vsel %vm548_vm2, %v4938_v13, -inf }
 0x7c2   :  { %v1318_v62 = vpop.xlane.xlu1 %1317 }
 0x7c3   :  { %v1406_v48 = vadd.f32 %v1382_v25, %v1318_v62  ;;  %v1438_v25 = vsel %vm548_vm2, %v4956_v52, -inf }
 0x7c4   :  { %v1309_v43 = vpop.xlane.xlu0 %1308 }
 0x7c5   :  { %v1403_v30 = vadd.f32 %v1373_v32, %v1309_v43  ;;  %v4965_v32 = vadd.f32 %v4935_v0, %v1405_v54  ;;  %v4968_v4 = vadd.f32 %v4935_v0, %v1406_v48  ;;  %v1442_v54 = vsel %vm548_vm2, %v4950_v60, -inf }
 0x7c6   :  { %v1312_v56 = vpop.xlane.xlu1 %1311  ;;  %v1444_v48 = vsel %vm548_vm2, %v4953_v1, -inf }
 0x7c7   :  { %v1404_v15 = vadd.f32 %v1376_v27, %v1312_v56  ;;  %v4975_v27 = vadd.f32 %v4935_v0, %v1403_v30  ;;  %v1450_v9 = vsel %vm548_vm2, %v4965_v32, -inf  ;;  %v1452_v12 = vsel %vm548_vm2, %v4968_v4, -inf }
 0x7c8   :  { %v1327_v16 = vpop.xlane.xlu0 %1326  ;;  %v1443_v56 = vmax.f32 %v1436_v38, %v1442_v54  ;;  %v1445_v30 = vmax.f32 %v1437_v26, %v1444_v48 }
 0x7c9   :  { %v4959_v23 = vadd.f32 %v4935_v0, %v1404_v15  ;;  %v1440_v15 = vsel %vm548_vm2, %v4944_v22, -inf  ;;  %v1446_v62 = vsel %vm548_vm2, %v4975_v27, -inf }
 0x7ca   :  { %v1330_v6 = vpop.xlane.xlu1 %1329  ;;  %v1441_v3 = vmax.f32 %v1435_v46, %v1440_v15  ;;  %v1451_v46 = vmax.f32 %v1443_v56, %v1450_v9 }
 0x7cb   :  { %v1448_v40 = vsel %vm548_vm2, %v4959_v23, -inf }
 0x7cc   :  { %v1321_v11 = vpop.xlane.xlu0 %1320 }
 0x7cd   :  { %v1407_v61 = vadd.f32 %v1385_v63, %v1321_v11  ;;  %v1439_v11 = vmax.f32 %v1434_v5, %v1438_v25 }
 0x7ce   :  { %v1324_v19 = vpop.xlane.xlu1 %1323 }
 0x7cf   :  { %v1408_v7 = vadd.f32 %v1388_v10, %v1324_v19  ;;  %v4988_v59 = vadd.f32 %v4935_v0, %v1407_v61  ;;  %v1449_v61 = vmax.f32 %v1441_v3, %v1448_v40  ;;  %v1447_v28 = vmax.f32 %v1439_v11, %v1446_v62 }
 0x7d0   :  { %v1391_v63 = vpop.xlane.xlu0 %1390 }
 0x7d1   :  { %v4991_v10 = vadd.f32 %v4935_v0, %v1408_v7  ;;  %v1409_v41 = vadd.f32 %v1391_v63, %v1327_v16  ;;  %v1454_v19 = vsel %vm548_vm2, %v4988_v59, -inf  ;;  %v1453_v63 = vmax.f32 %v1445_v30, %v1452_v12 }
 0x7d2   :  { %v1394_v51 = vpop.xlane.xlu1 %1393  ;;  %v1455_v38 = vmax.f32 %v1447_v28, %v1454_v19 }
 0x7d3   :  { %v1456_v43 = vsel %vm548_vm2, %v4991_v10, -inf  ;;  %v5003_v55 = vadd.f32 %v4935_v0, %v1409_v41  ;;  %v1410_v16 = vadd.f32 %v1394_v51, %v1330_v6 }
 0x7d4   :  { %v1457_v37 = vmax.f32 %v1449_v61, %v1456_v43 }
 0x7d5   :  { %v1458_v15 = vsel %vm548_vm2, %v5003_v55, -inf  ;;  %v5010_v7 = vadd.f32 %v4935_v0, %v1410_v16 }
 0x7d6   :  { %v1459_v54 = vmax.f32 %v1451_v46, %v1458_v15  ;;  %v1462_v48 = vmax.f32 %v1455_v38, %v1457_v37 }
 0x7d7   :  { %v1460_v6 = vsel %vm548_vm2, %v5010_v7, -inf }
 0x7d8   :  { %v1461_v5 = vmax.f32 %v1453_v63, %v1460_v6 }
 0x7da   :  { %v1463_v25 = vmax.f32 %v1459_v54, %v1461_v5 }
 0x7dc   :  { %v1464_v40 = vmax.f32 %v1462_v48, %v1463_v25 }
 0x7de   :  { %v1465_v41 = vrot.slane %v1464_v40, 4 }
 0x7e0   :  { %v1466_v26 = vmax.f32 %v1464_v40, %v1465_v41 }
 0x7e2   :  { %v1467_v3 = vrot.slane %v1466_v26, 2 }
 0x7e4   :  { %v1468_v51 = vmax.f32 %v1466_v26, %v1467_v3 }
 0x7e6   :  { %v1469_v31 = vrot.slane %v1468_v51, 1 }
 0x7e8   :  { %v5014_v16 = vmax.f32 %v1468_v51, %v1469_v31 }
 0x7ea   :  { %v1471_v9 = vsub.f32 %v4941_v17, %v5014_v16  ;;  %v1472_v12 = vsub.f32 %v4947_v24, %v5014_v16  ;;  %v1473_v28 = vsub.f32 %v4938_v13, %v5014_v16  ;;  %v1474_v37 = vsub.f32 %v1421_v34, %v5014_v16 }
 0x7eb   :  { %v1475_v30 = vsub.f32 %v4956_v52, %v5014_v16  ;;  %v1476_v31 = vsub.f32 %v4944_v22, %v5014_v16  ;;  %v1477_v24 = vsub.f32 %v4950_v60, %v5014_v16  ;;  %v1478_v34 = vsub.f32 %v4953_v1, %v5014_v16 }
 0x7ec   :  { %v1487_v62 = vmul.f32 1.442695, %v1471_v9  ;;  %v1489_v43 = vmul.f32 1.442695, %v1472_v12  ;;  %v1491_v56 = vmul.f32 1.442695, %v1473_v28  ;;  %v1479_v52 = vsub.f32 %v4975_v27, %v5014_v16 }
 0x7ed   :  { %v1493_v11 = vmul.f32 1.442695, %v1474_v37  ;;  %v1495_v17 = vmul.f32 1.442695, %v1475_v30  ;;  %v1497_v13 = vmul.f32 1.442695, %v1476_v31  ;;  %v1480_v22 = vsub.f32 %v4959_v23, %v5014_v16 }
 0x7ee   :  { %3615 = vpow2.f32 %v1487_v62  ;;  %v1499_v61 = vmul.f32 1.442695, %v1477_v24  ;;  %v1501_v19 = vmul.f32 1.442695, %v1478_v34  ;;  %v1503_v46 = vmul.f32 1.442695, %v1479_v52 }
 0x7ef   :  { %3617 = vpow2.f32 %v1489_v43  ;;  %v1481_v60 = vsub.f32 %v4965_v32, %v5014_v16  ;;  %v1505_v1 = vmul.f32 1.442695, %v1480_v22  ;;  %v1482_v6 = vsub.f32 %v4968_v4, %v5014_v16  ;;  %v5105_v34 = vld [vmem:[%s5671_s2] sm:$0x3] }
 0x7f0   :  { %3619 = vpow2.f32 %v1491_v56  ;;  %v1483_v32 = vsub.f32 %v4988_v59, %v5014_v16  ;;  %v1484_v4 = vsub.f32 %v4991_v10, %v5014_v16  ;;  %v1486_v41 = vsub.f32 %v5010_v7, %v5014_v16  ;;  %5772 = vst [vmem:[#allocation6_spill] sm:$0xff] %v5105_v34 }
 0x7f1   :  { %3621 = vpow2.f32 %v1493_v11  ;;  %v1507_v54 = vmul.f32 1.442695, %v1481_v60  ;;  %v1509_v5 = vmul.f32 1.442695, %v1482_v6  ;;  %v1485_v10 = vsub.f32 %v5003_v55, %v5014_v16  ;;  %v5120_v60 = vld [vmem:[%s5672_s3 + $0x8] sm:$0xff]  ;;  %v5135_v6 = vld [vmem:[%s5672_s3 + $0x18] sm:$0xff] }
 0x7f2   :  { %3623 = vpow2.f32 %v1495_v17  ;;  %v1511_v59 = vmul.f32 1.442695, %v1483_v32  ;;  %v1513_v26 = vmul.f32 1.442695, %v1484_v4  ;;  %v1517_v12 = vmul.f32 1.442695, %v1486_v41 }
 0x7f3   :  { %3625 = vpow2.f32 %v1497_v13  ;;  %v1515_v7 = vmul.f32 1.442695, %v1485_v10  ;;  %5774 = vst [vmem:[#allocation11_spill] sm:$0xff] %v5120_v60  ;;  %5776 = vst [vmem:[#allocation10_spill] sm:$0xff] %v5135_v6  ;;  %v5156_v32 = vld [vmem:[%s5672_s3 + $0x30] sm:$0xff]  ;;  %v5170_v4 = vld [vmem:[%s5672_s3 + $0x40] sm:$0xff] }
 0x7f4   :  { %3627 = vpow2.f32 %v1499_v61  ;;  %v5111_v61 = vld [vmem:[%s5672_s3] sm:$0xff]  ;;  %5779 = vst [vmem:[#allocation28_spill] sm:$0xff] %v5156_v32  ;;  %5781 = vst [vmem:[#allocation30_spill] sm:$0xff] %v5170_v4  ;;  %v5184_v41 = vld [vmem:[%s5672_s3 + $0x50] sm:$0xff] }
 0x7f5   :  { %3629 = vpow2.f32 %v1501_v19  ;;  %5773 = vst [vmem:[#allocation4_spill] sm:$0xff] %v5111_v61  ;;  %5783 = vst [vmem:[#allocation32_spill] sm:$0xff] %v5184_v41  ;;  %v5205_v10 = vld [vmem:[%s5672_s3 + $0x68] sm:$0xff] }
 0x7f6   :  { %3631 = vpow2.f32 %v1503_v46  ;;  %5786 = vst [vmem:[#allocation35_spill] sm:$0xff] %v5205_v10 }
 0x7f7   :  { %3633 = vpow2.f32 %v1505_v1  ;;  %v5128_v1 = vld [vmem:[%s5672_s3 + $0x10] sm:$0xff] }
 0x7f8   :  { %v5035_v15 = vpop.eup %3615  ;;  %3635 = vpow2.f32 %v1507_v54  ;;  %5775 = vst [vmem:[#allocation9_spill] sm:$0xff] %v5128_v1  ;;  %v5149_v54 = vld [vmem:[%s5672_s3 + $0x28] sm:$0xff] }
 0x7f9   :  { %v5039_v63 = vpop.eup %3617  ;;  %3637 = vpow2.f32 %v1509_v5  ;;  %5778 = vst [vmem:[#allocation27_spill] sm:$0xff] %v5149_v54  ;;  %v5163_v5 = vld [vmem:[%s5672_s3 + $0x38] sm:$0xff] }
 0x7fa   :  { %v5043_v27 = vpop.eup %3619  ;;  %v3516_v38 = vpack.c.bf16 %v5039_v63, %v5035_v15  ;;  %3639 = vpow2.f32 %v1511_v59  ;;  %5780 = vst [vmem:[#allocation29_spill] sm:$0xff] %v5163_v5  ;;  %v5191_v59 = vld [vmem:[%s5672_s3 + $0x58] sm:$0xff] }
 0x7fb   :  { %v5047_v23 = vpop.eup %3621  ;;  %3641 = vpow2.f32 %v1513_v26  ;;  %5784 = vst [vmem:[#allocation33_spill] sm:$0xff] %v5191_v59  ;;  %v5198_v26 = vld [vmem:[%s5672_s3 + $0x60] sm:$0xff] }
 0x7fc   :  { %3517 = vmatpush3.bf16.msra.mxu1 %v3516_v38  ;;  %v5054_v48 = vpop.eup %3623  ;;  %v3519_v25 = vpack.c.bf16 %v5047_v23, %v5043_v27  ;;  %3643 = vpow2.f32 %v1517_v12  ;;  %v5142_v38 = vld [vmem:[%s5672_s3 + $0x20] sm:$0xff]  ;;  %5785 = vst [vmem:[#allocation34_spill] sm:$0xff] %v5198_v26  ;;  %v5219_v12 = vld [vmem:[%s5672_s3 + $0x78] sm:$0xff] }
 0x7fd   :  { %3518 = vmatprep.subr.bf16.mxu1 %v5756_v44  ;;  %v5058_v40 = vpop.eup %3625  ;;  %3645 = vpow2.f32 %v1515_v7  ;;  %5777 = vst [vmem:[#allocation8_spill] sm:$0xff] %v5142_v38  ;;  %5788 = vst [vmem:[#allocation37_spill] sm:$0xff] %v5219_v12 }
 0x7fe   :  { %v5065_v3 = vpop.eup %3627  ;;  %v3522_v51 = vpack.c.bf16 %v5058_v40, %v5054_v48 }
 0x7ff   :  { %v5069_v9 = vpop.eup %3629 }
 0x800   :  { %3520 = vmatpush3.bf16.msra.mxu1 %v3519_v25  ;;  %v5072_v28 = vpop.eup %3631  ;;  %v3525_v37 = vpack.c.bf16 %v5069_v9, %v5065_v3  ;;  %v5177_v25 = vld [vmem:[%s5672_s3 + $0x48] sm:$0xff] }
 0x801   :  { %3521 = vmatprep.subr.bf16.mxu1 %v5756_v44  ;;  %v5076_v55 = vpop.eup %3633  ;;  %5782 = vst [vmem:[#allocation31_spill] sm:$0xff] %v5177_v25 }
 0x802   :  { %v5079_v16 = vpop.eup %3635  ;;  %v3528_v62 = vpack.c.bf16 %v5076_v55, %v5072_v28 }
 0x803   :  { %v5083_v43 = vpop.eup %3637 }
 0x804   :  { %3523 = vmatpush3.bf16.msra.mxu1 %v3522_v51  ;;  %v5086_v56 = vpop.eup %3639  ;;  %v3531_v30 = vpack.c.bf16 %v5083_v43, %v5079_v16  ;;  %v5212_v51 = vld [vmem:[%s5672_s3 + $0x70] sm:$0xff] }
 0x805   :  { %3524 = vmatprep.subr.bf16.mxu1 %v5756_v44  ;;  %v5090_v11 = vpop.eup %3641  ;;  %5787 = vst [vmem:[#allocation36_spill] sm:$0xff] %v5212_v51 }
 0x806   :  { %v5093_v31 = vpop.eup %3643  ;;  %v3534_v17 = vpack.c.bf16 %v5090_v11, %v5086_v56 }
 0x807   :  { %v5097_v24 = vpop.eup %3645 }
 0x808   :  { %3526 = vmatpush3.bf16.msra.mxu1 %v3525_v37  ;;  %v3537_v13 = vpack.c.bf16 %v5093_v31, %v5097_v24 }
 0x809   :  { %3527 = vmatprep.subr.bf16.mxu1 %v5756_v44 }
 0x80c   :  { %3529 = vmatpush3.bf16.msra.mxu1 %v3528_v62 }
 0x80d   :  { %3530 = vmatprep.subr.bf16.mxu1 %v5756_v44 }
 0x810   :  { %3532 = vmatpush3.bf16.msra.mxu1 %v3531_v30 }
 0x811   :  { %3533 = vmatprep.subr.bf16.mxu1 %v5756_v44 }
 0x814   :  { %3535 = vmatpush3.bf16.msra.mxu1 %v3534_v17 }
 0x815   :  { %3536 = vmatprep.subr.bf16.mxu1 %v5756_v44 }
 0x818   :  { %3538 = vmatpush3.bf16.msra.mxu1 %v3537_v13 }
 0x81a   :  { %v5225_v7 = vpop.f32.mrb[40].mxu0 }
 0x81b   :  { %3314 = vmatmul.mubr.f32.vlgmr.msra.gmra.mrb[34].mxu1 %v5105_v34  ;;  %v5227_v37 = vpop.f32.mrb[41].mxu0 }
 0x81c   :  { %3318 = vmatprep.mubr.msk.f32.mxu1 %vm707_vm3, %v5111_v61  ;;  %v5229_v62 = vpop.f32.mrb[42].mxu0 }
 0x81d   :  { %v2025_v30 = vpop.f32.mrb[43].mxu0 }
 0x822   :  { %v5231_v17 = vpop.f32.mrb[44].mxu0 }
 0x823   :  { %v5233_v13 = vpop.f32.mrb[45].mxu0 }
 0x8ee   :  { %v1585_v52 = vpop.f32.mrb[34].mxu1 }
 0x8ef   :  { %v1589_v19 = vmax.f32 %v1585_v52, 1e-30  ;;  %v3315_v22 = vpop.f32.mrb[35].mxu1  ;;  %v5235_v52 = vpop.f32.mrb[46].mxu0 }
 0x8f1   :  { %3647 = vrcp.f32 %v1589_v19  ;;  %v5237_v19 = vpop.f32.mrb[47].mxu0 }
 0x8f2   :  { %v5239_v22 = vpop.f32.mrb[48].mxu0 }
 0x8fb   :  { %v3648_v46 = vpop.eup %3647 }
 0x8fc   :  { %3316 = vmatprep.subr.msk.mxu1 %vm756_vm4, %v3648_v46 }
 0x8fd   :  { %3317 = vmatpush3.msk.msra.mxu1 %vm756_vm4, %v3648_v46  ;;  %v5241_v46 = vpop.f32.mrb[49].mxu0 }
 0x8fe   :  { %3319 = vmatmul.mubr.msk.f32.vlgmr.msra.gmra.mrb[36].mxu1 %vm707_vm3, %v5120_v60  ;;  %3342 = vmatprep.subr.bf16.mxu1 %v5757_v50 }
 0x8ff   :  { %3321 = vmatprep.mubr.msk.f32.mxu1 %vm707_vm3, %v5128_v1 }
 0x902   :  { %3322 = vmatmul.mubr.msk.f32.gmra.mrb[38].mxu1 %vm707_vm3, %v5135_v6 }
 0x903   :  { %3324 = vmatprep.mubr.msk.f32.mxu1 %vm707_vm3, %v5142_v38 }
 0x906   :  { %3325 = vmatmul.mubr.msk.f32.gmra.mrb[40].mxu1 %vm707_vm3, %v5149_v54 }
 0x907   :  { %3327 = vmatprep.mubr.msk.f32.mxu1 %vm707_vm3, %v5156_v32 }
 0x90a   :  { %3328 = vmatmul.mubr.msk.f32.gmra.mrb[42].mxu1 %vm707_vm3, %v5163_v5 }
 0x90b   :  { %3330 = vmatprep.mubr.msk.f32.mxu1 %vm707_vm3, %v5170_v4 }
 0x90e   :  { %3331 = vmatmul.mubr.msk.f32.gmra.mrb[44].mxu1 %vm707_vm3, %v5177_v25 }
 0x90f   :  { %3333 = vmatprep.mubr.msk.f32.mxu1 %vm707_vm3, %v5184_v41 }
 0x912   :  { %3334 = vmatmul.mubr.msk.f32.gmra.mrb[46].mxu1 %vm707_vm3, %v5191_v59 }
 0x913   :  { %3336 = vmatprep.mubr.msk.f32.mxu1 %vm707_vm3, %v5198_v26 }
 0x916   :  { %3337 = vmatmul.mubr.msk.f32.gmra.mrb[48].mxu1 %vm707_vm3, %v5205_v10 }
 0x917   :  { %3339 = vmatprep.mubr.msk.f32.mxu1 %vm707_vm3, %v5212_v51 }
 0x91a   :  { %3340 = vmatmul.mubr.msk.f32.gmra.mrb[50].mxu1 %vm707_vm3, %v5219_v12  ;;  %v5243_v12 = vpop.f32.mrb[50].mxu0 }
 0x91b   :  { %3358 = vmatprep.mubr.msk.bf16.mxu1 %vm3735_vm1, %v5757_v50  ;;  %v5245_v51 = vpop.f32.mrb[51].mxu0 }
 0x91c   :  { %v5247_v10 = vpop.f32.mrb[52].mxu0 }
 0x91d   :  { %v5249_v26 = vpop.f32.mrb[53].mxu0 }
 0x91e   :  { %v5251_v59 = vpop.f32.mrb[54].mxu0 }
 0x91f   :  { %v5253_v41 = vpop.f32.mrb[55].mxu0 }
 0x9d1   :  { %v3320_v25 = vpop.f32.mrb[36].mxu1 }
 0x9d2   :  { %v1741_v4 = vmul.f32 %v5039_v63, %v3320_v25  ;;  %v1661_v5 = vpop.f32.mrb[37].mxu1 }
 0x9d3   :  { %v1740_v32 = vmul.f32 %v5035_v15, %v1661_v5 }
 0x9d4   :  { %1763 = vperm.xlu1 %3568, %v1741_v4   ;;  %v2089_v4 = vmul.f32 %v4709_v14, %v5233_v13 }
 0x9d5   :  { %1758 = vperm.xlu0 %3567, %v1740_v32   ;;  %v3323_v54 = vpop.f32.mrb[38].mxu1 }
 0x9d6   :  { %v1743_v38 = vmul.f32 %v5047_v23, %v3323_v54  ;;  %v1671_v6 = vpop.f32.mrb[39].mxu1 }
 0x9d7   :  { %v1742_v1 = vmul.f32 %v5043_v27, %v1671_v6 }
 0x9d9   :  { %1773 = vperm.xlu0 %3567, %v1743_v38   ;;  %1768 = vperm.xlu1 %3568, %v1742_v1   ;;  %v3326_v60 = vpop.f32.mrb[40].mxu1 }
 0x9da   :  { %v1745_v61 = vmul.f32 %v5058_v40, %v3326_v60  ;;  %v1681_v34 = vpop.f32.mrb[41].mxu1 }
 0x9db   :  { %v1744_v0 = vmul.f32 %v5054_v48, %v1681_v34 }
 0x9dd   :  { %1783 = vperm.xlu0 %3567, %v1745_v61   ;;  %1778 = vperm.xlu1 %3568, %v1744_v0   ;;  %v3329_v63 = vpop.f32.mrb[42].mxu1 }
 0x9de   :  { %v1747_v15 = vmul.f32 %v5069_v9, %v3329_v63  ;;  %v1691_v32 = vpop.f32.mrb[43].mxu1 }
 0x9df   :  { %v1746_v5 = vmul.f32 %v5065_v3, %v1691_v32 }
 0x9e1   :  { %1793 = vperm.xlu0 %3567, %v1747_v15   ;;  %1788 = vperm.xlu1 %3568, %v1746_v5   ;;  %v3332_v23 = vpop.f32.mrb[44].mxu1 }
 0x9e2   :  { %v1749_v27 = vmul.f32 %v5076_v55, %v3332_v23  ;;  %v1701_v1 = vpop.f32.mrb[45].mxu1 }
 0x9e3   :  { %v1748_v6 = vmul.f32 %v5072_v28, %v1701_v1 }
 0x9e5   :  { %1803 = vperm.xlu0 %3567, %v1749_v27   ;;  %1798 = vperm.xlu1 %3568, %v1748_v6   ;;  %v3335_v40 = vpop.f32.mrb[46].mxu1 }
 0x9e6   :  { %v1751_v48 = vmul.f32 %v5083_v43, %v3335_v40  ;;  %v1711_v0 = vpop.f32.mrb[47].mxu1  ;;  %v2087_v43 = vmul.f32 %v4709_v14, %v5225_v7  ;;  %v2091_v7 = vmul.f32 %v4709_v14, %v5231_v17  ;;  %v5296_v17 = vld [vmem:[%s5667_s5] ss:$0 sm:$0xff] }
 0x9e7   :  { %v1750_v34 = vmul.f32 %v5079_v16, %v1711_v0  ;;  %v2086_v16 = vmul.f32 %v4709_v14, %v2025_v30  ;;  %v2113_v30 = vsel %vm390_vm0, %v2089_v4, 0.0  ;;  %v2149_v32 = vmul.f32 %v5296_v17, %v4721_v47 }
 0x9e8   :  { %v2119_v13 = vsel %vm390_vm0, %v2091_v7, 0.0  ;;  %v2151_v23 = vmul.f32 %v5296_v17, %v4715_v39  ;;  %v2153_v1 = vmul.f32 %v5296_v17, %v4772_v2  ;;  %v2152_v40 = vmul.f32 %v5296_v17, %v4731_v45 }
 0x9e9   :  { %1813 = vperm.xlu0 %3567, %v1751_v48   ;;  %1808 = vperm.xlu1 %3568, %v1750_v34   ;;  %v3338_v9 = vpop.f32.mrb[48].mxu1  ;;  %v2165_v5 = vsel %vm390_vm0, %v2149_v32, 0.0  ;;  %v2155_v0 = vmul.f32 %v5296_v17, %v4767_v20  ;;  %v2159_v4 = vmul.f32 %v5296_v17, %v4818_v35  ;;  %v2160_v7 = vmul.f32 %v5296_v17, %v4836_v36 }
 0x9ea   :  { %v1753_v3 = vmul.f32 %v5090_v11, %v3338_v9  ;;  %v1721_v61 = vpop.f32.mrb[49].mxu1  ;;  %v2104_v11 = vsel %vm390_vm0, %v2086_v16, 0.0  ;;  %v2171_v27 = vsel %vm390_vm0, %v2151_v23, 0.0  ;;  %v2177_v48 = vsel %vm390_vm0, %v2153_v1, 0.0 }
 0x9eb   :  { %v1752_v60 = vmul.f32 %v5086_v56, %v1721_v61  ;;  %v2085_v56 = vmul.f32 %v4709_v14, %v5227_v37  ;;  %v2090_v37 = vmul.f32 %v4709_v14, %v5237_v19  ;;  %v2174_v34 = vsel %vm390_vm0, %v2152_v40, 0.0  ;;  %v5789_v40 = vld [vmem:[#allocation13_spill] sm:$0xff] }
 0x9ec   :  { %v2154_v9 = vmul.f32 %v5296_v17, %v4795_v29  ;;  %v2183_v61 = vsel %vm390_vm0, %v2155_v0, 0.0  ;;  %v2164_v23 = vmul.f32 %v5296_v17, %v4888_v18 }
 0x9ed   :  { %1823 = vperm.xlu0 %3567, %v1753_v3   ;;  %1818 = vperm.xlu1 %3568, %v1752_v60   ;;  %v3341_v55 = vpop.f32.mrb[50].mxu1  ;;  %v2101_v25 = vsel %vm390_vm0, %v2085_v56, 0.0  ;;  %v2116_v15 = vsel %vm390_vm0, %v2090_v37, 0.0  ;;  %v2093_v3 = vmul.f32 %v4709_v14, %v5241_v46 }
 0x9ee   :  { %v1755_v28 = vmul.f32 %v5093_v31, %v3341_v55  ;;  %v1731_v38 = vpop.f32.mrb[51].mxu1  ;;  %v2107_v31 = vsel %vm390_vm0, %v2087_v43, 0.0  ;;  %v2180_v60 = vsel %vm390_vm0, %v2154_v9, 0.0  ;;  %v2156_v55 = vmul.f32 %v5296_v17, %v4784_v33 }
 0x9ef   :  { %v1754_v54 = vmul.f32 %v5097_v24, %v1731_v38  ;;  %v2088_v24 = vmul.f32 %v4709_v14, %v5229_v62  ;;  %v2092_v62 = vmul.f32 %v4709_v14, %v5235_v52  ;;  %v2150_v52 = vmul.f32 %v5296_v17, %v4744_v57 }
 0x9f0   :  { %v2125_v38 = vsel %vm390_vm0, %v2093_v3, 0.0  ;;  %v2186_v46 = vsel %vm390_vm0, %v2156_v55, 0.0  ;;  %v2096_v43 = vmul.f32 %v4709_v14, %v5243_v12  ;;  %v2097_v12 = vmul.f32 %v4709_v14, %v5249_v26  ;;  %v5790_v3 = vld [vmem:[#allocation14_spill] sm:$0xff] }
 0x9f1   :  { %1833 = vperm.xlu0 %3567, %v1755_v28   ;;  %1828 = vperm.xlu1 %3568, %v1754_v54   ;;  %v2110_v63 = vsel %vm390_vm0, %v2088_v24, 0.0  ;;  %v2122_v19 = vsel %vm390_vm0, %v2092_v62, 0.0  ;;  %v2168_v6 = vsel %vm390_vm0, %v2150_v52, 0.0  ;;  %v2095_v28 = vmul.f32 %v4709_v14, %v5239_v22 }
 0x9f2   :  { %v2094_v54 = vmul.f32 %v4709_v14, %v5245_v51  ;;  %v2157_v22 = vmul.f32 %v5296_v17, %v4824_v8  ;;  %v2134_v56 = vsel %vm390_vm0, %v2096_v43, 0.0  ;;  %v2195_v24 = vsel %vm390_vm0, %v2159_v4, 0.0  ;;  %v5795_v4 = vld [vmem:[#allocation15_spill] sm:$0xff] }
 0x9f3   :  { %v2131_v16 = vsel %vm390_vm0, %v2095_v28, 0.0  ;;  %v2137_v37 = vsel %vm390_vm0, %v2097_v12, 0.0  ;;  %v2198_v26 = vsel %vm390_vm0, %v2160_v7, 0.0  ;;  %v2100_v62 = vmul.f32 %v4709_v14, %v5251_v59  ;;  %v5796_v7 = vld [vmem:[#allocation22_spill] sm:$0xff] }
 0x9f4   :  { %v2189_v51 = vsel %vm390_vm0, %v2157_v22, 0.0  ;;  %v2210_v52 = vsel %vm390_vm0, %v2164_v23, 0.0 }
 0x9f5   :  { %v2146_v32 = vsel %vm390_vm0, %v2100_v62, 0.0 }
 0xa10   :  { %2105 = vadd.xlane.f32.xlu0 %v2104_v11  ;;  %v2128_v11 = vsel %vm390_vm0, %v2094_v54, 0.0  ;;  %v5792_v54 = vld [vmem:[#allocation18_spill] sm:$0xff] }
 0xa14   :  { %2108 = vadd.xlane.f32.xlu0 %v2107_v31  ;;  %v2158_v31 = vmul.f32 %v5296_v17, %v4847_v53 }
 0xa15   :  { %2102 = vadd.xlane.f32.xlu1 %v2101_v25 }
 0xa16   :  { %v2192_v25 = vsel %vm390_vm0, %v2158_v31, 0.0 }
 0xa18   :  { %2114 = vadd.xlane.f32.xlu0 %v2113_v30  ;;  %v2099_v30 = vmul.f32 %v4709_v14, %v5247_v10  ;;  %v2161_v10 = vmul.f32 %v5296_v17, %v4876_v49 }
 0xa19   :  { %2111 = vadd.xlane.f32.xlu1 %v2110_v63  ;;  %v2098_v63 = vmul.f32 %v4709_v14, %v5253_v41 }
 0xa1a   :  { %v2201_v41 = vsel %vm390_vm0, %v2161_v10, 0.0 }
 0xa1c   :  { %2120 = vadd.xlane.f32.xlu0 %v2119_v13  ;;  %v2143_v13 = vsel %vm390_vm0, %v2099_v30, 0.0 }
 0xa1d   :  { %2117 = vadd.xlane.f32.xlu1 %v2116_v15  ;;  %v2140_v15 = vsel %vm390_vm0, %v2098_v63, 0.0 }
 0xa20   :  { %2166 = vadd.xlane.f32.xlu0 %v2165_v5  ;;  %v2162_v5 = vmul.f32 %v5296_v17, %v4899_v21 }
 0xa21   :  { %2123 = vadd.xlane.f32.xlu1 %v2122_v19  ;;  %v2163_v19 = vmul.f32 %v5296_v17, %v4870_v58 }
 0xa22   :  { %v2204_v59 = vsel %vm390_vm0, %v2162_v5, 0.0 }
 0xa23   :  { %v2207_v14 = vsel %vm390_vm0, %v2163_v19, 0.0 }
 0xa24   :  { %2172 = vadd.xlane.f32.xlu0 %v2171_v27 }
 0xa25   :  { %2169 = vadd.xlane.f32.xlu1 %v2168_v6 }
 0xa28   :  { %2178 = vadd.xlane.f32.xlu0 %v2177_v48 }
 0xa29   :  { %2175 = vadd.xlane.f32.xlu1 %v2174_v34 }
 0xa2c   :  { %2184 = vadd.xlane.f32.xlu0 %v2183_v61 }
 0xa2d   :  { %2181 = vadd.xlane.f32.xlu1 %v2180_v60  ;;  %v5791_v60 = vld [vmem:[#allocation12_spill] sm:$0xff] }
 0xa30   :  { %2126 = vadd.xlane.f32.xlu0 %v2125_v38 }
 0xa31   :  { %2187 = vadd.xlane.f32.xlu1 %v2186_v46 }
 0xa34   :  { %2132 = vadd.xlane.f32.xlu0 %v2131_v16  ;;  %v5793_v16 = vld [vmem:[#allocation16_spill] sm:$0xff] }
 0xa35   :  { %2129 = vadd.xlane.f32.xlu1 %v2128_v11 }
 0xa38   :  { %2190 = vadd.xlane.f32.xlu0 %v2189_v51 }
 0xa39   :  { %2135 = vadd.xlane.f32.xlu1 %v2134_v56  ;;  %v5794_v56 = vld [vmem:[#allocation17_spill] sm:$0xff] }
 0xa3c   :  { %2196 = vadd.xlane.f32.xlu0 %v2195_v24 }
 0xa3d   :  { %2193 = vadd.xlane.f32.xlu1 %v2192_v25 }
 0xa40   :  { %2138 = vadd.xlane.f32.xlu0 %v2137_v37  ;;  %v5797_v37 = vld [vmem:[#allocation20_spill] sm:$0xff] }
 0xa41   :  { %2199 = vadd.xlane.f32.xlu1 %v2198_v26 }
 0xa44   :  { %2144 = vadd.xlane.f32.xlu0 %v2143_v13 }
 0xa45   :  { %2141 = vadd.xlane.f32.xlu1 %v2140_v15  ;;  %v5798_v15 = vld [vmem:[#allocation21_spill] sm:$0xff] }
 0xa48   :  { %2202 = vadd.xlane.f32.xlu0 %v2201_v41 }
 0xa49   :  { %2147 = vadd.xlane.f32.xlu1 %v2146_v32  ;;  %v5799_v32 = vld [vmem:[#allocation19_spill] sm:$0xff] }
 0xa4c   :  { %2208 = vadd.xlane.f32.xlu0 %v2207_v14 }
 0xa4d   :  { %2205 = vadd.xlane.f32.xlu1 %v2204_v59  ;;  %v5800_v59 = vld [vmem:[#allocation26_spill] sm:$0xff] }
 0xa51   :  { %2211 = vadd.xlane.f32.xlu1 %v2210_v52  ;;  %v5801_v52 = vld [vmem:[#allocation24_spill] sm:$0xff] }
 0xa53   :  { %v1764_v27 = vpop.permute.xlu1 %1763 }
 0xa54   :  { %v1837_v1 = vmul.f32 %v1764_v27, %v4165_v42  ;;  %v1759_v6 = vpop.permute.xlu0 %1758 }
 0xa55   :  { %v1836_v48 = vmul.f32 %v1759_v6, %v5789_v40 }
 0xa57   :  { %v1852_v0 = vpack.c.bf16 %v1837_v1, %v1836_v48  ;;  %v5802_v48 = vld [vmem:[#allocation25_spill] sm:$0xff] }
 0xa58   :  { %v1774_v34 = vpop.permute.xlu0 %1773  ;;  %v1769_v9 = vpop.permute.xlu1 %1768 }
 0xa59   :  { %v1839_v61 = vmul.f32 %v1774_v34, %v5790_v3  ;;  %v1838_v55 = vmul.f32 %v1769_v9, %v5791_v60  ;;  %3343 = vmatpush3.bf16.msra.mxu1 %v1852_v0  ;;  %v5803_v34 = vld [vmem:[#allocation23_spill] sm:$0xff] }
 0xa5a   :  { %3344 = vmatprep.subr.bf16.mxu1 %v5757_v50  ;;  %v5399_v60 = vld [vmem:[%s5673_s7] sm:$0xff]  }
 0xa5b   :  { %v1853_v17 = vpack.c.bf16 %v1839_v61, %v1838_v55  ;;  %v5804_v61 = vld [vmem:[#allocation3_spill] sm:$0xff]  ;;  %5805 = vst [vmem:[#allocation13_spill] sm:$0xff] %v5399_v60 }
 0xa5c   :  { %v1784_v28 = vpop.permute.xlu0 %1783  ;;  %v1779_v38 = vpop.permute.xlu1 %1778  ;;  %v5408_v55 = vld [vmem:[%s5673_s7 + $0x8] sm:$0xff]  }
 0xa5d   :  { %v1841_v46 = vmul.f32 %v1784_v28, %v5792_v54  ;;  %v1840_v42 = vmul.f32 %v1779_v38, %v5793_v16  ;;  %3345 = vmatpush3.bf16.msra.mxu1 %v1853_v17  ;;  %5806 = vst [vmem:[#allocation14_spill] sm:$0xff] %v5408_v55 }
 0xa5e   :  { %3346 = vmatprep.subr.bf16.mxu1 %v5757_v50 }
 0xa5f   :  { %v1854_v43 = vpack.c.bf16 %v1841_v46, %v1840_v42 }
 0xa60   :  { %v1794_v11 = vpop.permute.xlu0 %1793  ;;  %v1789_v22 = vpop.permute.xlu1 %1788 }
 0xa61   :  { %v1843_v51 = vmul.f32 %v1794_v11, %v5794_v56  ;;  %v1842_v31 = vmul.f32 %v1789_v22, %v5795_v4  ;;  %3347 = vmatpush3.bf16.msra.mxu1 %v1854_v43 }
 0xa62   :  { %3348 = vmatprep.subr.bf16.mxu1 %v5757_v50 }
 0xa63   :  { %v1855_v12 = vpack.c.bf16 %v1843_v51, %v1842_v31 }
 0xa64   :  { %v1804_v24 = vpop.permute.xlu0 %1803  ;;  %v1799_v25 = vpop.permute.xlu1 %1798 }
 0xa65   :  { %v1845_v30 = vmul.f32 %v1804_v24, %v5796_v7  ;;  %v1844_v63 = vmul.f32 %v1799_v25, %v5797_v37  ;;  %3349 = vmatpush3.bf16.msra.mxu1 %v1855_v12 }
 0xa66   :  { %3350 = vmatprep.subr.bf16.mxu1 %v5757_v50 }
 0xa67   :  { %v1856_v26 = vpack.c.bf16 %v1845_v30, %v1844_v63 }
 0xa68   :  { %v1814_v13 = vpop.permute.xlu0 %1813  ;;  %v1809_v62 = vpop.permute.xlu1 %1808 }
 0xa69   :  { %v1847_v10 = vmul.f32 %v1814_v13, %v5798_v15  ;;  %v1846_v41 = vmul.f32 %v1809_v62, %v5799_v32  ;;  %3351 = vmatpush3.bf16.msra.mxu1 %v1856_v26 }
 0xa6a   :  { %3352 = vmatprep.subr.bf16.mxu1 %v5757_v50 }
 0xa6b   :  { %v1857_v19 = vpack.c.bf16 %v1847_v10, %v1846_v41 }
 0xa6c   :  { %v1824_v5 = vpop.permute.xlu0 %1823  ;;  %v1819_v14 = vpop.permute.xlu1 %1818 }
 0xa6d   :  { %v1849_v23 = vmul.f32 %v1824_v5, %v5800_v59  ;;  %v1848_v27 = vmul.f32 %v1819_v14, %v5801_v52  ;;  %3353 = vmatpush3.bf16.msra.mxu1 %v1857_v19 }
 0xa6e   :  { %3354 = vmatprep.subr.bf16.mxu1 %v5757_v50 }
 0xa6f   :  { %v1858_v1 = vpack.c.bf16 %v1849_v23, %v1848_v27 }
 0xa70   :  { %v1834_v6 = vpop.permute.xlu0 %1833  ;;  %v1829_v40 = vpop.permute.xlu1 %1828 }
 0xa71   :  { %v1851_v0 = vmul.f32 %v1834_v6, %v5802_v48  ;;  %v1850_v9 = vmul.f32 %v1829_v40, %v5803_v34  ;;  %3355 = vmatpush3.bf16.msra.mxu1 %v1858_v1 }
 0xa72   :  { %3356 = vmatprep.subr.bf16.mxu1 %v5757_v50 }
 0xa73   :  { %v1859_v3 = vpack.c.bf16 %v1851_v0, %v1850_v9  ;;  %v5807_v0 = vld [vmem:[#allocation5_spill] sm:$0xff] }
 0xa75   :  { %3357 = vmatpush3.bf16.msra.mxu1 %v1859_v3 }
 0xa76   :  { %3362 = vmatprep.subr.bf16.mxu1 %v5757_v50 }
 0xa78   :  { %3359 = vmatmul.mubr.bf16.vlgmr.msra.gmra.mrb[52].mxu1 %v5804_v61 }
 0xa79   :  { %3363 = vmatpush3.bf16.msra.mxu1 %v5399_v60  ;;  %3366 = vmatprep.mubr.msk.bf16.mxu1 %vm3735_vm1, %v5757_v50 }
 0xa7a   :  { %3364 = vmatprep.subr.bf16.mxu1 %v5757_v50 }
 0xa7d   :  { %3365 = vmatpush3.bf16.msra.mxu1 %v5408_v55 }
 0xa7e   :  { %3539 = vmatprep.subr.bf16.mxu1 %v5756_v44 }
 0xa9d   :  { %v2106_v28 = vpop.xlane.xlu0 %2105 }
 0xaa1   :  { %v2109_v54 = vpop.xlane.xlu0 %2108 }
 0xaa2   :  { %v2103_v17 = vpop.xlane.xlu1 %2102 }
 0xaa5   :  { %v2115_v16 = vpop.xlane.xlu0 %2114 }
 0xaa6   :  { %v2112_v38 = vpop.xlane.xlu1 %2111 }
 0xaa9   :  { %v2121_v43 = vpop.xlane.xlu0 %2120 }
 0xaaa   :  { %v2118_v46 = vpop.xlane.xlu1 %2117 }
 0xaad   :  { %v2167_v22 = vpop.xlane.xlu0 %2166 }
 0xaae   :  { %v2124_v42 = vpop.xlane.xlu1 %2123  ;;  %v2213_v61 = vadd.f32 %v2167_v22, %v2103_v17 }
 0xab1   :  { %v2173_v51 = vpop.xlane.xlu0 %2172 }
 0xab2   :  { %v2170_v11 = vpop.xlane.xlu1 %2169  ;;  %v2215_v6 = vadd.f32 %v2173_v51, %v2109_v54 }
 0xab3   :  { %v2214_v40 = vadd.f32 %v2170_v11, %v2106_v28 }
 0xab5   :  { %v2179_v31 = vpop.xlane.xlu0 %2178  ;;  %v2237_v11 = vadd.f32 %v5807_v0, %v2214_v40 }
 0xab6   :  { %v2176_v56 = vpop.xlane.xlu1 %2175  ;;  %v2217_v48 = vadd.f32 %v2179_v31, %v2115_v16 }
 0xab7   :  { %v2216_v59 = vadd.f32 %v2176_v56, %v2112_v38 }
 0xab8   :  { %v2240_v17 = vadd.f32 %v5807_v0, %v2217_v48 }
 0xab9   :  { %v2185_v24 = vpop.xlane.xlu0 %2184  ;;  %v5416_v58 = vadd.f32 %v5807_v0, %v2216_v59 }
 0xaba   :  { %v2182_v4 = vpop.xlane.xlu1 %2181  ;;  %v2219_v23 = vadd.f32 %v2185_v24, %v2121_v43  ;;  %v2238_v43 = vadd.f32 %v5807_v0, %v2215_v6 }
 0xabb   :  { %v2218_v52 = vadd.f32 %v2182_v4, %v2118_v46  ;;  %v2255_v24 = vsel %vm548_vm2, %v5416_v58, -inf }
 0xabc   :  { %v5419_v38 = vadd.f32 %v5807_v0, %v2219_v23 }
 0xabd   :  { %v2127_v7 = vpop.xlane.xlu0 %2126  ;;  %v5422_v46 = vadd.f32 %v5807_v0, %v2218_v52 }
 0xabe   :  { %v2188_v12 = vpop.xlane.xlu1 %2187 }
 0xabf   :  { %v2220_v14 = vadd.f32 %v2188_v12, %v2124_v42  ;;  %v2236_v12 = vadd.f32 %v5807_v0, %v2213_v61 }
 0xac1   :  { %v2133_v37 = vpop.xlane.xlu0 %2132  ;;  %v5413_v34 = vadd.f32 %v5807_v0, %v2220_v14  ;;  %v2252_v14 = vsel %vm548_vm2, %v2236_v12, -inf }
 0xac2   :  { %v2130_v25 = vpop.xlane.xlu1 %2129 }
 0xac3   :  { %v2262_v22 = vsel %vm548_vm2, %v5413_v34, -inf }
 0xac5   :  { %v2191_v26 = vpop.xlane.xlu0 %2190 }
 0xac6   :  { %v2136_v30 = vpop.xlane.xlu1 %2135  ;;  %v2221_v54 = vadd.f32 %v2191_v26, %v2127_v7  ;;  %v2258_v7 = vsel %vm548_vm2, %v5422_v46, -inf  ;;  %v2256_v26 = vsel %vm548_vm2, %v2240_v17, -inf }
 0xac9   :  { %v2197_v62 = vpop.xlane.xlu0 %2196 }
 0xaca   :  { %v2194_v63 = vpop.xlane.xlu1 %2193  ;;  %v2223_v3 = vadd.f32 %v2197_v62, %v2133_v37  ;;  %v2254_v37 = vsel %vm548_vm2, %v2238_v43, -inf }
 0xacb   :  { %v2222_v55 = vadd.f32 %v2194_v63, %v2130_v25  ;;  %v2260_v25 = vsel %vm548_vm2, %v5419_v38, -inf  ;;  %v2253_v63 = vsel %vm548_vm2, %v2237_v11, -inf }
 0xacc   :  { %v5433_v56 = vadd.f32 %v5807_v0, %v2223_v3 }
 0xacd   :  { %v2139_v10 = vpop.xlane.xlu0 %2138  ;;  %v5436_v51 = vadd.f32 %v5807_v0, %v2222_v55 }
 0xace   :  { %v2200_v13 = vpop.xlane.xlu1 %2199  ;;  %v2268_v62 = vsel %vm548_vm2, %v5433_v56, -inf }
 0xacf   :  { %v2224_v1 = vadd.f32 %v2200_v13, %v2136_v30  ;;  %v5449_v30 = vadd.f32 %v5807_v0, %v2221_v54  ;;  %v2263_v13 = vmax.f32 %v2255_v24, %v2262_v22 }
 0xad1   :  { %v2145_v41 = vpop.xlane.xlu0 %2144  ;;  %v5425_v28 = vadd.f32 %v5807_v0, %v2224_v1  ;;  %v2264_v59 = vsel %vm548_vm2, %v5449_v30, -inf }
 0xad2   :  { %v2142_v15 = vpop.xlane.xlu1 %2141 }
 0xad3   :  { %v2270_v55 = vsel %vm548_vm2, %v5425_v28, -inf }
 0xad5   :  { %v2203_v5 = vpop.xlane.xlu0 %2202 }
 0xad6   :  { %v2148_v32 = vpop.xlane.xlu1 %2147  ;;  %v2225_v4 = vadd.f32 %v2203_v5, %v2139_v10  ;;  %v2271_v5 = vmax.f32 %v2263_v13, %v2270_v55 }
 0xad8   :  { %v5467_v10 = vadd.f32 %v5807_v0, %v2225_v4 }
 0xad9   :  { %v2209_v9 = vpop.xlane.xlu0 %2208 }
 0xada   :  { %v2206_v19 = vpop.xlane.xlu1 %2205  ;;  %v2227_v16 = vadd.f32 %v2209_v9, %v2145_v41  ;;  %v2261_v41 = vmax.f32 %v2254_v37, %v2260_v25  ;;  %v2272_v48 = vsel %vm548_vm2, %v5467_v10, -inf }
 0xadb   :  { %v2226_v42 = vadd.f32 %v2206_v19, %v2142_v15  ;;  %v2266_v15 = vsel %vm548_vm2, %v5436_v51, -inf  ;;  %v2259_v19 = vmax.f32 %v2253_v63, %v2258_v7 }
 0xadc   :  { %v2269_v1 = vmax.f32 %v2261_v41, %v2268_v62 }
 0xadd   :  { %v5457_v61 = vadd.f32 %v5807_v0, %v2226_v42  ;;  %v2267_v6 = vmax.f32 %v2259_v19, %v2266_v15 }
 0xade   :  { %v2212_v27 = vpop.xlane.xlu1 %2211 }
 0xadf   :  { %v2228_v60 = vadd.f32 %v2212_v27, %v2148_v32  ;;  %v2274_v52 = vsel %vm548_vm2, %v5457_v61, -inf  ;;  %v2257_v27 = vmax.f32 %v2252_v14, %v2256_v26 }
 0xae0   :  { %v2275_v3 = vmax.f32 %v2267_v6, %v2274_v52 }
 0xae1   :  { %v5439_v31 = vadd.f32 %v5807_v0, %v2228_v60  ;;  %v5454_v60 = vadd.f32 %v5807_v0, %v2227_v16  ;;  %v2265_v0 = vmax.f32 %v2257_v27, %v2264_v59 }
 0xae3   :  { %v2278_v32 = vsel %vm548_vm2, %v5439_v31, -inf  ;;  %v2276_v23 = vsel %vm548_vm2, %v5454_v60, -inf  ;;  %v2273_v54 = vmax.f32 %v2265_v0, %v2272_v48 }
 0xae4   :  { %v2279_v40 = vmax.f32 %v2271_v5, %v2278_v32  ;;  %v2277_v9 = vmax.f32 %v2269_v1, %v2276_v23 }
 0xae5   :  { %v2280_v42 = vmax.f32 %v2273_v54, %v2275_v3 }
 0xae6   :  { %v2281_v16 = vmax.f32 %v2277_v9, %v2279_v40 }
 0xae8   :  { %v2282_v22 = vmax.f32 %v2280_v42, %v2281_v16 }
 0xaea   :  { %v2283_v4 = vrot.slane %v2282_v22, 4 }
 0xaec   :  { %v2284_v24 = vmax.f32 %v2282_v22, %v2283_v4 }
 0xaee   :  { %v2285_v25 = vrot.slane %v2284_v24, 2 }
 0xaf0   :  { %v2286_v7 = vmax.f32 %v2284_v24, %v2285_v25 }
 0xaf2   :  { %v2287_v55 = vrot.slane %v2286_v7, 1 }
 0xaf4   :  { %v5480_v37 = vmax.f32 %v2286_v7, %v2287_v55 }
 0xaf6   :  { %v2289_v63 = vsub.f32 %v2236_v12, %v5480_v37  ;;  %v2290_v26 = vsub.f32 %v2237_v11, %v5480_v37  ;;  %v2291_v62 = vsub.f32 %v2238_v43, %v5480_v37  ;;  %v2292_v32 = vsub.f32 %v5416_v58, %v5480_v37 }
 0xaf7   :  { %v2293_v19 = vsub.f32 %v2240_v17, %v5480_v37  ;;  %v2294_v14 = vsub.f32 %v5422_v46, %v5480_v37  ;;  %v2295_v11 = vsub.f32 %v5419_v38, %v5480_v37  ;;  %v2296_v59 = vsub.f32 %v5413_v34, %v5480_v37 }
 0xaf8   :  { %v2305_v13 = vmul.f32 1.442695, %v2289_v63  ;;  %v2307_v15 = vmul.f32 1.442695, %v2290_v26  ;;  %v2309_v41 = vmul.f32 1.442695, %v2291_v62  ;;  %v2297_v17 = vsub.f32 %v5449_v30, %v5480_v37 }
 0xaf9   :  { %v2311_v5 = vmul.f32 1.442695, %v2292_v32  ;;  %v2313_v12 = vmul.f32 1.442695, %v2293_v19  ;;  %v2315_v43 = vmul.f32 1.442695, %v2294_v14  ;;  %v2298_v46 = vsub.f32 %v5436_v51, %v5480_v37 }
 0xafa   :  { %3649 = vpow2.f32 %v2305_v13  ;;  %v2317_v58 = vmul.f32 1.442695, %v2295_v11  ;;  %v2319_v23 = vmul.f32 1.442695, %v2296_v59  ;;  %v2321_v1 = vmul.f32 1.442695, %v2297_v17 }
 0xafb   :  { %3651 = vpow2.f32 %v2307_v15  ;;  %v2299_v34 = vsub.f32 %v5433_v56, %v5480_v37  ;;  %v2323_v48 = vmul.f32 1.442695, %v2298_v46  ;;  %v2300_v30 = vsub.f32 %v5425_v28, %v5480_v37  ;;  %v5809_v17 = vld [vmem:[#allocation4_spill] sm:$0xff]  ;;  %v5574_v46 = vld [vmem:[%s5674_s8] ss:$0 sm:$0xff] }
 0xafc   :  { %3653 = vpow2.f32 %v2309_v41  ;;  %v2301_v16 = vsub.f32 %v5467_v10, %v5480_v37  ;;  %v2302_v42 = vsub.f32 %v5457_v61, %v5480_v37  ;;  %v2304_v10 = vsub.f32 %v5439_v31, %v5480_v37 }
 0xafd   :  { %3655 = vpow2.f32 %v2311_v5  ;;  %v2325_v56 = vmul.f32 1.442695, %v2299_v34  ;;  %v2327_v28 = vmul.f32 1.442695, %v2300_v30  ;;  %v2303_v61 = vsub.f32 %v5454_v60, %v5480_v37 }
 0xafe   :  { %3657 = vpow2.f32 %v2313_v12  ;;  %v2329_v25 = vmul.f32 1.442695, %v2301_v16  ;;  %v2331_v7 = vmul.f32 1.442695, %v2302_v42  ;;  %v2335_v13 = vmul.f32 1.442695, %v2304_v10 }
 0xaff   :  { %3659 = vpow2.f32 %v2315_v43  ;;  %v2333_v31 = vmul.f32 1.442695, %v2303_v61  ;;  %v5813_v16 = vld [vmem:[#allocation8_spill] sm:$0xff]  ;;  %v5817_v10 = vld [vmem:[#allocation30_spill] sm:$0xff]  ;;  %v5820_v61 = vld [vmem:[#allocation33_spill] sm:$0xff] }
 0xb00   :  { %3661 = vpow2.f32 %v2317_v58  ;;  %v5808_v58 = vld [vmem:[#allocation6_spill] sm:$0xff]  ;;  %v5815_v42 = vld [vmem:[#allocation28_spill] sm:$0xff] }
 0xb01   :  { %3663 = vpow2.f32 %v2319_v23 }
 0xb02   :  { %3665 = vpow2.f32 %v2321_v1 }
 0xb03   :  { %3667 = vpow2.f32 %v2323_v48 }
 0xb04   :  { %v5498_v52 = vpop.eup %3649  ;;  %3669 = vpow2.f32 %v2325_v56  ;;  %v5812_v56 = vld [vmem:[#allocation10_spill] sm:$0xff] }
 0xb05   :  { %v5500_v27 = vpop.eup %3651  ;;  %3671 = vpow2.f32 %v2327_v28  ;;  %v5814_v28 = vld [vmem:[#allocation27_spill] sm:$0xff] }
 0xb06   :  { %v5506_v0 = vpop.eup %3653  ;;  %v3540_v9 = vpack.c.bf16 %v5500_v27, %v5498_v52  ;;  %3673 = vpow2.f32 %v2329_v25  ;;  %v5818_v25 = vld [vmem:[#allocation31_spill] sm:$0xff] }
 0xb07   :  { %v5510_v3 = vpop.eup %3655  ;;  %3675 = vpow2.f32 %v2331_v7  ;;  %v5819_v7 = vld [vmem:[#allocation32_spill] sm:$0xff] }
 0xb08   :  { %v5520_v22 = vpop.eup %3657  ;;  %v3543_v4 = vpack.c.bf16 %v5510_v3, %v5506_v0  ;;  %3677 = vpow2.f32 %v2335_v13  ;;  %v5822_v13 = vld [vmem:[#allocation35_spill] sm:$0xff] }
 0xb09   :  { %v5524_v24 = vpop.eup %3659  ;;  %3679 = vpow2.f32 %v2333_v31  ;;  %v5823_v31 = vld [vmem:[#allocation36_spill] sm:$0xff] }
 0xb0a   :  { %v5531_v55 = vpop.eup %3661  ;;  %v3546_v63 = vpack.c.bf16 %v5524_v24, %v5520_v22 }
 0xb0b   :  { %v5535_v26 = vpop.eup %3663 }
 0xb0c   :  { %v5538_v62 = vpop.eup %3665  ;;  %v3549_v15 = vpack.c.bf16 %v5535_v26, %v5531_v55 }
 0xb0d   :  { %v5542_v60 = vpop.eup %3667 }
 0xb0e   :  { %v5545_v37 = vpop.eup %3669  ;;  %v3552_v32 = vpack.c.bf16 %v5542_v60, %v5538_v62 }
 0xb0f   :  { %v5549_v41 = vpop.eup %3671 }
 0xb10   :  { %v5552_v19 = vpop.eup %3673  ;;  %v3555_v5 = vpack.c.bf16 %v5549_v41, %v5545_v37 }
 0xb11   :  { %v5556_v14 = vpop.eup %3675 }
 0xb12   :  { %v5559_v12 = vpop.eup %3677  ;;  %v3558_v11 = vpack.c.bf16 %v5556_v14, %v5552_v19 }
 0xb13   :  { %v5563_v43 = vpop.eup %3679 }
 0xb14   :  { %v3561_v59 = vpack.c.bf16 %v5559_v12, %v5563_v43 }
 0xb4b   :  { %v1894_v38 = vpop.f32.mrb[52].mxu1 }
 0xb4c   :  { %v1900_v6 = vpack.c.bf16 %v1894_v38, %v1894_v38  ;;  %v3360_v40 = vpop.f32.mrb[53].mxu1 }
 0xb4d   :  { %v1897_v51 = vpop.f32.mrb[54].mxu1 }
 0xb4e   :  { %v3361_v54 = vpop.f32.mrb[55].mxu1  ;;  %3367 = vmatmul.mubr.msk.bf16.vlgmr.msra.gmra.mrb[56].mxu1 %vm390_vm0, %v1900_v6 }
 0xb4f   :  { %3541 = vmatpush3.bf16.msra.mxu1 %v3540_v9  ;;  %3434 = vmatprep.mubr.msk.f32.mxu1 %vm3735_vm1, %v5757_v50  ;;  %v5810_v9 = vld [vmem:[#allocation11_spill] sm:$0xff]  ;;  %v5811_v54 = vld [vmem:[#allocation9_spill] sm:$0xff] }
 0xb50   :  { %3542 = vmatprep.subr.bf16.mxu1 %v5756_v44 }
 0xb53   :  { %3544 = vmatpush3.bf16.msra.mxu1 %v3543_v4  ;;  %v5816_v4 = vld [vmem:[#allocation29_spill] sm:$0xff] }
 0xb54   :  { %3545 = vmatprep.subr.bf16.mxu1 %v5756_v44 }
 0xb57   :  { %3547 = vmatpush3.bf16.msra.mxu1 %v3546_v63  ;;  %v5821_v63 = vld [vmem:[#allocation34_spill] sm:$0xff] }
 0xb58   :  { %3548 = vmatprep.subr.bf16.mxu1 %v5756_v44 }
 0xb5b   :  { %3550 = vmatpush3.bf16.msra.mxu1 %v3549_v15  ;;  %v5824_v15 = vld [vmem:[#allocation37_spill] sm:$0xff] }
 0xb5c   :  { %3551 = vmatprep.subr.bf16.mxu1 %v5756_v44 }
 0xb5f   :  { %3553 = vmatpush3.bf16.msra.mxu1 %v3552_v32 }
 0xb60   :  { %3554 = vmatprep.subr.bf16.mxu1 %v5756_v44 }
 0xb63   :  { %3556 = vmatpush3.bf16.msra.mxu1 %v3555_v5 }
 0xb64   :  { %3557 = vmatprep.subr.bf16.mxu1 %v5756_v44 }
 0xb67   :  { %3559 = vmatpush3.bf16.msra.mxu1 %v3558_v11 }
 0xb68   :  { %3560 = vmatprep.subr.bf16.mxu1 %v5756_v44 }
 0xb6b   :  { %3562 = vmatpush3.bf16.msra.mxu1 %v3561_v59 }
 0xb6e   :  { %3435 = vmatmul.mubr.f32.vlgmr.msra.gmra.mrb[60].mxu1 %v5808_v58 }
 0xb6f   :  { %3439 = vmatprep.mubr.msk.f32.mxu1 %vm707_vm3, %v5809_v17 }
 0xc21   :  { %v1938_v23 = vpop.f32.mrb[56].mxu1 }
 0xc22   :  { %v1939_v38 = vadd.f32 %v5574_v46, %v1938_v23  ;;  %v3368_v1 = vpop.f32.mrb[57].mxu1 }
 0xc23   :  { %v1941_v34 = vpop.f32.mrb[58].mxu1 }
 0xc24   :  { %3681 = vtanh.f32 %v1939_v38  ;;  %v3369_v44 = vpop.f32.mrb[59].mxu1 }
 0xc2e   :  { %v3682_v6 = vpop.eup %3681 }
 0xc2f   :  { %2857 = vst.msk [vmem:[%s5675_s10 + $0x2] sm:$0x3] %vm1144_vm5, %v3682_v6 }
 0xc41   :  { %v2403_v40 = vpop.f32.mrb[60].mxu1 }
 0xc42   :  { %v2407_v48 = vmax.f32 %v2403_v40, 1e-30  ;;  %v3436_v30 = vpop.f32.mrb[61].mxu1 }
 0xc44   :  { %3683 = vrcp.f32 %v2407_v48 }
 0xc4e   :  { %v3684_v51 = vpop.eup %3683 }
 0xc4f   :  { %3437 = vmatprep.subr.msk.mxu1 %vm756_vm4, %v3684_v51 }
 0xc50   :  { %3438 = vmatpush3.msk.msra.mxu1 %vm756_vm4, %v3684_v51 }
 0xc51   :  { %3440 = vmatmul.mubr.msk.f32.vlgmr.msra.gmra.mrb[62].mxu1 %vm707_vm3, %v5810_v9 }
 0xc52   :  { %3442 = vmatprep.mubr.msk.f32.mxu1 %vm707_vm3, %v5811_v54 }
 0xc55   :  { %3443 = vmatmul.mubr.msk.f32.gmra.mrb[64].mxu1 %vm707_vm3, %v5812_v56 }
 0xc56   :  { %3445 = vmatprep.mubr.msk.f32.mxu1 %vm707_vm3, %v5813_v16 }
 0xc59   :  { %3446 = vmatmul.mubr.msk.f32.gmra.mrb[66].mxu1 %vm707_vm3, %v5814_v28 }
 0xc5a   :  { %3448 = vmatprep.mubr.msk.f32.mxu1 %vm707_vm3, %v5815_v42 }
 0xc5d   :  { %3449 = vmatmul.mubr.msk.f32.gmra.mrb[68].mxu1 %vm707_vm3, %v5816_v4 }
 0xc5e   :  { %3451 = vmatprep.mubr.msk.f32.mxu1 %vm707_vm3, %v5817_v10 }
 0xc61   :  { %3452 = vmatmul.mubr.msk.f32.gmra.mrb[70].mxu1 %vm707_vm3, %v5818_v25 }
 0xc62   :  { %3454 = vmatprep.mubr.msk.f32.mxu1 %vm707_vm3, %v5819_v7 }
 0xc65   :  { %3455 = vmatmul.mubr.msk.f32.gmra.mrb[72].mxu1 %vm707_vm3, %v5820_v61 }
 0xc66   :  { %3457 = vmatprep.mubr.msk.f32.mxu1 %vm707_vm3, %v5821_v63 }
 0xc69   :  { %3458 = vmatmul.mubr.msk.f32.gmra.mrb[74].mxu1 %vm707_vm3, %v5822_v13 }
 0xc6a   :  { %3460 = vmatprep.mubr.msk.f32.mxu1 %vm707_vm3, %v5823_v31 }
 0xc6d   :  { %3461 = vmatmul.mubr.msk.f32.gmra.mrb[76].mxu1 %vm707_vm3, %v5824_v15 }
 0xd24   :  { %v3441_v32 = vpop.f32.mrb[62].mxu1 }
 0xd25   :  { %v2559_v5 = vmul.f32 %v5500_v27, %v3441_v32  ;;  %v2479_v11 = vpop.f32.mrb[63].mxu1 }
 0xd26   :  { %v2558_v59 = vmul.f32 %v5498_v52, %v2479_v11 }
 0xd27   :  { %2581 = vperm.xlu1 %3568, %v2559_v5  }
 0xd28   :  { %2576 = vperm.xlu0 %3567, %v2558_v59   ;;  %v3444_v58 = vpop.f32.mrb[64].mxu1 }
 0xd29   :  { %v2561_v17 = vmul.f32 %v5510_v3, %v3444_v58  ;;  %v2489_v23 = vpop.f32.mrb[65].mxu1 }
 0xd2a   :  { %v2560_v38 = vmul.f32 %v5506_v0, %v2489_v23 }
 0xd2c   :  { %2591 = vperm.xlu0 %3567, %v2561_v17   ;;  %2586 = vperm.xlu1 %3568, %v2560_v38   ;;  %v3447_v1 = vpop.f32.mrb[66].mxu1 }
 0xd2d   :  { %v2563_v34 = vmul.f32 %v5524_v24, %v3447_v1  ;;  %v2499_v44 = vpop.f32.mrb[67].mxu1 }
 0xd2e   :  { %v2562_v6 = vmul.f32 %v5520_v22, %v2499_v44 }
 0xd30   :  { %2601 = vperm.xlu0 %3567, %v2563_v34   ;;  %2596 = vperm.xlu1 %3568, %v2562_v6   ;;  %v3450_v27 = vpop.f32.mrb[68].mxu1 }
 0xd31   :  { %v2565_v52 = vmul.f32 %v5535_v26, %v3450_v27  ;;  %v2509_v40 = vpop.f32.mrb[69].mxu1  ;;  %v5825_v27 = vld [vmem:[#allocation7_spill] sm:$0xff] }
 0xd32   :  { %v2564_v48 = vmul.f32 %v5531_v55, %v2509_v40  ;;  %v5828_v40 = vld [vmem:[#allocation14_spill] sm:$0xff] }
 0xd34   :  { %2611 = vperm.xlu0 %3567, %v2565_v52   ;;  %2606 = vperm.xlu1 %3568, %v2564_v48   ;;  %v3453_v3 = vpop.f32.mrb[70].mxu1 }
 0xd35   :  { %v2567_v0 = vmul.f32 %v5542_v60, %v3453_v3  ;;  %v2519_v30 = vpop.f32.mrb[71].mxu1 }
 0xd36   :  { %v2566_v51 = vmul.f32 %v5538_v62, %v2519_v30 }
 0xd38   :  { %2621 = vperm.xlu0 %3567, %v2567_v0   ;;  %2616 = vperm.xlu1 %3568, %v2566_v51   ;;  %v3456_v24 = vpop.f32.mrb[72].mxu1 }
 0xd39   :  { %v2569_v22 = vmul.f32 %v5549_v41, %v3456_v24  ;;  %v2529_v9 = vpop.f32.mrb[73].mxu1 }
 0xd3a   :  { %v2568_v54 = vmul.f32 %v5545_v37, %v2529_v9 }
 0xd3c   :  { %2631 = vperm.xlu0 %3567, %v2569_v22   ;;  %2626 = vperm.xlu1 %3568, %v2568_v54   ;;  %v3459_v26 = vpop.f32.mrb[74].mxu1 }
 0xd3d   :  { %v2571_v55 = vmul.f32 %v5556_v14, %v3459_v26  ;;  %v2539_v56 = vpop.f32.mrb[75].mxu1 }
 0xd3e   :  { %v2570_v16 = vmul.f32 %v5552_v19, %v2539_v56 }
 0xd40   :  { %2641 = vperm.xlu0 %3567, %v2571_v55   ;;  %2636 = vperm.xlu1 %3568, %v2570_v16   ;;  %v3462_v60 = vpop.f32.mrb[76].mxu1 }
 0xd41   :  { %v2573_v62 = vmul.f32 %v5559_v12, %v3462_v60  ;;  %v2549_v28 = vpop.f32.mrb[77].mxu1 }
 0xd42   :  { %v2572_v42 = vmul.f32 %v5563_v43, %v2549_v28 }
 0xd44   :  { %2651 = vperm.xlu0 %3567, %v2573_v62   ;;  %2646 = vperm.xlu1 %3568, %v2572_v42  }
 0xda6   :  { %v2582_v41 = vpop.permute.xlu1 %2581 }
 0xda7   :  { %v2655_v37 = vmul.f32 %v2582_v41, %v4744_v57  ;;  %v2577_v4 = vpop.permute.xlu0 %2576 }
 0xda8   :  { %v2654_v10 = vmul.f32 %v2577_v4, %v4721_v47 }
 0xdaa   :  { %v2670_v14 = vpack.c.bf16 %v2655_v37, %v2654_v10 }
 0xdab   :  { %v2592_v25 = vpop.permute.xlu0 %2591  ;;  %v2587_v7 = vpop.permute.xlu1 %2586 }
 0xdac   :  { %v2657_v19 = vmul.f32 %v2592_v25, %v4731_v45  ;;  %v2656_v61 = vmul.f32 %v2587_v7, %v4715_v39  ;;  %3464 = vmatpush3.bf16.msra.mxu0 %v2670_v14 }
 0xdad   :  { %3465 = vmatprep.subr.bf16.mxu0 %v5757_v50 }
 0xdae   :  { %v2671_v12 = vpack.c.bf16 %v2657_v19, %v2656_v61 }
 0xdaf   :  { %v2602_v43 = vpop.permute.xlu0 %2601  ;;  %v2597_v63 = vpop.permute.xlu1 %2596 }
 0xdb0   :  { %v2659_v13 = vmul.f32 %v2602_v43, %v4795_v29  ;;  %v2658_v57 = vmul.f32 %v2597_v63, %v4772_v2  ;;  %3466 = vmatpush3.bf16.msra.mxu0 %v2671_v12 }
 0xdb1   :  { %3467 = vmatprep.subr.bf16.mxu0 %v5757_v50 }
 0xdb2   :  { %v2672_v47 = vpack.c.bf16 %v2659_v13, %v2658_v57 }
 0xdb3   :  { %v2612_v31 = vpop.permute.xlu0 %2611  ;;  %v2607_v15 = vpop.permute.xlu1 %2606 }
 0xdb4   :  { %v2661_v45 = vmul.f32 %v2612_v31, %v4784_v33  ;;  %v2660_v39 = vmul.f32 %v2607_v15, %v4767_v20  ;;  %3468 = vmatpush3.bf16.msra.mxu0 %v2672_v47 }
 0xdb5   :  { %3469 = vmatprep.subr.bf16.mxu0 %v5757_v50 }
 0xdb6   :  { %v2673_v32 = vpack.c.bf16 %v2661_v45, %v2660_v39 }
 0xdb7   :  { %v2622_v5 = vpop.permute.xlu0 %2621  ;;  %v2617_v11 = vpop.permute.xlu1 %2616 }
 0xdb8   :  { %v2663_v29 = vmul.f32 %v2622_v5, %v4847_v53  ;;  %v2662_v2 = vmul.f32 %v2617_v11, %v4824_v8  ;;  %3470 = vmatpush3.bf16.msra.mxu0 %v2673_v32 }
 0xdb9   :  { %3471 = vmatprep.subr.bf16.mxu0 %v5757_v50 }
 0xdba   :  { %v2674_v59 = vpack.c.bf16 %v2663_v29, %v2662_v2 }
 0xdbb   :  { %v2632_v58 = vpop.permute.xlu0 %2631  ;;  %v2627_v17 = vpop.permute.xlu1 %2626 }
 0xdbc   :  { %v2665_v33 = vmul.f32 %v2632_v58, %v4836_v36  ;;  %v2664_v20 = vmul.f32 %v2627_v17, %v4818_v35  ;;  %3472 = vmatpush3.bf16.msra.mxu0 %v2674_v59 }
 0xdbd   :  { %3473 = vmatprep.subr.bf16.mxu0 %v5757_v50 }
 0xdbe   :  { %v2675_v23 = vpack.c.bf16 %v2665_v33, %v2664_v20 }
 0xdbf   :  { %v2642_v38 = vpop.permute.xlu0 %2641  ;;  %v2637_v1 = vpop.permute.xlu1 %2636 }
 0xdc0   :  { %v2667_v53 = vmul.f32 %v2642_v38, %v4899_v21  ;;  %v2666_v8 = vmul.f32 %v2637_v1, %v4876_v49  ;;  %3474 = vmatpush3.bf16.msra.mxu0 %v2675_v23  ;;  %v5826_v21 = vld [vmem:[#allocation3_spill] sm:$0xff]  ;;  %v5827_v49 = vld [vmem:[#allocation13_spill] sm:$0xff] }
 0xdc1   :  { %3475 = vmatprep.subr.bf16.mxu0 %v5757_v50 }
 0xdc2   :  { %v2676_v34 = vpack.c.bf16 %v2667_v53, %v2666_v8 }
 0xdc3   :  { %v2652_v44 = vpop.permute.xlu0 %2651  ;;  %v2647_v6 = vpop.permute.xlu1 %2646 }
 0xdc4   :  { %v2669_v36 = vmul.f32 %v2652_v44, %v4888_v18  ;;  %v2668_v35 = vmul.f32 %v2647_v6, %v5825_v27  ;;  %3476 = vmatpush3.bf16.msra.mxu0 %v2676_v34 }
 0xdc5   :  { %3477 = vmatprep.subr.bf16.mxu0 %v5757_v50 }
 0xdc6   :  { %v2677_v52 = vpack.c.bf16 %v2669_v36, %v2668_v35 }
 0xdc8   :  { %3478 = vmatpush3.bf16.msra.mxu0 %v2677_v52 }
 0xdc9   :  { %3483 = vmatprep.subr.bf16.mxu0 %v5757_v50 }
 0xdcb   :  { %3480 = vmatmul.mubr.bf16.vlgmr.msra.gmra.mrb[56].mxu0 %v5826_v21 }
 0xdcc   :  { %3484 = vmatpush3.bf16.msra.mxu0 %v5827_v49  ;;  %3487 = vmatprep.mubr.msk.bf16.mxu0 %vm3735_vm1, %v5757_v50 }
 0xdcd   :  { %3485 = vmatprep.subr.bf16.mxu0 %v5757_v50 }
 0xdd0   :  { %3486 = vmatpush3.bf16.msra.mxu0 %v5828_v40 }
 0xe9e   :  { %v2712_v18 = vpop.f32.mrb[56].mxu0 }
 0xe9f   :  { %v2718_v48 = vpack.c.bf16 %v2712_v18, %v2712_v18  ;;  %v3481_v3 = vpop.f32.mrb[57].mxu0 }
 0xea0   :  { %v2715_v0 = vpop.f32.mrb[58].mxu0 }
 0xea1   :  { %v3482_v30 = vpop.f32.mrb[59].mxu0  ;;  %3488 = vmatmul.mubr.msk.bf16.vlgmr.msra.gmra.mrb[60].mxu0 %vm390_vm0, %v2718_v48 }
 0xf74   :  { %v2756_v51 = vpop.f32.mrb[60].mxu0 }
 0xf75   :  { %v2757_v24 = vadd.f32 %v5574_v46, %v2756_v51  ;;  %v3489_v22 = vpop.f32.mrb[61].mxu0 }
 0xf76   :  { %v2759_v9 = vpop.f32.mrb[62].mxu0 }
 0xf77   :  { %3685 = vtanh.f32 %v2757_v24  ;;  %v3490_v54 = vpop.f32.mrb[63].mxu0 }
 0xf81   :  { %v3686_v26 = vpop.eup %3685 }
 0xf82   :  { %2893 = vst.msk [vmem:[%s5675_s10 + $0x4] sm:$0x3] %vm1144_vm5, %v3686_v26 }

// kernel: dmpnn_forward.16
= control target key start
LH: loop header
LB: loop body
LE: loop exit
PB: predicated region body
PF: predicated region fallthrough
CT: control target
= control target key end

     0   :  { %v422_v0 = vmov 0   ;;  %vm30_vm0 = vcmask 1043456   ;;  %vm39_vm1 = vcmask 523264   ;;  %vm41_vm2 = vcmask 519168   ;;  %s575_s3 = inlined_call_operand.<no memory space> [shape: f32[1,1], index: 3, kind: input, shape index: {}]   ;;  %s576_s4 = inlined_call_operand.vmem [shape: bf16[192,192], index: 4, kind: input, shape index: {}]   ;;  %s577_s0 = inlined_call_operand.vmem [shape: f32[12,192], index: 0, kind: input, shape index: {}]   ;;  %s578_s1 = inlined_call_operand.vmem [shape: f32[1,192], index: 1, kind: input, shape index: {}]   ;;  %s579_s2 = inlined_call_operand.vmem [shape: f32[1,192], index: 2, kind: input, shape index: {}]   ;;  %s580_s5 = inlined_call_operand.vmem [shape: f32[1,192], index: 5, kind: input, shape index: {}]   ;;  %s581_s6 = inlined_call_operand.vmem [shape: f32[12,192], index: 6, kind: output, shape index: {}]  }
   0x1   :  { %381 = vset.pattern.permute.xlu0 %v422_v0  ;;  %v11_v1 = vstv %s575_s3  ;;  %v382_v2 = vld [vmem:[%s576_s4 + $0x4] ss:$8 sps:$4 sm:$0xff]   ;;  %v384_v3 = vld [vmem:[%s576_s4] ss:$8 sps:$4 sm:$0xff]   ;;  %v385_v4 = vld [vmem:[%s576_s4 + $0x14] ss:$8 sps:$4 sm:$0xff]  }
   0x2   :  { %12 = vst [vmem:[#allocation2] sm:$0x1] %v11_v1  ;;  %303 = vmatprep.subr.bf16.mxu0 %v382_v2  ;;  %v387_v5 = vld [vmem:[%s576_s4 + $0x10] ss:$8 sps:$4 sm:$0xff]   ;;  %v388_v6 = vld [vmem:[%s576_s4 + $0x24] ss:$8 sps:$4 sm:$0xff]  }
   0x3   :  { %304 = vmatpush1.bf16.msra.mxu0 %v384_v3  ;;  %v390_v7 = vld [vmem:[%s576_s4 + $0x20] ss:$8 sps:$4 sm:$0xff]   ;;  %v391_v8 = vld [vmem:[%s576_s4 + $0x34] ss:$8 sps:$4 sm:$0xff]   ;;  %v393_v10 = vld [vmem:[%s576_s4 + $0x30] ss:$8 sps:$4 sm:$0xff]  }
   0x4   :  { %305 = vmatprep.subr.bf16.mxu0 %v385_v4  ;;  %v394_v11 = vld [vmem:[%s576_s4 + $0x44] ss:$8 sps:$4 sm:$0xff]   ;;  %v396_v12 = vld [vmem:[%s576_s4 + $0x40] ss:$8 sps:$4 sm:$0xff]   ;;  %v397_v13 = vld [vmem:[%s576_s4 + $0x54] ss:$8 sps:$4 sm:$0xff]  }
   0x5   :  { %v399_v14 = vld [vmem:[%s576_s4 + $0x50] ss:$8 sps:$4 sm:$0xff]   ;;  %v400_v15 = vld [vmem:[%s576_s4 + $0x64] ss:$8 sps:$4 sm:$0xff]   ;;  %v402_v16 = vld [vmem:[%s576_s4 + $0x60] ss:$8 sps:$4 sm:$0xff]  }
   0x6   :  { %v403_v17 = vld [vmem:[%s576_s4 + $0x74] ss:$8 sps:$4 sm:$0xff]   ;;  %v28_v18 = vld [vmem:[%s577_s0 + $0x10] sm:$0xf]  ;;  %v27_v19 = vld [vmem:[%s577_s0 + $0x8] sm:$0xff] }
   0x7   :  { %306 = vmatpush1.bf16.msra.mxu0 %v387_v5  ;;  %v29_v20 = vld [vmem:[%s577_s0 + $0x18] sm:$0xf]  ;;  %v406_v22 = vld [vmem:[%s576_s4 + $0x84] ss:$8 sps:$4 sm:$0xff]   ;;  %v31_v24 = vsel %vm30_vm0, %v28_v18, 0.0  ;;  %v40_v25 = vsel %vm39_vm1, %v27_v19, 0.0 }
   0x8   :  { %307 = vmatprep.subr.bf16.mxu0 %v388_v6  ;;  %v405_v21 = vld [vmem:[%s576_s4 + $0x70] ss:$8 sps:$4 sm:$0xff]   ;;  %v26_v23 = vld [vmem:[%s577_s0] sm:$0xff]  ;;  %v42_v26 = vsel %vm41_vm2, %v29_v20, 0.0  ;;  %v409_v29 = vld [vmem:[%s576_s4 + $0x94] ss:$8 sps:$4 sm:$0xff]  }
   0x9   :  { %v354_v9 = vld [vmem:[#allocation2] ss:$0 sm:$0xff]  ;;  %v32_v28 = vadd.f32 %v31_v24, %v26_v23  ;;  %v43_v30 = vadd.f32 %v42_v26, %v40_v25  ;;  %v411_v31 = vld [vmem:[%s576_s4 + $0x90] ss:$8 sps:$4 sm:$0xff]   ;;  %v412_v33 = vld [vmem:[%s576_s4 + $0xa4] ss:$8 sps:$4 sm:$0xff]  }
   0xa   :  { %131 = vperm.xlu0 %381, %v354_v9   ;;  %v408_v27 = vld [vmem:[%s576_s4 + $0x80] ss:$8 sps:$4 sm:$0xff]   ;;  %v415_v38 = vld [vmem:[%s576_s4 + $0xb4] ss:$8 sps:$4 sm:$0xff]   ;;  %v417_v40 = vld [vmem:[%s576_s4 + $0xb0] ss:$8 sps:$4 sm:$0xff]  }
   0xb   :  { %308 = vmatpush1.bf16.msra.mxu0 %v390_v7  ;;  %v33_v32 = vrot.slane %v32_v28, 4  ;;  %v44_v34 = vrot.slane %v43_v30, 4  ;;  %v414_v35 = vld [vmem:[%s576_s4 + $0xa0] ss:$8 sps:$4 sm:$0xff]  }
   0xc   :  { %309 = vmatprep.subr.bf16.mxu0 %v391_v8 }
   0xd   :  { %v34_v36 = vadd.f32 %v33_v32, %v32_v28  ;;  %v45_v37 = vadd.f32 %v44_v34, %v43_v30  ;;  %v104_v28 = vld [vmem:[%s579_s2] sm:$0x3] }
   0xf   :  { %310 = vmatpush1.bf16.msra.mxu0 %v393_v10  ;;  %v35_v39 = vrot.slane %v34_v36, 2  ;;  %v46_v41 = vrot.slane %v45_v37, 2 }
  0x10   :  { %311 = vmatprep.subr.bf16.mxu0 %v394_v11 }
  0x11   :  { %v36_v42 = vadd.f32 %v35_v39, %v34_v36  ;;  %v47_v43 = vadd.f32 %v46_v41, %v45_v37 }
  0x13   :  { %312 = vmatpush1.bf16.msra.mxu0 %v396_v12  ;;  %v37_v44 = vrot.slane %v36_v42, 1  ;;  %v48_v45 = vrot.slane %v47_v43, 1 }
  0x14   :  { %313 = vmatprep.subr.bf16.mxu0 %v397_v13 }
  0x15   :  { %v38_v46 = vadd.f32 %v37_v44, %v36_v42  ;;  %v49_v47 = vadd.f32 %v48_v45, %v47_v43 }
  0x17   :  { %314 = vmatpush1.bf16.msra.mxu0 %v399_v14  ;;  %v51_v48 = vmul.f32 0.083333336, %v38_v46  ;;  %v52_v49 = vmul.f32 0.083333336, %v49_v47 }
  0x18   :  { %315 = vmatprep.subr.bf16.mxu0 %v400_v15  ;;  %v90_v15 = vlaneseq }
  0x19   :  { %v55_v50 = vsub.f32 %v28_v18, %v51_v48  ;;  %v54_v51 = vsub.f32 %v27_v19, %v52_v49  ;;  %v56_v52 = vsub.f32 %v29_v20, %v52_v49  ;;  %v53_v53 = vsub.f32 %v26_v23, %v51_v48  ;;  %v88_v20 = vld [vmem:[%s578_s1] sm:$0x3] }
  0x1b   :  { %316 = vmatpush1.bf16.msra.mxu0 %v402_v16  ;;  %v59_v54 = vmul.f32 %v55_v50, %v55_v50  ;;  %v58_v55 = vmul.f32 %v54_v51, %v54_v51  ;;  %v60_v56 = vmul.f32 %v56_v52, %v56_v52  ;;  %v57_v57 = vmul.f32 %v53_v53, %v53_v53 }
  0x1c   :  { %317 = vmatprep.subr.bf16.mxu0 %v403_v17  ;;  %v91_v16 = vshrl.u32 %v90_v15, 7 }
  0x1d   :  { %v61_v58 = vsel %vm30_vm0, %v59_v54, 0.0  ;;  %v69_v59 = vsel %vm39_vm1, %v58_v55, 0.0  ;;  %v70_v60 = vsel %vm41_vm2, %v60_v56, 0.0 }
  0x1e   :  { %v62_v61 = vadd.f32 %v61_v58, %v57_v57  ;;  %v71_v62 = vadd.f32 %v70_v60, %v69_v59  ;;  %v92_v17 = vsub.s32 0, %v91_v16  ;;  %v96_v18 = vsub.s32 1, %v91_v16 }
  0x1f   :  { %318 = vmatpush1.bf16.msra.mxu0 %v405_v21 }
  0x20   :  { %319 = vmatprep.subr.bf16.mxu0 %v406_v22  ;;  %v63_v63 = vrot.slane %v62_v61, 4  ;;  %v72_v0 = vrot.slane %v71_v62, 4  ;;  %v93_v22 = vrot.slane %v88_v20, %v92_v17  ;;  %v97_v23 = vrot.slane %v88_v20, %v96_v18 }
  0x21   :  { %v113_v30 = vrot.slane %v104_v28, %v96_v18 }
  0x22   :  { %v64_v1 = vadd.f32 %v63_v63, %v62_v61  ;;  %v73_v2 = vadd.f32 %v72_v0, %v71_v62 }
  0x23   :  { %320 = vmatpush1.bf16.msra.mxu0 %v408_v27 }
  0x24   :  { %321 = vmatprep.subr.bf16.mxu0 %v409_v29  ;;  %v65_v3 = vrot.slane %v64_v1, 2  ;;  %v74_v4 = vrot.slane %v73_v2, 2  ;;  %v109_v29 = vrot.slane %v104_v28, %v92_v17 }
  0x26   :  { %v66_v5 = vadd.f32 %v65_v3, %v64_v1  ;;  %v75_v6 = vadd.f32 %v74_v4, %v73_v2 }
  0x27   :  { %322 = vmatpush1.bf16.msra.mxu0 %v411_v31 }
  0x28   :  { %323 = vmatprep.subr.bf16.mxu0 %v412_v33  ;;  %v67_v7 = vrot.slane %v66_v5, 1  ;;  %v76_v8 = vrot.slane %v75_v6, 1 }
  0x2a   :  { %v68_v9 = vadd.f32 %v67_v7, %v66_v5  ;;  %v77_v10 = vadd.f32 %v76_v8, %v75_v6 }
  0x2b   :  { %324 = vmatpush1.bf16.msra.mxu0 %v414_v35 }
  0x2c   :  { %325 = vmatprep.subr.bf16.mxu0 %v415_v38  ;;  %v78_v11 = vmul.f32 0.083333336, %v68_v9  ;;  %v79_v12 = vmul.f32 0.083333336, %v77_v10 }
  0x2e   :  { %v80_v13 = vadd.f32 1e-05, %v78_v11  ;;  %v81_v14 = vadd.f32 1e-05, %v79_v12 }
  0x2f   :  { %326 = vmatpush1.bf16.msra.mxu0 %v417_v40 }
  0x30   :  { %418 = vrsqrt.f32 %v80_v13 }
  0x31   :  { %420 = vrsqrt.f32 %v81_v14 }
  0x3a   :  { %v419_v19 = vpop.eup %418 }
  0x3b   :  { %v421_v21 = vpop.eup %420  ;;  %v84_v24 = vmul.f32 %v419_v19, %v53_v53  ;;  %v86_v26 = vmul.f32 %v419_v19, %v55_v50  ;;  %v168_v50 = vld [vmem:[%s580_s5] sm:$0x3] }
  0x3c   :  { %v85_v25 = vmul.f32 %v421_v21, %v54_v51  ;;  %v87_v27 = vmul.f32 %v421_v21, %v56_v52  ;;  %v173_v51 = vrot.slane %v168_v50, %v92_v17  ;;  %v177_v52 = vrot.slane %v168_v50, %v96_v18 }
  0x3d   :  { %v100_v31 = vmul.f32 %v93_v22, %v84_v24  ;;  %v102_v33 = vmul.f32 %v93_v22, %v86_v26 }
  0x3e   :  { %v101_v32 = vmul.f32 %v97_v23, %v85_v25  ;;  %v103_v34 = vmul.f32 %v97_v23, %v87_v27 }
  0x3f   :  { %v116_v35 = vadd.f32 %v109_v29, %v100_v31  ;;  %v118_v37 = vadd.f32 %v109_v29, %v102_v33 }
  0x40   :  { %v117_v36 = vadd.f32 %v113_v30, %v101_v32  ;;  %v119_v38 = vadd.f32 %v113_v30, %v103_v34 }
  0x41   :  { %vm120_vm5 = vcmp.ge.f32.partialorder %v116_v35, 0.0  ;;  %vm122_vm6 = vcmp.ge.f32.partialorder %v118_v37, 0.0 }
  0x42   :  { %vm121_vm3 = vcmp.ge.f32.partialorder %v117_v36, 0.0  ;;  %vm123_vm4 = vcmp.ge.f32.partialorder %v119_v38, 0.0 }
  0x89   :  { %v132_v39 = vpop.permute.xlu0 %131 }
  0x8a   :  { %v134_v40 = vmul.f32 %v132_v39, %v116_v35  ;;  %v135_v41 = vmul.f32 %v132_v39, %v117_v36  ;;  %v136_v42 = vmul.f32 %v132_v39, %v118_v37  ;;  %v137_v43 = vmul.f32 %v132_v39, %v119_v38 }
  0x8c   :  { %v139_v44 = vsel %vm121_vm3, %v117_v36, %v135_v41  ;;  %v141_v45 = vsel %vm123_vm4, %v119_v38, %v137_v43  ;;  %v138_v46 = vsel %vm120_vm5, %v116_v35, %v134_v40  ;;  %v140_v47 = vsel %vm122_vm6, %v118_v37, %v136_v42 }
  0x8d   :  { %v143_v48 = vpack.c.bf16 %v141_v45, %v139_v44  ;;  %v142_v49 = vpack.c.bf16 %v140_v47, %v138_v46 }
  0x8f   :  { %379 = vmatprep.mubr.msk.bf16.mxu0 %vm39_vm1, %v143_v48 }
  0x90   :  { %336 = vmatmul.mubr.bf16.vlgmr.msra.gmra.mrb[0].mxu0 %v142_v49 }
 0x163   :  { %v337_v53 = vpop.f32.mrb[0].mxu0 }
 0x164   :  { %v338_v54 = vadd.f32 %v337_v53, %v173_v51  ;;  %v339_v55 = vpop.f32.mrb[1].mxu0 }
 0x165   :  { %v340_v56 = vadd.f32 %v339_v55, %v177_v52  ;;  %v341_v57 = vpop.f32.mrb[2].mxu0 }
 0x166   :  { %346 = vst [vmem:[%s581_s6] sm:$0xff] %v338_v54  ;;  %v342_v58 = vadd.f32 %v341_v57, %v173_v51  ;;  %v343_v59 = vpop.f32.mrb[3].mxu0 }
 0x167   :  { %347 = vst.msk [vmem:[%s581_s6 + $0x8] sm:$0xff] %vm39_vm1, %v340_v56  ;;  %v344_v60 = vadd.f32 %v343_v59, %v177_v52 }
 0x168   :  { %348 = vst [vmem:[%s581_s6 + $0x10] sm:$0xf] %v342_v58 }
 0x169   :  { %349 = vst.msk [vmem:[%s581_s6 + $0x18] sm:$0xf] %vm41_vm2, %v344_v60 }

// kernel: dmpnn_forward.19
= control target key start
LH: loop header
LB: loop body
LE: loop exit
PB: predicated region body
PF: predicated region fallthrough
CT: control target
= control target key end

     0   :  { %s490_s0 = inlined_call_operand.vmem [shape: f32[12,192], index: 0, kind: input, shape index: {}]   ;;  %s491_s1 = inlined_call_operand.vmem [shape: f32[1,192], index: 1, kind: input, shape index: {}]   ;;  %s492_s2 = inlined_call_operand.vmem [shape: f32[1,192], index: 2, kind: input, shape index: {}]   ;;  %s493_s3 = inlined_call_operand.<no memory space> [shape: f32[1,1], index: 3, kind: input, shape index: {}]   ;;  %s494_s4 = inlined_call_operand.vmem [shape: bf16[192,32], index: 4, kind: input, shape index: {}]   ;;  %s495_s5 = inlined_call_operand.vmem [shape: f32[1,32], index: 5, kind: input, shape index: {}]   ;;  %s496_s6 = inlined_call_operand.hbm [shape: f32[12,32], index: 6, kind: output, shape index: {}]  }
   0x1   :  { %v11_v0 = vstv %s493_s3 }
   0x2   :  { %12 = vst [vmem:[#allocation2] sm:$0x1] %v11_v0 }
   0x3   :  { %v332_v2 = vld [vmem:[%s494_s4] sm:$0xff]   ;;  %v372_v3 = vmov 0   ;;  %v333_v4 = vld [vmem:[%s494_s4 + $0x8] sm:$0xff]   ;;  %v334_v5 = vld [vmem:[%s494_s4 + $0x10] sm:$0xff]  }
   0x4   :  { %331 = vset.pattern.permute.xlu0 %v372_v3  ;;  %251 = vmatprep.subr.bf16.mxu0 %v372_v3  ;;  %v335_v6 = vld [vmem:[%s494_s4 + $0x18] sm:$0xff]   ;;  %v336_v7 = vld [vmem:[%s494_s4 + $0x20] sm:$0xff]  }
   0x5   :  { %252 = vmatpush1.bf16.msra.mxu0 %v332_v2 }
   0x6   :  { %253 = vmatprep.subr.bf16.mxu0 %v372_v3 }
   0x9   :  { %v312_v1 = vld [vmem:[#allocation2] ss:$0 sm:$0xff]  ;;  %254 = vmatpush1.bf16.msra.mxu0 %v333_v4 }
   0xa   :  { %132 = vperm.xlu0 %331, %v312_v1   ;;  %255 = vmatprep.subr.bf16.mxu0 %v372_v3 }
   0xd   :  { %256 = vmatpush1.bf16.msra.mxu0 %v334_v5 }
   0xe   :  { %257 = vmatprep.subr.bf16.mxu0 %v372_v3 }
  0x11   :  { %258 = vmatpush1.bf16.msra.mxu0 %v335_v6 }
  0x12   :  { %259 = vmatprep.subr.bf16.mxu0 %v372_v3 }
  0x13   :  { %13 = vsyncpa [#allocation4], 0  ;;  %v337_v8 = vld [vmem:[%s494_s4 + $0x28] sm:$0xff]   ;;  %v29_v9 = vld [vmem:[%s490_s0 + $0x10] sm:$0xf]  ;;  %vm31_vm0 = vcmask 1043456  }
  0x14   :  { %v28_v10 = vld [vmem:[%s490_s0 + $0x8] sm:$0xff]  ;;  %v30_v11 = vld [vmem:[%s490_s0 + $0x18] sm:$0xf]  ;;  %vm40_vm1 = vcmask 523264   ;;  %vm42_vm2 = vcmask 519168   ;;  %v27_v12 = vld [vmem:[%s490_s0] sm:$0xff] }
  0x15   :  { %260 = vmatpush1.bf16.msra.mxu0 %v336_v7  ;;  %v32_v13 = vsel %vm31_vm0, %v29_v9, 0.0  ;;  %v338_v14 = vld [vmem:[%s494_s4 + $0x30] sm:$0xff]   ;;  %v41_v15 = vsel %vm40_vm1, %v28_v10, 0.0  ;;  %v43_v16 = vsel %vm42_vm2, %v30_v11, 0.0  ;;  %v339_v19 = vld [vmem:[%s494_s4 + $0x38] sm:$0xff]   ;;  %v340_v22 = vld [vmem:[%s494_s4 + $0x40] sm:$0xff]  }
  0x16   :  { %261 = vmatprep.subr.bf16.mxu0 %v372_v3  ;;  %v33_v17 = vadd.f32 %v32_v13, %v27_v12  ;;  %v44_v18 = vadd.f32 %v43_v16, %v41_v15  ;;  %v341_v25 = vld [vmem:[%s494_s4 + $0x48] sm:$0xff]   ;;  %v342_v28 = vld [vmem:[%s494_s4 + $0x50] sm:$0xff]   ;;  %v343_v31 = vld [vmem:[%s494_s4 + $0x58] sm:$0xff]   ;;  %s373_s7 = smov [#allocation3]   ;;  %vm292_vm7 = vcmask 261120   ;;  %vm294_vm8 = vcmask 257024  }
  0x17   :  { %s301_s8 = sshll.u32 %s373_s7, 4  ;;  %s302_s8 = int_to_ptr.vmem [resolvable:$true] %s301_s8 }
  0x18   :  { %v34_v20 = vrot.slane %v33_v17, 4  ;;  %v45_v21 = vrot.slane %v44_v18, 4  ;;  %s348_s9 = scalar_lea.vmem %s302_s8, 256  ;;  %p353_p1 = scmp.lt.s32.totalorder %s302_s8, %s302_s8 }
  0x19   :  { %262 = vmatpush1.bf16.msra.mxu0 %v337_v8  ;;  %v89_v8 = vld [vmem:[%s491_s1] sm:$0x3]  ;;  %p349_p0 = scmp.ne.s32.totalorder %s302_s8, %s348_s9  ;;  %p354_p2 = scmp.lt.s32.totalorder %s348_s9, %s348_s9 }
  0x1a   :  { %263 = vmatprep.subr.bf16.mxu0 %v372_v3  ;;  %v35_v23 = vadd.f32 %v34_v20, %v33_v17  ;;  %v46_v24 = vadd.f32 %v45_v21, %v44_v18 }
  0x1b   :  { %p355_p3 = por %p354_p2, %p353_p1 }
  0x1c   :  { %v36_v26 = vrot.slane %v35_v23, 2  ;;  %v47_v27 = vrot.slane %v46_v24, 2 }
  0x1d   :  { %264 = vmatpush1.bf16.msra.mxu0 %v338_v14  ;;  %v105_v14 = vld [vmem:[%s492_s2] sm:$0x3]  ;;  %p356_p4 = pnand %p355_p3, %p349_p0 }
  0x1e   :  { %265 = vmatprep.subr.bf16.mxu0 %v372_v3  ;;  %v37_v29 = vadd.f32 %v36_v26, %v35_v23  ;;  %v48_v30 = vadd.f32 %v47_v27, %v46_v24 }
  0x20   :  { %v38_v32 = vrot.slane %v37_v29, 1  ;;  %v49_v33 = vrot.slane %v48_v30, 1 }
  0x21   :  { %266 = vmatpush1.bf16.msra.mxu0 %v339_v19 }
  0x22   :  { %267 = vmatprep.subr.bf16.mxu0 %v372_v3  ;;  %v39_v34 = vadd.f32 %v38_v32, %v37_v29  ;;  %v50_v35 = vadd.f32 %v49_v33, %v48_v30 }
  0x24   :  { %v52_v36 = vmul.f32 0.083333336, %v39_v34  ;;  %v53_v37 = vmul.f32 0.083333336, %v50_v35 }
  0x25   :  { %268 = vmatpush1.bf16.msra.mxu0 %v340_v22 }
  0x26   :  { %269 = vmatprep.subr.bf16.mxu0 %v372_v3  ;;  %v56_v38 = vsub.f32 %v29_v9, %v52_v36  ;;  %v55_v39 = vsub.f32 %v28_v10, %v53_v37  ;;  %v57_v40 = vsub.f32 %v30_v11, %v53_v37  ;;  %v54_v41 = vsub.f32 %v27_v12, %v52_v36 }
  0x28   :  { %v60_v42 = vmul.f32 %v56_v38, %v56_v38  ;;  %v59_v43 = vmul.f32 %v55_v39, %v55_v39  ;;  %v61_v44 = vmul.f32 %v57_v40, %v57_v40  ;;  %v58_v45 = vmul.f32 %v54_v41, %v54_v41 }
  0x29   :  { %270 = vmatpush1.bf16.msra.mxu0 %v341_v25 }
  0x2a   :  { %271 = vmatprep.subr.bf16.mxu0 %v372_v3  ;;  %v62_v46 = vsel %vm31_vm0, %v60_v42, 0.0  ;;  %v70_v47 = vsel %vm40_vm1, %v59_v43, 0.0  ;;  %v71_v48 = vsel %vm42_vm2, %v61_v44, 0.0 }
  0x2b   :  { %v63_v49 = vadd.f32 %v62_v46, %v58_v45  ;;  %v72_v50 = vadd.f32 %v71_v48, %v70_v47 }
  0x2d   :  { %272 = vmatpush1.bf16.msra.mxu0 %v342_v28  ;;  %v64_v51 = vrot.slane %v63_v49, 4  ;;  %v73_v52 = vrot.slane %v72_v50, 4 }
  0x2e   :  { %273 = vmatprep.subr.bf16.mxu0 %v372_v3  ;;  %v91_v3 = vlaneseq }
  0x2f   :  { %v65_v53 = vadd.f32 %v64_v51, %v63_v49  ;;  %v74_v54 = vadd.f32 %v73_v52, %v72_v50 }
  0x30   :  { %v92_v4 = vshrl.u32 %v91_v3, 7 }
  0x31   :  { %274 = vmatpush1.bf16.msra.mxu0 %v343_v31  ;;  %v66_v55 = vrot.slane %v65_v53, 2  ;;  %v75_v56 = vrot.slane %v74_v54, 2 }
  0x32   :  { %v93_v5 = vsub.s32 0, %v92_v4  ;;  %v97_v6 = vsub.s32 1, %v92_v4 }
  0x33   :  { %v67_v57 = vadd.f32 %v66_v55, %v65_v53  ;;  %v76_v58 = vadd.f32 %v75_v56, %v74_v54 }
  0x34   :  { %v94_v10 = vrot.slane %v89_v8, %v93_v5  ;;  %v98_v11 = vrot.slane %v89_v8, %v97_v6  ;;  %v110_v17 = vrot.slane %v105_v14, %v93_v5  ;;  %v114_v18 = vrot.slane %v105_v14, %v97_v6 }
  0x35   :  { %v68_v59 = vrot.slane %v67_v57, 1  ;;  %v77_v60 = vrot.slane %v76_v58, 1 }
  0x37   :  { %v69_v61 = vadd.f32 %v68_v59, %v67_v57  ;;  %v78_v62 = vadd.f32 %v77_v60, %v76_v58 }
  0x39   :  { %v79_v63 = vmul.f32 0.083333336, %v69_v61  ;;  %v80_v0 = vmul.f32 0.083333336, %v78_v62 }
  0x3b   :  { %v81_v1 = vadd.f32 1e-05, %v79_v63  ;;  %v82_v2 = vadd.f32 1e-05, %v80_v0 }
  0x3d   :  { %344 = vrsqrt.f32 %v81_v1 }
  0x3e   :  { %346 = vrsqrt.f32 %v82_v2 }
  0x47   :  { %v345_v7 = vpop.eup %344 }
  0x48   :  { %v347_v9 = vpop.eup %346  ;;  %v85_v12 = vmul.f32 %v345_v7, %v54_v41  ;;  %v87_v13 = vmul.f32 %v345_v7, %v56_v38  ;;  %v313_v38 = vld [vmem:[%s495_s5] ss:$0 sm:$0xff] }
  0x49   :  { %v86_v15 = vmul.f32 %v347_v9, %v55_v39  ;;  %v88_v16 = vmul.f32 %v347_v9, %v57_v40 }
  0x4a   :  { %v101_v19 = vmul.f32 %v94_v10, %v85_v12  ;;  %v103_v20 = vmul.f32 %v94_v10, %v87_v13 }
  0x4b   :  { %v102_v21 = vmul.f32 %v98_v11, %v86_v15  ;;  %v104_v22 = vmul.f32 %v98_v11, %v88_v16 }
  0x4c   :  { %v117_v23 = vadd.f32 %v110_v17, %v101_v19  ;;  %v119_v24 = vadd.f32 %v110_v17, %v103_v20 }
  0x4d   :  { %v118_v25 = vadd.f32 %v114_v18, %v102_v21  ;;  %v120_v26 = vadd.f32 %v114_v18, %v104_v22 }
  0x4e   :  { %vm121_vm5 = vcmp.ge.f32.partialorder %v117_v23, 0.0  ;;  %vm123_vm6 = vcmp.ge.f32.partialorder %v119_v24, 0.0 }
  0x4f   :  { %vm122_vm3 = vcmp.ge.f32.partialorder %v118_v25, 0.0  ;;  %vm124_vm4 = vcmp.ge.f32.partialorder %v120_v26, 0.0 }
  0x89   :  { %v133_v27 = vpop.permute.xlu0 %132 }
  0x8a   :  { %v135_v28 = vmul.f32 %v133_v27, %v117_v23  ;;  %v137_v29 = vmul.f32 %v133_v27, %v119_v24  ;;  %v136_v30 = vmul.f32 %v133_v27, %v118_v25  ;;  %v138_v31 = vmul.f32 %v133_v27, %v120_v26 }
  0x8c   :  { %v140_v32 = vsel %vm122_vm3, %v118_v25, %v136_v30  ;;  %v142_v33 = vsel %vm124_vm4, %v120_v26, %v138_v31  ;;  %v139_v34 = vsel %vm121_vm5, %v117_v23, %v135_v28  ;;  %v141_v35 = vsel %vm123_vm6, %v119_v24, %v137_v29 }
  0x8d   :  { %v144_v36 = vpack.c.bf16 %v142_v33, %v140_v32  ;;  %v143_v37 = vpack.c.bf16 %v141_v35, %v139_v34 }
  0x8f   :  { %326 = vmatprep.mubr.msk.bf16.mxu0 %vm40_vm1, %v144_v36 }
  0x90   :  { %284 = vmatmul.mubr.bf16.vlgmr.msra.gmra.mrb[0].mxu0 %v143_v37 }
 0x163   :  { %v285_v39 = vpop.f32.mrb[0].mxu0 }
 0x164   :  { %v286_v40 = vadd.f32 %v313_v38, %v285_v39  ;;  %v287_v41 = vpop.f32.mrb[1].mxu0 }
 0x165   :  { %v288_v42 = vpop.f32.mrb[2].mxu0 }
 0x166   :  { %293 = vst.msk [vmem:[#allocation3] sm:$0xff] %vm292_vm7, %v286_v40  ;;  %v289_v43 = vadd.f32 %v313_v38, %v288_v42  ;;  %v290_v44 = vpop.f32.mrb[3].mxu0 }
 0x168   :  { %295 = vst.msk [vmem:[#allocation3 + $0x8] sm:$0xf] %vm294_vm8, %v289_v43 }
 0x169   :  { %359 = shalt.err (!%p356_p4)
}
 0x16a   :  { %s360_s11 = scalar_lea.hbm %s496_s6, 256 }
 0x16b   :  { %p361_p5 = scmp.ne.s32.totalorder %s496_s6, %s360_s11  ;;  %p364_p6 = scmp.lt.u32.totalorder %s360_s11, %s496_s6 }
 0x16d   :  { %p366_p7 = pnand %p364_p6, %p361_p5 }
 0x16f   :  { %369 = shalt.err (!%p366_p7)
}
 0x170   :  { %s374_s16 = smov 128   ;;  %s375_s17 = smov 8  }
 0x171   :  { %307 = dma.vmem_to_hbm [thread:$0]  %s302_s8, 256, %s496_s6, [#allocation4], %s374_s16, %s374_s16, %s375_s17  }
 0x172   :  { %370 = dma.done.wait [#allocation4], 256  }
 0x173   :  { %371 = vsyncadd [#allocation4], 4294967040 }
 0x174   :  { %311 = vsyncpa [#allocation4], 1 }

</bundles_post_ra>
